<compile_context>
chip_gen: v5e
topology: v5e:2x2
jax: 0.10.0
libtpu: 0.0.40
codegen_flags: <defaults>
</compile_context>

<pallas_src>
import functools

import jax
import jax.numpy as jnp
from jax import lax
from jax.experimental import pallas as pl
from jax.experimental.pallas import tpu as pltpu

_EPS = 1e-5
_LANE = 128


def _round_up(v, m):
    return (v + m - 1) // m * m


# --------------------------------------------------------------------------- #
# Fused Pallas kernel
# --------------------------------------------------------------------------- #
def _last_layer_kernel(
    x_ref,                       # (4*Mph, Cp)  bf16, phase-separated, zero-padded
    g1_ref, b1_ref,              # (1, Cp) f32
    g2_ref, b2_ref,              # (1, Kp) f32
    g3_ref, b3_ref,              # (1, Cp) f32
    w1_ref,                      # (Cp, Kp)   bf16
    w2a_ref,                     # (Kp, 4*Kp) bf16  taps (0,0),(0,2),(2,0),(2,2)  [phase (0,0)]
    w2b_ref,                     # (Kp, 2*Kp) bf16  taps (0,1),(2,1)              [phase (0,1)]
    w2c_ref,                     # (Kp, 2*Kp) bf16  taps (1,0),(1,2)              [phase (1,0)]
    w2d_ref,                     # (Kp, Kp)   bf16  tap  (1,1)                    [phase (1,1)]
    w3_ref,                      # (Cp, Kp)   bf16
    out_ref,                     # (N, Ho, Wo, 2*Kp) bf16
    *, N, H, W, H8, W8, Ho, Wo, Cp, Kp,
):
    f32 = jnp.float32
    Mph = N * H8 * W8
    inv_m = 1.0 / float(N * H * W)       # pixel count for bn1 / bn2
    inv_mp = 1.0 / float(N * Ho * Wo)    # pixel count for bn3 (Hp==Ho, Wp==Wo)

    # Phase k = p*2 + q holds pixels x[n, 2i+p, 2j+q, :] at flat row
    # k*Mph + n*H8*W8 + i*W8 + j; spatially padded rows hold exact zeros.
    x = x_ref[...].astype(f32)           # (4*Mph, Cp)

    # ---------------- bn1 statistics (single pass) -------------------------
    s1 = jnp.sum(x, axis=0, keepdims=True)
    q1 = jnp.sum(x * x, axis=0, keepdims=True)
    mu1 = s1 * inv_m
    var1 = jnp.maximum(q1 * inv_m - mu1 * mu1, 0.0)
    sc1 = lax.rsqrt(var1 + _EPS) * g1_ref[...]
    sh1 = b1_ref[...] - mu1 * sc1

    # ------ branch 2 first (needs only x): maxpool -> bn3 -> relu -> conv3 --
    pooled = jnp.maximum(jnp.maximum(x[0:Mph], x[Mph:2 * Mph]),
                         jnp.maximum(x[2 * Mph:3 * Mph], x[3 * Mph:]))
    # In-kernel row-validity mask (i < Hp, j < Wo); H8/W8 are powers of two so
    # only a sublane iota + bitwise-and + compares are required.
    r = lax.broadcasted_iota(jnp.int32, (Mph, 1), 0)
    m3 = (((r & (H8 * W8 - 1)) < Ho * W8) & ((r & (W8 - 1)) < Wo)).astype(f32)
    pooled = pooled * m3                 # invalid pool rows -> 0 (unbiased stats)
    s3 = jnp.sum(pooled, axis=0, keepdims=True)
    q3 = jnp.sum(pooled * pooled, axis=0, keepdims=True)
    mu3 = s3 * inv_mp
    var3 = jnp.maximum(q3 * inv_mp - mu3 * mu3, 0.0)
    sc3 = lax.rsqrt(var3 + _EPS) * g3_ref[...]
    sh3 = b3_ref[...] - mu3 * sc3
    a3 = jnp.maximum(pooled * sc3 + sh3, 0.0)
    z3 = jnp.dot(a3.astype(jnp.bfloat16), w3_ref[...],
                 preferred_element_type=f32)                      # (Mph, Kp)

    # ---------- branch 1: bn1 -> relu -> conv1, fused over all 4 phases -----
    a1 = jnp.maximum(x * sc1 + sh1, 0.0).astype(jnp.bfloat16)     # (4*Mph, Cp)
    y1 = jnp.dot(a1, w1_ref[...], preferred_element_type=f32)     # (4*Mph, Kp)

    # bn2 statistics: padded rows of a1 are exactly relu(sh1) (x is exactly 0
    # there), so their contribution is removed with a closed-form correction.
    pad_row = jnp.broadcast_to(jnp.maximum(sh1, 0.0).astype(jnp.bfloat16), (8, Cp))
    y_pad = jnp.dot(pad_row, w1_ref[...], preferred_element_type=f32)[0:1]  # (1, Kp)
    n_pad = float(4 * Mph - N * H * W)
    s2 = jnp.sum(y1, axis=0, keepdims=True) - n_pad * y_pad
    q2 = jnp.sum(y1 * y1, axis=0, keepdims=True) - n_pad * (y_pad * y_pad)
    mu2 = s2 * inv_m
    var2 = jnp.maximum(q2 * inv_m - mu2 * mu2, 0.0)
    sc2 = lax.rsqrt(var2 + _EPS) * g2_ref[...]
    sh2 = b2_ref[...] - mu2 * sc2

    a2 = jnp.maximum(y1 * sc2 + sh2, 0.0).astype(jnp.bfloat16)    # (4*Mph, Kp)

    # ---------- conv2 (3x3, stride 2, VALID): 4 tap-packed MXU matmuls ------
    z00 = jnp.dot(a2[0:Mph], w2a_ref[...], preferred_element_type=f32)           # (Mph, 4Kp)
    z01 = jnp.dot(a2[Mph:2 * Mph], w2b_ref[...], preferred_element_type=f32)     # (Mph, 2Kp)
    z10 = jnp.dot(a2[2 * Mph:3 * Mph], w2c_ref[...], preferred_element_type=f32) # (Mph, 2Kp)
    z11 = jnp.dot(a2[3 * Mph:], w2d_ref[...], preferred_element_type=f32)        # (Mph, Kp)

    def shift_up_w8(v):
        # v[r] <- v[r + W8] (8-aligned sublane shift); wrapped tail rows are
        # zero-filled and are never retained by the final slice (Ho < H8).
        return jnp.concatenate([v[W8:], jnp.zeros((W8, Kp), f32)], axis=0)

    # dw = 0 taps accumulate into acc_a; dw = 1 taps into acc_b (the column
    # offset for dw = 1 is applied once, at the final output slice).
    acc_a = z00[:, :Kp] + z01[:, :Kp] + z10[:, :Kp] + z11
    acc_a = acc_a + shift_up_w8(z00[:, 2 * Kp:3 * Kp] + z01[:, Kp:])
    acc_b = z00[:, Kp:2 * Kp] + z10[:, Kp:]
    acc_b = acc_b + shift_up_w8(z00[:, 3 * Kp:])

    acc_a = acc_a.reshape(N, H8, W8, Kp)
    acc_b = acc_b.reshape(N, H8, W8, Kp)
    z3v = z3.reshape(N, H8, W8, Kp)

    out1 = acc_a[:, :Ho, :Wo, :] + acc_b[:, :Ho, 1:Wo + 1, :]
    out2 = z3v[:, :Ho, :Wo, :]
    out_ref[...] = jnp.concatenate([out1, out2], axis=-1).astype(out_ref.dtype)


# --------------------------------------------------------------------------- #
# Parameter init (shapes from the PyTorch __init__)
# --------------------------------------------------------------------------- #
def init_params(key, n_channels, n_out_channels):
    ks = jax.random.split(key, 9)
    return {
        "g1": 1.0 + 0.1 * jax.random.normal(ks[0], (n_channels,), jnp.float32),
        "b1": 0.1 * jax.random.normal(ks[1], (n_channels,), jnp.float32),
        "g2": 1.0 + 0.1 * jax.random.normal(ks[2], (n_out_channels,), jnp.float32),
        "b2": 0.1 * jax.random.normal(ks[3], (n_out_channels,), jnp.float32),
        "g3": 1.0 + 0.1 * jax.random.normal(ks[4], (n_channels,), jnp.float32),
        "b3": 0.1 * jax.random.normal(ks[5], (n_channels,), jnp.float32),
        "w1": 0.2 * jax.random.normal(ks[6], (n_out_channels, n_channels, 1, 1), jnp.float32),
        "w2": 0.2 * jax.random.normal(ks[7], (n_out_channels, n_out_channels, 3, 3), jnp.float32),
        "w3": 0.2 * jax.random.normal(ks[8], (n_out_channels, n_channels, 1, 1), jnp.float32),
    }


# --------------------------------------------------------------------------- #
# Forward pass wrapper (NCHW in / NCHW out); layout plumbing only in XLA.
# --------------------------------------------------------------------------- #
@jax.jit
def last_layer_forward(x_nchw, params):
    N, C, H, W = x_nchw.shape
    Cout = params["w1"].shape[0]
    if H % 2 == 0 or W % 2 == 0:
        # Same constraint as the PyTorch module: torch.cat needs both branches
        # to produce identical spatial sizes, which requires odd H, W.
        raise ValueError("LastLayer requires odd spatial dimensions")

    Cp = _round_up(C, _LANE)                       # lane-dense input channels
    Kp = _round_up(Cout, _LANE)                    # lane-dense output channels
    Ho, Wo = (H - 3) // 2 + 1, (W - 3) // 2 + 1    # conv2 output
    Hp, Wp = H // 2, W // 2                        # maxpool output
    assert Ho == Hp and Wo == Wp
    H8 = max(8, pl.next_power_of_2((H + 1) // 2))  # per-phase spatial extent
    W8 = max(8, pl.next_power_of_2((W + 1) // 2))  # (pow2 -> bitwise in-kernel mask)
    assert Ho < H8 and Wo < W8                     # shift / slice wrap-safety invariant
    Mph = N * H8 * W8

    # ---- phase-separated, spatially zero-padded, channel-padded bf16 input --
    x = jnp.transpose(x_nchw, (0, 2, 3, 1)).astype(jnp.float32)        # NHWC
    x = jnp.pad(x, ((0, 0), (0, 2 * H8 - H), (0, 2 * W8 - W), (0, Cp - C)))
    x = x.reshape(N, H8, 2, W8, 2, Cp)
    x = jnp.transpose(x, (2, 4, 0, 1, 3, 5))                           # (p,q,N,i,j,c)
    xph = x.reshape(4 * Mph, Cp).astype(jnp.bfloat16)

    # ---- parameters: channel-padded, matmul-ready, bf16 weights ------------
    def pad_vec(v, n):
        return jnp.pad(v.astype(jnp.float32), (0, n - v.shape[0])).reshape(1, n)

    g1, b1 = pad_vec(params["g1"], Cp), pad_vec(params["b1"], Cp)
    g2, b2 = pad_vec(params["g2"], Kp), pad_vec(params["b2"], Kp)
    g3, b3 = pad_vec(params["g3"], Cp), pad_vec(params["b3"], Cp)

    def pad_mat(w):          # torch (O, I) -> padded (Cp, Kp), bf16
        return jnp.pad(w.astype(jnp.float32).T,
                       ((0, Cp - w.shape[1]), (0, Kp - w.shape[0]))).astype(jnp.bfloat16)

    w1 = pad_mat(params["w1"][:, :, 0, 0])
    w3 = pad_mat(params["w3"][:, :, 0, 0])

    def tap(kh, kw):         # conv2 tap (kh, kw) as a padded (Kp, Kp) matmul matrix
        t = params["w2"][:, :, kh, kw].astype(jnp.float32).T           # (I, O)
        return jnp.pad(t, ((0, Kp - Cout), (0, Kp - Cout)))

    # Tap packing along the matmul-N dim (fills the 256-wide MXU on v6e/v7x).
    w2a = jnp.concatenate([tap(0, 0), tap(0, 2), tap(2, 0), tap(2, 2)], axis=1).astype(jnp.bfloat16)
    w2b = jnp.concatenate([tap(0, 1), tap(2, 1)], axis=1).astype(jnp.bfloat16)
    w2c = jnp.concatenate([tap(1, 0), tap(1, 2)], axis=1).astype(jnp.bfloat16)
    w2d = tap(1, 1).astype(jnp.bfloat16)

    kernel = functools.partial(
        _last_layer_kernel,
        N=N, H=H, W=W, H8=H8, W8=W8, Ho=Ho, Wo=Wo, Cp=Cp, Kp=Kp)

    inputs = (xph, g1, b1, g2, b2, g3, b3, w1, w2a, w2b, w2c, w2d, w3)

    flops = 2 * Mph * Kp * (5 * Cp + 9 * Kp)
    bytes_accessed = (sum(int(a.size) * a.dtype.itemsize for a in inputs)
                      + N * Ho * Wo * 2 * Kp * 2)

    out_k = pl.pallas_call(
        kernel,
        out_shape=jax.ShapeDtypeStruct((N, Ho, Wo, 2 * Kp), jnp.bfloat16),
        compiler_params=pltpu.CompilerParams(
            vmem_limit_bytes=48 * 1024 * 1024),
        cost_estimate=pl.CostEstimate(
            flops=flops, transcendentals=2 * Cp + Kp,
            bytes_accessed=bytes_accessed),
    )(*inputs)

    out = jnp.concatenate([out_k[..., :Cout], out_k[..., Kp:Kp + Cout]], axis=-1)
    return jnp.transpose(out, (0, 3, 1, 2)).astype(jnp.float32)        # NCHW


# --------------------------------------------------------------------------- #
# Pure-JAX reference (training-mode BN). dot_dtype lets us build both the
# exact-f32 reference and a bf16-matmul reference matching the kernel's MXU
# operand precision.
# --------------------------------------------------------------------------- #
def _bn_train_ref(x, gamma, beta):
    mu = jnp.mean(x, axis=(0, 2, 3), keepdims=True)
    var = jnp.mean((x - mu) ** 2, axis=(0, 2, 3), keepdims=True)
    return ((x - mu) * lax.rsqrt(var + _EPS) * gamma[None, :, None, None]
            + beta[None, :, None, None])


def last_layer_reference(x, p, dot_dtype=jnp.float32):
    dn = ("NCHW", "OIHW", "NCHW")

    def conv(v, w, stride):
        return lax.conv_general_dilated(
            v.astype(dot_dtype), w.astype(dot_dtype), (stride, stride), "VALID",
            dimension_numbers=dn, preferred_element_type=jnp.float32)

    y = jax.nn.relu(_bn_train_ref(x, p["g1"], p["b1"]))
    y = conv(y, p["w1"], 1)
    y = jax.nn.relu(_bn_train_ref(y, p["g2"], p["b2"]))
    y = conv(y, p["w2"], 2)

    q = lax.reduce_window(x, -jnp.inf, lax.max, (1, 1, 2, 2), (1, 1, 2, 2), "VALID")
    q = jax.nn.relu(_bn_train_ref(q, p["g3"], p["b3"]))
    q = conv(q, p["w3"], 1)

    return jnp.concatenate([y, q], axis=1)


# --------------------------------------------------------------------------- #
if __name__ == "__main__":
    key = jax.random.PRNGKey(0)
    k_x, k_p = jax.random.split(key)

    N, C_IN, C_OUT = 2, 4, 8
    H = W = 9   # odd spatial size: both branches produce 4x4, as DSOD requires

    x = jax.random.normal(k_x, (N, C_IN, H, W), jnp.float32)
    params = init_params(k_p, C_IN, C_OUT)

    out = jax.block_until_ready(last_layer_forward(x, params))
    assert out.shape == (N, 2 * C_OUT, H // 2, W // 2), out.shape

    # Tight check vs. a reference with identical bf16 input / operand / output
    # precision.
    x_q = x.astype(jnp.bfloat16).astype(jnp.float32)
    ref_m = last_layer_reference(x_q, params, jnp.bfloat16)
    ref_m = ref_m.astype(jnp.bfloat16).astype(jnp.float32)
    assert jnp.allclose(out, ref_m, rtol=1e-2, atol=1e-2), (
        float(jnp.max(jnp.abs(out - ref_m))))

    # Sanity check vs. the exact f32 module semantics (bf16-level tolerance).
    ref_f32 = last_layer_reference(x, params)
    err = float(jnp.max(jnp.abs(out - ref_f32)))
    scale = float(jnp.max(jnp.abs(ref_f32)))
    assert err <= 5e-2 * scale + 5e-3, (err, scale)

    print("KERNEL_OK")
</pallas_src>

<mosaic_0001>
module attributes {stable_mosaic.version = 11 : i64} {
  func.func @_last_layer_kernel(%arg0: memref<512x128xbf16, #tpu.memory_space<vmem>>, %arg1: memref<1x128xf32, #tpu.memory_space<vmem>>, %arg2: memref<1x128xf32, #tpu.memory_space<vmem>>, %arg3: memref<1x128xf32, #tpu.memory_space<vmem>>, %arg4: memref<1x128xf32, #tpu.memory_space<vmem>>, %arg5: memref<1x128xf32, #tpu.memory_space<vmem>>, %arg6: memref<1x128xf32, #tpu.memory_space<vmem>>, %arg7: memref<128x128xbf16, #tpu.memory_space<vmem>>, %arg8: memref<128x512xbf16, #tpu.memory_space<vmem>>, %arg9: memref<128x256xbf16, #tpu.memory_space<vmem>>, %arg10: memref<128x256xbf16, #tpu.memory_space<vmem>>, %arg11: memref<128x128xbf16, #tpu.memory_space<vmem>>, %arg12: memref<128x128xbf16, #tpu.memory_space<vmem>>, %arg13: memref<2x4x4x256xbf16, #tpu.memory_space<vmem>>) attributes {dimension_semantics = [], scalar_prefetch = 0 : i64, scratch_operands = 0 : i64, tpu.core_type = #tpu.core_type<tc>} {
    %c0 = arith.constant 0 : index
    %c0_0 = arith.constant 0 : index
    %0 = vector.load %arg0[%c0, %c0_0] : memref<512x128xbf16, #tpu.memory_space<vmem>>, vector<512x128xbf16>
    %1 = arith.extf %0 : vector<512x128xbf16> to vector<512x128xf32>
    %cst = arith.constant dense<0.000000e+00> : vector<128xf32>
    %2 = vector.multi_reduction <add>, %1, %cst [0] : vector<512x128xf32> to vector<128xf32>
    %3 = vector.shape_cast %2 : vector<128xf32> to vector<1x128xf32>
    %4 = arith.mulf %1, %1 : vector<512x128xf32>
    %cst_1 = arith.constant dense<0.000000e+00> : vector<128xf32>
    %5 = vector.multi_reduction <add>, %4, %cst_1 [0] : vector<512x128xf32> to vector<128xf32>
    %6 = vector.shape_cast %5 : vector<128xf32> to vector<1x128xf32>
    %cst_2 = arith.constant 0.00617283955 : f32
    %7 = vector.broadcast %cst_2 : f32 to vector<1x128xf32>
    %8 = arith.mulf %3, %7 : vector<1x128xf32>
    %cst_3 = arith.constant 0.00617283955 : f32
    %9 = vector.broadcast %cst_3 : f32 to vector<1x128xf32>
    %10 = arith.mulf %6, %9 : vector<1x128xf32>
    %11 = arith.mulf %8, %8 : vector<1x128xf32>
    %12 = arith.subf %10, %11 : vector<1x128xf32>
    %cst_4 = arith.constant 0.000000e+00 : f32
    %13 = vector.broadcast %cst_4 : f32 to vector<1x128xf32>
    %14 = arith.maximumf %12, %13 : vector<1x128xf32>
    %cst_5 = arith.constant 9.99999974E-6 : f32
    %15 = vector.broadcast %cst_5 : f32 to vector<1x128xf32>
    %16 = arith.addf %14, %15 : vector<1x128xf32>
    %17 = math.rsqrt %16 : vector<1x128xf32>
    %c0_6 = arith.constant 0 : index
    %c0_7 = arith.constant 0 : index
    %18 = vector.load %arg1[%c0_6, %c0_7] : memref<1x128xf32, #tpu.memory_space<vmem>>, vector<1x128xf32>
    %19 = arith.mulf %17, %18 : vector<1x128xf32>
    %c0_8 = arith.constant 0 : index
    %c0_9 = arith.constant 0 : index
    %20 = vector.load %arg2[%c0_8, %c0_9] : memref<1x128xf32, #tpu.memory_space<vmem>>, vector<1x128xf32>
    %21 = arith.mulf %8, %19 : vector<1x128xf32>
    %22 = arith.subf %20, %21 : vector<1x128xf32>
    %23 = vector.extract_strided_slice %1 {offsets = [0, 0], sizes = [128, 128], strides = [1, 1]} : vector<512x128xf32> to vector<128x128xf32>
    %24 = vector.extract_strided_slice %1 {offsets = [128, 0], sizes = [128, 128], strides = [1, 1]} : vector<512x128xf32> to vector<128x128xf32>
    %25 = arith.maximumf %23, %24 : vector<128x128xf32>
    %26 = vector.extract_strided_slice %1 {offsets = [256, 0], sizes = [128, 128], strides = [1, 1]} : vector<512x128xf32> to vector<128x128xf32>
    %27 = vector.extract_strided_slice %1 {offsets = [384, 0], sizes = [128, 128], strides = [1, 1]} : vector<512x128xf32> to vector<128x128xf32>
    %28 = arith.maximumf %26, %27 : vector<128x128xf32>
    %29 = arith.maximumf %25, %28 : vector<128x128xf32>
    %30 = tpu.iota {dimensions = array<i32: 0>} : vector<128x1xi32>
    %c63_i32 = arith.constant 63 : i32
    %31 = vector.broadcast %c63_i32 : i32 to vector<128x1xi32>
    %32 = arith.andi %30, %31 : vector<128x1xi32>
    %c32_i32 = arith.constant 32 : i32
    %33 = vector.broadcast %c32_i32 : i32 to vector<128x1xi32>
    %34 = arith.cmpi slt, %32, %33 : vector<128x1xi32>
    %c7_i32 = arith.constant 7 : i32
    %35 = vector.broadcast %c7_i32 : i32 to vector<128x1xi32>
    %36 = arith.andi %30, %35 : vector<128x1xi32>
    %c4_i32 = arith.constant 4 : i32
    %37 = vector.broadcast %c4_i32 : i32 to vector<128x1xi32>
    %38 = arith.cmpi slt, %36, %37 : vector<128x1xi32>
    %39 = arith.andi %34, %38 : vector<128x1xi1>
    %40 = arith.extui %39 : vector<128x1xi1> to vector<128x1xi32>
    %41 = arith.sitofp %40 : vector<128x1xi32> to vector<128x1xf32>
    %42 = vector.broadcast %41 : vector<128x1xf32> to vector<128x128xf32>
    %43 = arith.mulf %29, %42 : vector<128x128xf32>
    %cst_10 = arith.constant dense<0.000000e+00> : vector<128xf32>
    %44 = vector.multi_reduction <add>, %43, %cst_10 [0] : vector<128x128xf32> to vector<128xf32>
    %45 = vector.shape_cast %44 : vector<128xf32> to vector<1x128xf32>
    %46 = arith.mulf %43, %43 : vector<128x128xf32>
    %cst_11 = arith.constant dense<0.000000e+00> : vector<128xf32>
    %47 = vector.multi_reduction <add>, %46, %cst_11 [0] : vector<128x128xf32> to vector<128xf32>
    %48 = vector.shape_cast %47 : vector<128xf32> to vector<1x128xf32>
    %cst_12 = arith.constant 3.125000e-02 : f32
    %49 = vector.broadcast %cst_12 : f32 to vector<1x128xf32>
    %50 = arith.mulf %45, %49 : vector<1x128xf32>
    %cst_13 = arith.constant 3.125000e-02 : f32
    %51 = vector.broadcast %cst_13 : f32 to vector<1x128xf32>
    %52 = arith.mulf %48, %51 : vector<1x128xf32>
    %53 = arith.mulf %50, %50 : vector<1x128xf32>
    %54 = arith.subf %52, %53 : vector<1x128xf32>
    %cst_14 = arith.constant 0.000000e+00 : f32
    %55 = vector.broadcast %cst_14 : f32 to vector<1x128xf32>
    %56 = arith.maximumf %54, %55 : vector<1x128xf32>
    %cst_15 = arith.constant 9.99999974E-6 : f32
    %57 = vector.broadcast %cst_15 : f32 to vector<1x128xf32>
    %58 = arith.addf %56, %57 : vector<1x128xf32>
    %59 = math.rsqrt %58 : vector<1x128xf32>
    %c0_16 = arith.constant 0 : index
    %c0_17 = arith.constant 0 : index
    %60 = vector.load %arg5[%c0_16, %c0_17] : memref<1x128xf32, #tpu.memory_space<vmem>>, vector<1x128xf32>
    %61 = arith.mulf %59, %60 : vector<1x128xf32>
    %c0_18 = arith.constant 0 : index
    %c0_19 = arith.constant 0 : index
    %62 = vector.load %arg6[%c0_18, %c0_19] : memref<1x128xf32, #tpu.memory_space<vmem>>, vector<1x128xf32>
    %63 = arith.mulf %50, %61 : vector<1x128xf32>
    %64 = arith.subf %62, %63 : vector<1x128xf32>
    %65 = vector.broadcast %61 : vector<1x128xf32> to vector<128x128xf32>
    %66 = arith.mulf %43, %65 : vector<128x128xf32>
    %67 = vector.broadcast %64 : vector<1x128xf32> to vector<128x128xf32>
    %68 = arith.addf %66, %67 : vector<128x128xf32>
    %cst_20 = arith.constant 0.000000e+00 : f32
    %69 = vector.broadcast %cst_20 : f32 to vector<128x128xf32>
    %70 = arith.maximumf %68, %69 : vector<128x128xf32>
    %71 = arith.truncf %70 : vector<128x128xf32> to vector<128x128xbf16>
    %c0_21 = arith.constant 0 : index
    %c0_22 = arith.constant 0 : index
    %72 = vector.load %arg12[%c0_21, %c0_22] : memref<128x128xbf16, #tpu.memory_space<vmem>>, vector<128x128xbf16>
    %cst_23 = arith.constant dense<0.000000e+00> : vector<128x128xf32>
    %73 = tpu.matmul %71, %72, %cst_23 {dimension_numbers = #tpu.dot_dimension_numbers<[1], [0], [0], [1], [0, 0, 1, 1], [], []>} : vector<128x128xbf16>, vector<128x128xbf16>, vector<128x128xf32> -> vector<128x128xf32>
    %74 = vector.broadcast %19 : vector<1x128xf32> to vector<512x128xf32>
    %75 = arith.mulf %1, %74 : vector<512x128xf32>
    %76 = vector.broadcast %22 : vector<1x128xf32> to vector<512x128xf32>
    %77 = arith.addf %75, %76 : vector<512x128xf32>
    %cst_24 = arith.constant 0.000000e+00 : f32
    %78 = vector.broadcast %cst_24 : f32 to vector<512x128xf32>
    %79 = arith.maximumf %77, %78 : vector<512x128xf32>
    %80 = arith.truncf %79 : vector<512x128xf32> to vector<512x128xbf16>
    %c0_25 = arith.constant 0 : index
    %c0_26 = arith.constant 0 : index
    %81 = vector.load %arg7[%c0_25, %c0_26] : memref<128x128xbf16, #tpu.memory_space<vmem>>, vector<128x128xbf16>
    %cst_27 = arith.constant dense<0.000000e+00> : vector<512x128xf32>
    %82 = tpu.matmul %80, %81, %cst_27 {dimension_numbers = #tpu.dot_dimension_numbers<[1], [0], [0], [1], [0, 0, 1, 1], [], []>} : vector<512x128xbf16>, vector<128x128xbf16>, vector<512x128xf32> -> vector<512x128xf32>
    %cst_28 = arith.constant 0.000000e+00 : f32
    %83 = vector.broadcast %cst_28 : f32 to vector<1x128xf32>
    %84 = arith.maximumf %22, %83 : vector<1x128xf32>
    %85 = arith.truncf %84 : vector<1x128xf32> to vector<1x128xbf16>
    %86 = vector.shape_cast %85 : vector<1x128xbf16> to vector<1x128xbf16>
    %87 = vector.broadcast %86 : vector<1x128xbf16> to vector<8x128xbf16>
    %c0_29 = arith.constant 0 : index
    %c0_30 = arith.constant 0 : index
    %88 = vector.load %arg7[%c0_29, %c0_30] : memref<128x128xbf16, #tpu.memory_space<vmem>>, vector<128x128xbf16>
    %cst_31 = arith.constant dense<0.000000e+00> : vector<8x128xf32>
    %89 = tpu.matmul %87, %88, %cst_31 {dimension_numbers = #tpu.dot_dimension_numbers<[1], [0], [0], [1], [0, 0, 1, 1], [], []>} : vector<8x128xbf16>, vector<128x128xbf16>, vector<8x128xf32> -> vector<8x128xf32>
    %90 = vector.extract_strided_slice %89 {offsets = [0, 0], sizes = [1, 128], strides = [1, 1]} : vector<8x128xf32> to vector<1x128xf32>
    %cst_32 = arith.constant dense<0.000000e+00> : vector<128xf32>
    %91 = vector.multi_reduction <add>, %82, %cst_32 [0] : vector<512x128xf32> to vector<128xf32>
    %92 = vector.shape_cast %91 : vector<128xf32> to vector<1x128xf32>
    %cst_33 = arith.constant 3.500000e+02 : f32
    %93 = vector.broadcast %cst_33 : f32 to vector<1x128xf32>
    %94 = arith.mulf %93, %90 : vector<1x128xf32>
    %95 = arith.subf %92, %94 : vector<1x128xf32>
    %96 = arith.mulf %82, %82 : vector<512x128xf32>
    %cst_34 = arith.constant dense<0.000000e+00> : vector<128xf32>
    %97 = vector.multi_reduction <add>, %96, %cst_34 [0] : vector<512x128xf32> to vector<128xf32>
    %98 = vector.shape_cast %97 : vector<128xf32> to vector<1x128xf32>
    %99 = arith.mulf %90, %90 : vector<1x128xf32>
    %cst_35 = arith.constant 3.500000e+02 : f32
    %100 = vector.broadcast %cst_35 : f32 to vector<1x128xf32>
    %101 = arith.mulf %100, %99 : vector<1x128xf32>
    %102 = arith.subf %98, %101 : vector<1x128xf32>
    %cst_36 = arith.constant 0.00617283955 : f32
    %103 = vector.broadcast %cst_36 : f32 to vector<1x128xf32>
    %104 = arith.mulf %95, %103 : vector<1x128xf32>
    %cst_37 = arith.constant 0.00617283955 : f32
    %105 = vector.broadcast %cst_37 : f32 to vector<1x128xf32>
    %106 = arith.mulf %102, %105 : vector<1x128xf32>
    %107 = arith.mulf %104, %104 : vector<1x128xf32>
    %108 = arith.subf %106, %107 : vector<1x128xf32>
    %cst_38 = arith.constant 0.000000e+00 : f32
    %109 = vector.broadcast %cst_38 : f32 to vector<1x128xf32>
    %110 = arith.maximumf %108, %109 : vector<1x128xf32>
    %cst_39 = arith.constant 9.99999974E-6 : f32
    %111 = vector.broadcast %cst_39 : f32 to vector<1x128xf32>
    %112 = arith.addf %110, %111 : vector<1x128xf32>
    %113 = math.rsqrt %112 : vector<1x128xf32>
    %c0_40 = arith.constant 0 : index
    %c0_41 = arith.constant 0 : index
    %114 = vector.load %arg3[%c0_40, %c0_41] : memref<1x128xf32, #tpu.memory_space<vmem>>, vector<1x128xf32>
    %115 = arith.mulf %113, %114 : vector<1x128xf32>
    %c0_42 = arith.constant 0 : index
    %c0_43 = arith.constant 0 : index
    %116 = vector.load %arg4[%c0_42, %c0_43] : memref<1x128xf32, #tpu.memory_space<vmem>>, vector<1x128xf32>
    %117 = arith.mulf %104, %115 : vector<1x128xf32>
    %118 = arith.subf %116, %117 : vector<1x128xf32>
    %119 = vector.broadcast %115 : vector<1x128xf32> to vector<512x128xf32>
    %120 = arith.mulf %82, %119 : vector<512x128xf32>
    %121 = vector.broadcast %118 : vector<1x128xf32> to vector<512x128xf32>
    %122 = arith.addf %120, %121 : vector<512x128xf32>
    %cst_44 = arith.constant 0.000000e+00 : f32
    %123 = vector.broadcast %cst_44 : f32 to vector<512x128xf32>
    %124 = arith.maximumf %122, %123 : vector<512x128xf32>
    %125 = arith.truncf %124 : vector<512x128xf32> to vector<512x128xbf16>
    %126 = vector.extract_strided_slice %125 {offsets = [0, 0], sizes = [128, 128], strides = [1, 1]} : vector<512x128xbf16> to vector<128x128xbf16>
    %c0_45 = arith.constant 0 : index
    %c0_46 = arith.constant 0 : index
    %127 = vector.load %arg8[%c0_45, %c0_46] : memref<128x512xbf16, #tpu.memory_space<vmem>>, vector<128x512xbf16>
    %cst_47 = arith.constant dense<0.000000e+00> : vector<128x512xf32>
    %128 = tpu.matmul %126, %127, %cst_47 {dimension_numbers = #tpu.dot_dimension_numbers<[1], [0], [0], [1], [0, 0, 1, 1], [], []>} : vector<128x128xbf16>, vector<128x512xbf16>, vector<128x512xf32> -> vector<128x512xf32>
    %129 = vector.extract_strided_slice %125 {offsets = [128, 0], sizes = [128, 128], strides = [1, 1]} : vector<512x128xbf16> to vector<128x128xbf16>
    %c0_48 = arith.constant 0 : index
    %c0_49 = arith.constant 0 : index
    %130 = vector.load %arg9[%c0_48, %c0_49] : memref<128x256xbf16, #tpu.memory_space<vmem>>, vector<128x256xbf16>
    %cst_50 = arith.constant dense<0.000000e+00> : vector<128x256xf32>
    %131 = tpu.matmul %129, %130, %cst_50 {dimension_numbers = #tpu.dot_dimension_numbers<[1], [0], [0], [1], [0, 0, 1, 1], [], []>} : vector<128x128xbf16>, vector<128x256xbf16>, vector<128x256xf32> -> vector<128x256xf32>
    %132 = vector.extract_strided_slice %125 {offsets = [256, 0], sizes = [128, 128], strides = [1, 1]} : vector<512x128xbf16> to vector<128x128xbf16>
    %c0_51 = arith.constant 0 : index
    %c0_52 = arith.constant 0 : index
    %133 = vector.load %arg10[%c0_51, %c0_52] : memref<128x256xbf16, #tpu.memory_space<vmem>>, vector<128x256xbf16>
    %cst_53 = arith.constant dense<0.000000e+00> : vector<128x256xf32>
    %134 = tpu.matmul %132, %133, %cst_53 {dimension_numbers = #tpu.dot_dimension_numbers<[1], [0], [0], [1], [0, 0, 1, 1], [], []>} : vector<128x128xbf16>, vector<128x256xbf16>, vector<128x256xf32> -> vector<128x256xf32>
    %135 = vector.extract_strided_slice %125 {offsets = [384, 0], sizes = [128, 128], strides = [1, 1]} : vector<512x128xbf16> to vector<128x128xbf16>
    %c0_54 = arith.constant 0 : index
    %c0_55 = arith.constant 0 : index
    %136 = vector.load %arg11[%c0_54, %c0_55] : memref<128x128xbf16, #tpu.memory_space<vmem>>, vector<128x128xbf16>
    %cst_56 = arith.constant dense<0.000000e+00> : vector<128x128xf32>
    %137 = tpu.matmul %135, %136, %cst_56 {dimension_numbers = #tpu.dot_dimension_numbers<[1], [0], [0], [1], [0, 0, 1, 1], [], []>} : vector<128x128xbf16>, vector<128x128xbf16>, vector<128x128xf32> -> vector<128x128xf32>
    %138 = vector.extract_strided_slice %128 {offsets = [0, 0], sizes = [128, 128], strides = [1, 1]} : vector<128x512xf32> to vector<128x128xf32>
    %139 = vector.extract_strided_slice %131 {offsets = [0, 0], sizes = [128, 128], strides = [1, 1]} : vector<128x256xf32> to vector<128x128xf32>
    %140 = arith.addf %138, %139 : vector<128x128xf32>
    %141 = vector.extract_strided_slice %134 {offsets = [0, 0], sizes = [128, 128], strides = [1, 1]} : vector<128x256xf32> to vector<128x128xf32>
    %142 = arith.addf %140, %141 : vector<128x128xf32>
    %143 = arith.addf %142, %137 : vector<128x128xf32>
    %144 = vector.extract_strided_slice %128 {offsets = [0, 256], sizes = [128, 128], strides = [1, 1]} : vector<128x512xf32> to vector<128x128xf32>
    %145 = vector.extract_strided_slice %131 {offsets = [0, 128], sizes = [128, 128], strides = [1, 1]} : vector<128x256xf32> to vector<128x128xf32>
    %146 = arith.addf %144, %145 : vector<128x128xf32>
    %147 = vector.extract_strided_slice %146 {offsets = [8, 0], sizes = [120, 128], strides = [1, 1]} : vector<128x128xf32> to vector<120x128xf32>
    %cst_57 = arith.constant 0.000000e+00 : f32
    %148 = vector.broadcast %cst_57 : f32 to vector<8x128xf32>
    %149 = tpu.concatenate %147, %148 in 0 : vector<120x128xf32>, vector<8x128xf32> -> vector<128x128xf32>
    %150 = arith.addf %143, %149 : vector<128x128xf32>
    %151 = vector.extract_strided_slice %128 {offsets = [0, 128], sizes = [128, 128], strides = [1, 1]} : vector<128x512xf32> to vector<128x128xf32>
    %152 = vector.extract_strided_slice %134 {offsets = [0, 128], sizes = [128, 128], strides = [1, 1]} : vector<128x256xf32> to vector<128x128xf32>
    %153 = arith.addf %151, %152 : vector<128x128xf32>
    %154 = vector.extract_strided_slice %128 {offsets = [0, 384], sizes = [128, 128], strides = [1, 1]} : vector<128x512xf32> to vector<128x128xf32>
    %155 = vector.extract_strided_slice %154 {offsets = [8, 0], sizes = [120, 128], strides = [1, 1]} : vector<128x128xf32> to vector<120x128xf32>
    %cst_58 = arith.constant 0.000000e+00 : f32
    %156 = vector.broadcast %cst_58 : f32 to vector<8x128xf32>
    %157 = tpu.concatenate %155, %156 in 0 : vector<120x128xf32>, vector<8x128xf32> -> vector<128x128xf32>
    %158 = arith.addf %153, %157 : vector<128x128xf32>
    %159 = vector.shape_cast %150 : vector<128x128xf32> to vector<2x8x8x128xf32>
    %160 = vector.shape_cast %158 : vector<128x128xf32> to vector<2x8x8x128xf32>
    %161 = vector.shape_cast %73 : vector<128x128xf32> to vector<2x8x8x128xf32>
    %162 = vector.extract_strided_slice %159 {offsets = [0, 0, 0, 0], sizes = [2, 4, 4, 128], strides = [1, 1, 1, 1]} : vector<2x8x8x128xf32> to vector<2x4x4x128xf32>
    %163 = vector.extract_strided_slice %160 {offsets = [0, 0, 1, 0], sizes = [2, 4, 4, 128], strides = [1, 1, 1, 1]} : vector<2x8x8x128xf32> to vector<2x4x4x128xf32>
    %164 = arith.addf %162, %163 : vector<2x4x4x128xf32>
    %165 = vector.extract_strided_slice %161 {offsets = [0, 0, 0, 0], sizes = [2, 4, 4, 128], strides = [1, 1, 1, 1]} : vector<2x8x8x128xf32> to vector<2x4x4x128xf32>
    %166 = tpu.concatenate %164, %165 in 3 : vector<2x4x4x128xf32>, vector<2x4x4x128xf32> -> vector<2x4x4x256xf32>
    %167 = arith.truncf %166 : vector<2x4x4x256xf32> to vector<2x4x4x256xbf16>
    %c0_59 = arith.constant 0 : index
    %c0_60 = arith.constant 0 : index
    %c0_61 = arith.constant 0 : index
    %c0_62 = arith.constant 0 : index
    %168 = vector.load %arg13[%c0_59, %c0_60, %c0_61, %c0_62] : memref<2x4x4x256xbf16, #tpu.memory_space<vmem>>, vector<2x4x4x256xbf16>
    tpu.vector_store %arg13[%c0_59, %c0_60, %c0_61, %c0_62], %167 {strides = array<i32>} : memref<2x4x4x256xbf16, #tpu.memory_space<vmem>>, vector<2x4x4x256xbf16>,
    return
  }
}

</mosaic_0001>

<bundles_post_ra>
// kernel: last_layer_forward.1
= control target key start
LH: loop header
LB: loop body
LE: loop exit
PB: predicated region body
PF: predicated region fallthrough
CT: control target
= control target key end

     0   :  { %s5780_s7 = inlined_call_operand.vmem [shape: bf16[128,128], index: 7, kind: input, shape index: {}]   ;;  %s5781_s0 = inlined_call_operand.vmem [shape: bf16[512,128], index: 0, kind: input, shape index: {}]   ;;  %s5782_s1 = inlined_call_operand.vmem [shape: f32[1,128], index: 1, kind: input, shape index: {}]   ;;  %s5783_s2 = inlined_call_operand.vmem [shape: f32[1,128], index: 2, kind: input, shape index: {}]   ;;  %s5784_s12 = inlined_call_operand.vmem [shape: bf16[128,128], index: 12, kind: input, shape index: {}]   ;;  %s5785_s5 = inlined_call_operand.vmem [shape: f32[1,128], index: 5, kind: input, shape index: {}]   ;;  %s5786_s6 = inlined_call_operand.vmem [shape: f32[1,128], index: 6, kind: input, shape index: {}]   ;;  %s5787_s8 = inlined_call_operand.vmem [shape: bf16[128,512], index: 8, kind: input, shape index: {}]   ;;  %s5788_s3 = inlined_call_operand.vmem [shape: f32[1,128], index: 3, kind: input, shape index: {}]   ;;  %s5789_s4 = inlined_call_operand.vmem [shape: f32[1,128], index: 4, kind: input, shape index: {}]   ;;  %s5790_s9 = inlined_call_operand.vmem [shape: bf16[128,256], index: 9, kind: input, shape index: {}]   ;;  %s5791_s10 = inlined_call_operand.vmem [shape: bf16[128,256], index: 10, kind: input, shape index: {}]   ;;  %s5792_s11 = inlined_call_operand.vmem [shape: bf16[128,128], index: 11, kind: input, shape index: {}]   ;;  %s5793_s13 = inlined_call_operand.vmem [shape: bf16[2,4,4,256], index: 13, kind: output, shape index: {}]  }
   0x1   :  { %v3341_v0 = vld [vmem:[%s5780_s7 + $0x38] sm:$0xff]  ;;  %v3673_v1 = vld [vmem:[%s5780_s7 + $0x30] sm:$0xff]  ;;  %v3679_v2 = vld [vmem:[%s5780_s7 + $0x28] sm:$0xff] }
   0x2   :  { %1124 = vmatpush.bf16.msra.mxu1 %v3341_v0  ;;  %3581 = vmatpush.bf16.msra.mxu2 %v3341_v0  ;;  %v3686_v3 = vld [vmem:[%s5780_s7 + $0x20] sm:$0xff]  ;;  %v3696_v5 = vld [vmem:[%s5780_s7 + $0x18] sm:$0xff]  ;;  %v3542_v6 = vld [vmem:[%s5781_s0 + $0x8] sm:$0xff]  }
   0x3   :  { %v3415_v4 = vld [vmem:[%s5781_s0] sm:$0xff]   ;;  %v3706_v9 = vunpack.c.l.bf16 %v3542_v6  ;;  %v3712_v10 = vld [vmem:[%s5780_s7 + $0x10] sm:$0xff]  ;;  %v3718_v12 = vunpack.c.h.bf16 %v3542_v6  ;;  %v3733_v18 = vld [vmem:[%s5780_s7 + $0x8] sm:$0xff] }
   0x4   :  { %v3702_v7 = vunpack.c.l.bf16 %v3415_v4  ;;  %v3704_v8 = vunpack.c.h.bf16 %v3415_v4  ;;  %v3543_v11 = vld [vmem:[%s5781_s0 + $0x10] sm:$0xff]   ;;  %v3544_v19 = vld [vmem:[%s5781_s0 + $0x18] sm:$0xff]   ;;  %v3753_v27 = vld [vmem:[%s5780_s7] sm:$0xff] }
   0x5   :  { %v3722_v14 = vunpack.c.l.bf16 %v3543_v11  ;;  %v3738_v20 = vunpack.c.h.bf16 %v3543_v11  ;;  %v243_v22 = vmul.f32 %v3706_v9, %v3706_v9  ;;  %v3744_v23 = vunpack.c.l.bf16 %v3544_v19  ;;  %v3545_v28 = vld [vmem:[%s5781_s0 + $0x20] sm:$0xff]   ;;  %v3546_v37 = vld [vmem:[%s5781_s0 + $0x28] sm:$0xff]   ;;  %v3547_v46 = vld [vmem:[%s5781_s0 + $0x30] sm:$0xff]  }
   0x6   :  { %1125 = vmatpush.bf16.msra.mxu1 %v3673_v1  ;;  %3582 = vmatpush.bf16.msra.mxu2 %v3673_v1  ;;  %v172_v13 = vadd.f32 %v3704_v8, %v3702_v7  ;;  %v241_v16 = vmul.f32 %v3702_v7, %v3702_v7  ;;  %v242_v17 = vmul.f32 %v3704_v8, %v3704_v8  ;;  %v3758_v29 = vunpack.c.h.bf16 %v3544_v19  ;;  %v3548_v55 = vld [vmem:[%s5781_s0 + $0x38] sm:$0xff]  }
   0x7   :  { %v244_v25 = vmul.f32 %v3718_v12, %v3718_v12  ;;  %v245_v31 = vmul.f32 %v3722_v14, %v3722_v14  ;;  %v3764_v33 = vunpack.c.l.bf16 %v3545_v28  ;;  %v246_v35 = vmul.f32 %v3738_v20, %v3738_v20 }
   0x8   :  { %v173_v15 = vadd.f32 %v3706_v9, %v172_v13  ;;  %v305_v26 = vadd.f32 %v242_v17, %v241_v16  ;;  %v3773_v38 = vunpack.c.h.bf16 %v3545_v28  ;;  %v247_v40 = vmul.f32 %v3744_v23, %v3744_v23  ;;  %v3550_v17 = vld [vmem:[%s5781_s0 + $0x48] sm:$0xff]  }
   0x9   :  { %v3779_v42 = vunpack.c.l.bf16 %v3546_v37  ;;  %v248_v44 = vmul.f32 %v3758_v29, %v3758_v29  ;;  %v3787_v47 = vunpack.c.h.bf16 %v3546_v37  ;;  %v249_v49 = vmul.f32 %v3764_v33, %v3764_v33 }
   0xa   :  { %1126 = vmatpush.bf16.msra.mxu1 %v3679_v2  ;;  %3583 = vmatpush.bf16.msra.mxu2 %v3679_v2  ;;  %v174_v21 = vadd.f32 %v3718_v12, %v173_v15  ;;  %v306_v32 = vadd.f32 %v305_v26, %v243_v22  ;;  %v3793_v51 = vunpack.c.l.bf16 %v3547_v46  ;;  %v250_v53 = vmul.f32 %v3773_v38, %v3773_v38 }
   0xb   :  { %5922 = vst [vmem:[#allocation2_spill] sm:$0xff] %v3787_v47  ;;  %v3801_v56 = vunpack.c.h.bf16 %v3547_v46  ;;  %v251_v58 = vmul.f32 %v3779_v42, %v3779_v42  ;;  %v3807_v60 = vunpack.c.l.bf16 %v3548_v55  ;;  %v252_v62 = vmul.f32 %v3787_v47, %v3787_v47 }
   0xc   :  { %v175_v24 = vadd.f32 %v3722_v14, %v174_v21  ;;  %v307_v36 = vadd.f32 %v306_v32, %v244_v25  ;;  %5923 = vst [vmem:[#allocation3_spill] sm:$0xff] %v3793_v51  ;;  %v253_v6 = vmul.f32 %v3793_v51, %v3793_v51 }
   0xd   :  { %5924 = vst [vmem:[#allocation4_spill] sm:$0xff] %v3801_v56  ;;  %v254_v15 = vmul.f32 %v3801_v56, %v3801_v56  ;;  %v255_v22 = vmul.f32 %v3807_v60, %v3807_v60 }
   0xe   :  { %1127 = vmatpush.bf16.msra.mxu1 %v3686_v3  ;;  %3584 = vmatpush.bf16.msra.mxu2 %v3686_v3  ;;  %v176_v30 = vadd.f32 %v3738_v20, %v175_v24  ;;  %v308_v41 = vadd.f32 %v307_v36, %v245_v31  ;;  %5925 = vst [vmem:[#allocation5_spill] sm:$0xff] %v3807_v60  ;;  %v3835_v24 = vunpack.c.l.bf16 %v3550_v17  ;;  %v3843_v31 = vunpack.c.h.bf16 %v3550_v17 }
  0x10   :  { %v177_v34 = vadd.f32 %v3744_v23, %v176_v30  ;;  %v309_v45 = vadd.f32 %v308_v41, %v246_v35  ;;  %v3551_v30 = vld [vmem:[%s5781_s0 + $0x50] sm:$0xff]  }
  0x11   :  { %v3849_v35 = vunpack.c.l.bf16 %v3551_v30  ;;  %v3857_v41 = vunpack.c.h.bf16 %v3551_v30  ;;  %v3556_v30 = vld [vmem:[%s5781_s0 + $0x78] sm:$0xff]  }
  0x12   :  { %1128 = vmatpush.bf16.msra.mxu1 %v3696_v5  ;;  %3585 = vmatpush.bf16.msra.mxu2 %v3696_v5  ;;  %v178_v39 = vadd.f32 %v3758_v29, %v177_v34  ;;  %v310_v50 = vadd.f32 %v309_v45, %v247_v40  ;;  %v3552_v40 = vld [vmem:[%s5781_s0 + $0x58] sm:$0xff]  }
  0x13   :  { %v3863_v45 = vunpack.c.l.bf16 %v3552_v40 }
  0x14   :  { %v179_v43 = vadd.f32 %v3764_v33, %v178_v39  ;;  %v311_v54 = vadd.f32 %v310_v50, %v248_v44  ;;  %v259_v44 = vmul.f32 %v3835_v24, %v3835_v24  ;;  %v3553_v50 = vld [vmem:[%s5781_s0 + $0x60] sm:$0xff]  }
  0x16   :  { %1129 = vmatpush.bf16.msra.mxu1 %v3712_v10  ;;  %3586 = vmatpush.bf16.msra.mxu2 %v3712_v10  ;;  %v180_v48 = vadd.f32 %v3773_v38, %v179_v43  ;;  %v312_v59 = vadd.f32 %v311_v54, %v249_v49  ;;  %v261_v54 = vmul.f32 %v3849_v35, %v3849_v35 }
  0x18   :  { %v181_v52 = vadd.f32 %v3779_v42, %v180_v48  ;;  %v313_v63 = vadd.f32 %v312_v59, %v250_v53  ;;  %v260_v48 = vmul.f32 %v3843_v31, %v3843_v31 }
  0x1a   :  { %1130 = vmatpush.bf16.msra.mxu1 %v3733_v18  ;;  %3587 = vmatpush.bf16.msra.mxu2 %v3733_v18  ;;  %v182_v57 = vadd.f32 %v3787_v47, %v181_v52  ;;  %v3871_v52 = vunpack.c.h.bf16 %v3552_v40 }
  0x1c   :  { %v183_v61 = vadd.f32 %v3793_v51, %v182_v57 }
  0x1e   :  { %1131 = vmatpush.bf16.msra.mxu1 %v3753_v27  ;;  %3588 = vmatpush.bf16.msra.mxu2 %v3753_v27  ;;  %v184_v4 = vadd.f32 %v3801_v56, %v183_v61  ;;  %v3554_v61 = vld [vmem:[%s5781_s0 + $0x68] sm:$0xff]  }
  0x20   :  { %v185_v13 = vadd.f32 %v3807_v60, %v184_v4  ;;  %v3890_v4 = vunpack.c.l.bf16 %v3554_v61 }
  0x22   :  { %1299 = vmatpush.bf16.msrb.mxu2 %v3341_v0  ;;  %v3549_v0 = vld [vmem:[%s5781_s0 + $0x40] sm:$0xff]  }
  0x23   :  { %v3821_v11 = vunpack.c.l.bf16 %v3549_v0  ;;  %v3829_v19 = vunpack.c.h.bf16 %v3549_v0  ;;  %v263_v0 = vmul.f32 %v3863_v45, %v3863_v45 }
  0x25   :  { %v257_v34 = vmul.f32 %v3821_v11, %v3821_v11  ;;  %v258_v37 = vmul.f32 %v3829_v19, %v3829_v19 }
  0x26   :  { %1300 = vmatpush.bf16.msrb.mxu2 %v3673_v1  ;;  %v3815_v1 = vunpack.c.h.bf16 %v3548_v55  ;;  %v3877_v55 = vunpack.c.l.bf16 %v3553_v50 }
  0x28   :  { %5926 = vst [vmem:[#allocation6_spill] sm:$0xff] %v3815_v1  ;;  %v186_v21 = vadd.f32 %v3815_v1, %v185_v13  ;;  %v256_v26 = vmul.f32 %v3815_v1, %v3815_v1 }
  0x2a   :  { %1301 = vmatpush.bf16.msrb.mxu2 %v3679_v2  ;;  %v314_v2 = vadd.f32 %v313_v63, %v251_v58  ;;  %v187_v25 = vadd.f32 %v3821_v11, %v186_v21  ;;  %v262_v58 = vmul.f32 %v3857_v41, %v3857_v41  ;;  %v265_v21 = vmul.f32 %v3877_v55, %v3877_v55 }
  0x2c   :  { %v315_v16 = vadd.f32 %v314_v2, %v252_v62  ;;  %v188_v32 = vadd.f32 %v3829_v19, %v187_v25  ;;  %v3885_v62 = vunpack.c.h.bf16 %v3553_v50  ;;  %v264_v2 = vmul.f32 %v3871_v52, %v3871_v52 }
  0x2e   :  { %1302 = vmatpush.bf16.msrb.mxu2 %v3686_v3  ;;  %v316_v3 = vadd.f32 %v315_v16, %v253_v6  ;;  %v189_v36 = vadd.f32 %v3835_v24, %v188_v32  ;;  %v3898_v16 = vunpack.c.h.bf16 %v3554_v61 }
  0x30   :  { %v317_v28 = vadd.f32 %v316_v3, %v254_v15  ;;  %v190_v43 = vadd.f32 %v3843_v31, %v189_v36  ;;  %v3555_v15 = vld [vmem:[%s5781_s0 + $0x70] sm:$0xff]   ;;  %5927 = vst [vmem:[#allocation7_spill] sm:$0xff] %v3898_v16  ;;  %v268_v40 = vmul.f32 %v3898_v16, %v3898_v16 }
  0x31   :  { %v3903_v3 = vunpack.c.l.bf16 %v3555_v15  ;;  %v3911_v32 = vunpack.c.h.bf16 %v3555_v15 }
  0x32   :  { %1303 = vmatpush.bf16.msrb.mxu2 %v3696_v5  ;;  %v318_v5 = vadd.f32 %v317_v28, %v255_v22  ;;  %v191_v46 = vadd.f32 %v3849_v35, %v190_v43 }
  0x33   :  { %5928 = vst [vmem:[#allocation8_spill] sm:$0xff] %v3903_v3 }
  0x34   :  { %v319_v39 = vadd.f32 %v318_v5, %v256_v26  ;;  %v192_v53 = vadd.f32 %v3857_v41, %v191_v46  ;;  %v266_v26 = vmul.f32 %v3885_v62, %v3885_v62  ;;  %5929 = vst [vmem:[#allocation9_spill] sm:$0xff] %v3911_v32  ;;  %v267_v5 = vmul.f32 %v3890_v4, %v3890_v4 }
  0x36   :  { %1304 = vmatpush.bf16.msrb.mxu2 %v3712_v10  ;;  %v320_v10 = vadd.f32 %v319_v39, %v257_v34  ;;  %v193_v57 = vadd.f32 %v3863_v45, %v192_v53 }
  0x38   :  { %v321_v49 = vadd.f32 %v320_v10, %v258_v37  ;;  %v194_v63 = vadd.f32 %v3871_v52, %v193_v57  ;;  %v3916_v37 = vunpack.c.l.bf16 %v3556_v30  ;;  %v3924_v10 = vunpack.c.h.bf16 %v3556_v30  ;;  %v3558_v57 = vld [vmem:[%s5781_s0 + $0x88] sm:$0xff]  }
  0x39   :  { %v3950_v15 = vunpack.c.h.bf16 %v3558_v57 }
  0x3a   :  { %1305 = vmatpush.bf16.msrb.mxu2 %v3733_v18  ;;  %v322_v18 = vadd.f32 %v321_v49, %v259_v44  ;;  %v195_v6 = vadd.f32 %v3877_v55, %v194_v63  ;;  %5930 = vst [vmem:[#allocation10_spill] sm:$0xff] %v3916_v37  ;;  %v3557_v44 = vld [vmem:[%s5781_s0 + $0x80] sm:$0xff]   ;;  %v271_v61 = vmul.f32 %v3916_v37, %v3916_v37 }
  0x3b   :  { %5931 = vst [vmem:[#allocation11_spill] sm:$0xff] %v3924_v10  ;;  %v3929_v50 = vunpack.c.l.bf16 %v3557_v44 }
  0x3c   :  { %v323_v59 = vadd.f32 %v322_v18, %v260_v48  ;;  %v196_v17 = vadd.f32 %v3885_v62, %v195_v6  ;;  %v269_v48 = vmul.f32 %v3903_v3, %v3903_v3  ;;  %v272_v6 = vmul.f32 %v3924_v10, %v3924_v10 }
  0x3e   :  { %1306 = vmatpush.bf16.msrb.mxu2 %v3753_v27  ;;  %v324_v27 = vadd.f32 %v323_v59, %v261_v54  ;;  %v197_v25 = vadd.f32 %v3890_v4, %v196_v17  ;;  %v270_v54 = vmul.f32 %v3911_v32, %v3911_v32 }
  0x40   :  { %v325_v13 = vadd.f32 %v324_v27, %v262_v58  ;;  %v198_v34 = vadd.f32 %v3898_v16, %v197_v25  ;;  %v3937_v58 = vunpack.c.h.bf16 %v3557_v44 }
  0x42   :  { %v326_v22 = vadd.f32 %v325_v13, %v263_v0  ;;  %v199_v39 = vadd.f32 %v3903_v3, %v198_v34  ;;  %v3942_v0 = vunpack.c.l.bf16 %v3558_v57  ;;  %v3559_v13 = vld [vmem:[%s5781_s0 + $0x90] sm:$0xff]   ;;  %v3560_v34 = vld [vmem:[%s5781_s0 + $0x98] sm:$0xff]  }
  0x43   :  { %v3955_v25 = vunpack.c.l.bf16 %v3559_v13 }
  0x44   :  { %v327_v28 = vadd.f32 %v326_v22, %v264_v2  ;;  %v200_v46 = vadd.f32 %v3911_v32, %v199_v39  ;;  %v275_v39 = vmul.f32 %v3942_v0, %v3942_v0 }
  0x46   :  { %v328_v36 = vadd.f32 %v327_v28, %v265_v21  ;;  %v201_v53 = vadd.f32 %v3916_v37, %v200_v46  ;;  %v273_v21 = vmul.f32 %v3929_v50, %v3929_v50  ;;  %v274_v28 = vmul.f32 %v3937_v58, %v3937_v58 }
  0x47   :  { %v276_v46 = vmul.f32 %v3950_v15, %v3950_v15 }
  0x48   :  { %v329_v43 = vadd.f32 %v328_v36, %v266_v26  ;;  %v202_v59 = vadd.f32 %v3924_v10, %v201_v53  ;;  %v3976_v53 = vunpack.c.h.bf16 %v3560_v34 }
  0x4a   :  { %v330_v49 = vadd.f32 %v329_v43, %v267_v5  ;;  %v203_v27 = vadd.f32 %v3929_v50, %v202_v59  ;;  %v3963_v5 = vunpack.c.h.bf16 %v3559_v13  ;;  %v3968_v43 = vunpack.c.l.bf16 %v3560_v34  ;;  %5933 = vst [vmem:[#allocation13_spill] sm:$0xff] %v3976_v53  ;;  %v3563_v34 = vld [vmem:[%s5781_s0 + $0xb0] sm:$0xff]  }
  0x4c   :  { %v331_v18 = vadd.f32 %v330_v49, %v268_v40  ;;  %v204_v17 = vadd.f32 %v3937_v58, %v203_v27  ;;  %5932 = vst [vmem:[#allocation12_spill] sm:$0xff] %v3968_v43  ;;  %v3561_v49 = vld [vmem:[%s5781_s0 + $0xa0] sm:$0xff]  }
  0x4d   :  { %v3981_v59 = vunpack.c.l.bf16 %v3561_v49 }
  0x4e   :  { %v332_v63 = vadd.f32 %v331_v18, %v269_v48  ;;  %v205_v26 = vadd.f32 %v3942_v0, %v204_v17  ;;  %v277_v18 = vmul.f32 %v3955_v25, %v3955_v25  ;;  %v279_v17 = vmul.f32 %v3968_v43, %v3968_v43 }
  0x4f   :  { %5934 = vst [vmem:[#allocation14_spill] sm:$0xff] %v3981_v59 }
  0x50   :  { %v333_v2 = vadd.f32 %v332_v63, %v270_v54  ;;  %v206_v36 = vadd.f32 %v3950_v15, %v205_v26  ;;  %v278_v63 = vmul.f32 %v3963_v5, %v3963_v5 }
  0x52   :  { %v334_v22 = vadd.f32 %v333_v2, %v271_v61  ;;  %v207_v44 = vadd.f32 %v3955_v25, %v206_v36  ;;  %v3989_v2 = vunpack.c.h.bf16 %v3561_v49 }
  0x54   :  { %v335_v30 = vadd.f32 %v334_v22, %v272_v6  ;;  %v208_v54 = vadd.f32 %v3963_v5, %v207_v44  ;;  %v3562_v6 = vld [vmem:[%s5781_s0 + $0xa8] sm:$0xff]   ;;  %5935 = vst [vmem:[#allocation15_spill] sm:$0xff] %v3989_v2  ;;  %v282_v49 = vmul.f32 %v3989_v2, %v3989_v2 }
  0x55   :  { %v3994_v22 = vunpack.c.l.bf16 %v3562_v6  ;;  %v4002_v36 = vunpack.c.h.bf16 %v3562_v6 }
  0x56   :  { %v336_v40 = vadd.f32 %v335_v30, %v273_v21  ;;  %v209_v61 = vadd.f32 %v3968_v43, %v208_v54 }
  0x57   :  { %5936 = vst [vmem:[#allocation16_spill] sm:$0xff] %v3994_v22 }
  0x58   :  { %v337_v48 = vadd.f32 %v336_v40, %v274_v28  ;;  %v210_v13 = vadd.f32 %v3976_v53, %v209_v61  ;;  %v280_v28 = vmul.f32 %v3976_v53, %v3976_v53  ;;  %5937 = vst [vmem:[#allocation17_spill] sm:$0xff] %v4002_v36  ;;  %v281_v40 = vmul.f32 %v3981_v59, %v3981_v59 }
  0x5a   :  { %v338_v57 = vadd.f32 %v337_v48, %v275_v39  ;;  %v211_v26 = vadd.f32 %v3981_v59, %v210_v13 }
  0x5c   :  { %v339_v27 = vadd.f32 %v338_v57, %v276_v46  ;;  %v212_v39 = vadd.f32 %v3989_v2, %v211_v26  ;;  %v4007_v46 = vunpack.c.l.bf16 %v3563_v34  ;;  %v4015_v57 = vunpack.c.h.bf16 %v3563_v34  ;;  %v3565_v26 = vld [vmem:[%s5781_s0 + $0xc0] sm:$0xff]  }
  0x5e   :  { %v340_v21 = vadd.f32 %v339_v27, %v277_v18  ;;  %5938 = vst [vmem:[#allocation18_spill] sm:$0xff] %v4007_v46  ;;  %v213_v48 = vadd.f32 %v3994_v22, %v212_v39  ;;  %v3564_v18 = vld [vmem:[%s5781_s0 + $0xb8] sm:$0xff]   ;;  %v285_v34 = vmul.f32 %v4007_v46, %v4007_v46 }
  0x5f   :  { %5939 = vst [vmem:[#allocation19_spill] sm:$0xff] %v4015_v57  ;;  %v4020_v6 = vunpack.c.l.bf16 %v3564_v18 }
  0x60   :  { %v341_v30 = vadd.f32 %v340_v21, %v278_v63  ;;  %v214_v61 = vadd.f32 %v4002_v36, %v213_v48  ;;  %v283_v63 = vmul.f32 %v3994_v22, %v3994_v22  ;;  %v286_v48 = vmul.f32 %v4015_v57, %v4015_v57 }
  0x61   :  { %5940 = vst [vmem:[#allocation20_spill] sm:$0xff] %v4020_v6 }
  0x62   :  { %v342_v44 = vadd.f32 %v341_v30, %v279_v17  ;;  %v215_v13 = vadd.f32 %v4007_v46, %v214_v61  ;;  %v284_v17 = vmul.f32 %v4002_v36, %v4002_v36 }
  0x64   :  { %v343_v54 = vadd.f32 %v342_v44, %v280_v28  ;;  %v4028_v28 = vunpack.c.h.bf16 %v3564_v18  ;;  %v216_v30 = vadd.f32 %v4015_v57, %v215_v13  ;;  %v4041_v18 = vunpack.c.h.bf16 %v3565_v26 }
  0x66   :  { %v344_v27 = vadd.f32 %v343_v54, %v281_v40  ;;  %5941 = vst [vmem:[#allocation21_spill] sm:$0xff] %v4028_v28  ;;  %v4033_v40 = vunpack.c.l.bf16 %v3565_v26  ;;  %v217_v44 = vadd.f32 %v4020_v6, %v216_v30  ;;  %v3566_v54 = vld [vmem:[%s5781_s0 + $0xc8] sm:$0xff]   ;;  %v288_v30 = vmul.f32 %v4028_v28, %v4028_v28 }
  0x67   :  { %5943 = vst [vmem:[#allocation23_spill] sm:$0xff] %v4041_v18  ;;  %v4046_v13 = vunpack.c.l.bf16 %v3566_v54  ;;  %v4054_v26 = vunpack.c.h.bf16 %v3566_v54 }
  0x68   :  { %v345_v21 = vadd.f32 %v344_v27, %v282_v49  ;;  %5942 = vst [vmem:[#allocation22_spill] sm:$0xff] %v4033_v40  ;;  %v218_v61 = vadd.f32 %v4028_v28, %v217_v44  ;;  %v287_v27 = vmul.f32 %v4020_v6, %v4020_v6  ;;  %v289_v6 = vmul.f32 %v4033_v40, %v4033_v40 }
  0x69   :  { %5944 = vst [vmem:[#allocation24_spill] sm:$0xff] %v4046_v13  ;;  %v290_v28 = vmul.f32 %v4041_v18, %v4041_v18 }
  0x6a   :  { %v346_v39 = vadd.f32 %v345_v21, %v283_v63  ;;  %v219_v21 = vadd.f32 %v4033_v40, %v218_v61  ;;  %5945 = vst [vmem:[#allocation25_spill] sm:$0xff] %v4054_v26  ;;  %v291_v40 = vmul.f32 %v4046_v13, %v4046_v13 }
  0x6c   :  { %v347_v49 = vadd.f32 %v346_v39, %v284_v17  ;;  %v3567_v39 = vld [vmem:[%s5781_s0 + $0xd0] sm:$0xff]   ;;  %v220_v44 = vadd.f32 %v4041_v18, %v219_v21  ;;  %v292_v18 = vmul.f32 %v4054_v26, %v4054_v26 }
  0x6d   :  { %v4067_v54 = vunpack.c.h.bf16 %v3567_v39 }
  0x6e   :  { %v348_v63 = vadd.f32 %v347_v49, %v285_v34  ;;  %v4059_v49 = vunpack.c.l.bf16 %v3567_v39  ;;  %v221_v61 = vadd.f32 %v4046_v13, %v220_v44 }
  0x6f   :  { %5947 = vst [vmem:[#allocation27_spill] sm:$0xff] %v4067_v54 }
  0x70   :  { %v349_v17 = vadd.f32 %v348_v63, %v286_v48  ;;  %5946 = vst [vmem:[#allocation26_spill] sm:$0xff] %v4059_v49  ;;  %v3568_v63 = vld [vmem:[%s5781_s0 + $0xd8] sm:$0xff]   ;;  %v222_v21 = vadd.f32 %v4054_v26, %v221_v61  ;;  %v293_v13 = vmul.f32 %v4059_v49, %v4059_v49  ;;  %v294_v26 = vmul.f32 %v4067_v54, %v4067_v54 }
  0x71   :  { %v4080_v39 = vunpack.c.h.bf16 %v3568_v63 }
  0x72   :  { %v350_v34 = vadd.f32 %v349_v17, %v287_v27  ;;  %v4072_v17 = vunpack.c.l.bf16 %v3568_v63  ;;  %v223_v44 = vadd.f32 %v4059_v49, %v222_v21 }
  0x73   :  { %5949 = vst [vmem:[#allocation29_spill] sm:$0xff] %v4080_v39 }
  0x74   :  { %v351_v48 = vadd.f32 %v350_v34, %v288_v30  ;;  %5948 = vst [vmem:[#allocation28_spill] sm:$0xff] %v4072_v17  ;;  %v3569_v34 = vld [vmem:[%s5781_s0 + $0xe0] sm:$0xff]   ;;  %v224_v61 = vadd.f32 %v4067_v54, %v223_v44  ;;  %v295_v49 = vmul.f32 %v4072_v17, %v4072_v17  ;;  %v296_v54 = vmul.f32 %v4080_v39, %v4080_v39 }
  0x75   :  { %v4093_v63 = vunpack.c.h.bf16 %v3569_v34 }
  0x76   :  { %v352_v27 = vadd.f32 %v351_v48, %v289_v6  ;;  %v4085_v48 = vunpack.c.l.bf16 %v3569_v34  ;;  %v225_v21 = vadd.f32 %v4072_v17, %v224_v61 }
  0x77   :  { %5951 = vst [vmem:[#allocation31_spill] sm:$0xff] %v4093_v63 }
  0x78   :  { %v353_v30 = vadd.f32 %v352_v27, %v290_v28  ;;  %5950 = vst [vmem:[#allocation30_spill] sm:$0xff] %v4085_v48  ;;  %v3570_v27 = vld [vmem:[%s5781_s0 + $0xe8] sm:$0xff]   ;;  %v226_v44 = vadd.f32 %v4080_v39, %v225_v21  ;;  %v297_v17 = vmul.f32 %v4085_v48, %v4085_v48  ;;  %v298_v39 = vmul.f32 %v4093_v63, %v4093_v63 }
  0x79   :  { %v4106_v34 = vunpack.c.h.bf16 %v3570_v27 }
  0x7a   :  { %v354_v6 = vadd.f32 %v353_v30, %v291_v40  ;;  %v4098_v30 = vunpack.c.l.bf16 %v3570_v27  ;;  %v227_v61 = vadd.f32 %v4085_v48, %v226_v44 }
  0x7b   :  { %5953 = vst [vmem:[#allocation33_spill] sm:$0xff] %v4106_v34 }
  0x7c   :  { %v355_v28 = vadd.f32 %v354_v6, %v292_v18  ;;  %5952 = vst [vmem:[#allocation32_spill] sm:$0xff] %v4098_v30  ;;  %v3571_v6 = vld [vmem:[%s5781_s0 + $0xf0] sm:$0xff]   ;;  %v228_v21 = vadd.f32 %v4093_v63, %v227_v61  ;;  %v299_v48 = vmul.f32 %v4098_v30, %v4098_v30  ;;  %v300_v63 = vmul.f32 %v4106_v34, %v4106_v34 }
  0x7d   :  { %v4119_v27 = vunpack.c.h.bf16 %v3571_v6 }
  0x7e   :  { %v356_v40 = vadd.f32 %v355_v28, %v293_v13  ;;  %v4111_v28 = vunpack.c.l.bf16 %v3571_v6  ;;  %v229_v44 = vadd.f32 %v4098_v30, %v228_v21 }
  0x7f   :  { %5955 = vst [vmem:[#allocation35_spill] sm:$0xff] %v4119_v27 }
  0x80   :  { %v357_v18 = vadd.f32 %v356_v40, %v294_v26  ;;  %5954 = vst [vmem:[#allocation34_spill] sm:$0xff] %v4111_v28  ;;  %v3572_v40 = vld [vmem:[%s5781_s0 + $0xf8] sm:$0xff]   ;;  %v230_v61 = vadd.f32 %v4106_v34, %v229_v44  ;;  %v301_v6 = vmul.f32 %v4111_v28, %v4111_v28 }
  0x82   :  { %v358_v13 = vadd.f32 %v357_v18, %v295_v49  ;;  %v4124_v18 = vunpack.c.l.bf16 %v3572_v40  ;;  %v231_v21 = vadd.f32 %v4111_v28, %v230_v61 }
  0x84   :  { %v359_v26 = vadd.f32 %v358_v13, %v296_v54  ;;  %5956 = vst [vmem:[#allocation36_spill] sm:$0xff] %v4124_v18  ;;  %v4129_v13 = vunpack.c.h.bf16 %v3572_v40  ;;  %v232_v57 = vadd.f32 %v4119_v27, %v231_v21  ;;  %v303_v34 = vmul.f32 %v4124_v18, %v4124_v18 }
  0x86   :  { %v360_v49 = vadd.f32 %v359_v26, %v297_v17  ;;  %5957 = vst [vmem:[#allocation37_spill] sm:$0xff] %v4129_v13  ;;  %v233_v46 = vadd.f32 %v4124_v18, %v232_v57  ;;  %v302_v17 = vmul.f32 %v4119_v27, %v4119_v27 }
  0x88   :  { %v361_v54 = vadd.f32 %v360_v49, %v298_v39  ;;  %v234_v61 = vadd.f32 %v4129_v13, %v233_v46  ;;  %v304_v49 = vmul.f32 %v4129_v13, %v4129_v13 }
  0x8a   :  { %v362_v44 = vadd.f32 %v361_v54, %v299_v48  ;;  %v235_v40 = vrot.slane %v234_v61, 4 }
  0x8c   :  { %v363_v26 = vadd.f32 %v362_v44, %v300_v63  ;;  %v236_v30 = vadd.f32 %v235_v40, %v234_v61 }
  0x8e   :  { %v364_v39 = vadd.f32 %v363_v26, %v301_v6  ;;  %v237_v48 = vrot.slane %v236_v30, 2 }
  0x90   :  { %v365_v21 = vadd.f32 %v364_v39, %v302_v17  ;;  %v238_v57 = vadd.f32 %v237_v48, %v236_v30 }
  0x92   :  { %v366_v28 = vadd.f32 %v365_v21, %v303_v34  ;;  %v239_v22 = vrot.slane %v238_v57, 1 }
  0x94   :  { %v367_v54 = vadd.f32 %v366_v28, %v304_v49  ;;  %v240_v63 = vadd.f32 %v239_v22, %v238_v57 }
  0x96   :  { %v368_v36 = vrot.slane %v367_v54, 4  ;;  %v374_v2 = vmul.f32 0.0061728396, %v240_v63 }
  0x98   :  { %v369_v27 = vadd.f32 %v368_v36, %v367_v54  ;;  %v376_v6 = vmul.f32 %v374_v2, %v374_v2  ;;  %v390_v36 = vld [vmem:[%s5782_s1] sm:$0x1] }
  0x9a   :  { %v370_v44 = vrot.slane %v369_v27, 2 }
  0x9c   :  { %v371_v46 = vadd.f32 %v370_v44, %v369_v27 }
  0x9e   :  { %v372_v59 = vrot.slane %v371_v46, 1 }
  0xa0   :  { %v373_v18 = vadd.f32 %v372_v59, %v371_v46 }
  0xa2   :  { %v375_v26 = vmul.f32 0.0061728396, %v373_v18 }
  0xa4   :  { %v377_v53 = vsub.f32 %v375_v26, %v376_v6 }
  0xa6   :  { %v378_v43 = vmax.f32 %v377_v53, 0.0 }
  0xa8   :  { %v379_v13 = vadd.f32 1e-05, %v378_v43  ;;  %v392_v43 = vld [vmem:[%s5783_s2] sm:$0x1] }
  0xaa   :  { %3590 = vrsqrt.f32 %v379_v13  ;;  %vm386_vm0 = vweird.f32 %v379_v13 }
  0xb0   :  { %v3591_v17 = vpop.eup %3590 }
  0xb1   :  { %v381_v34 = vmul.f32 %v3591_v17, %v379_v13  ;;  %vm387_vm1 = vweird.f32 %v3591_v17 }
  0xb2   :  { %vm388_vm2 = vmor %vm386_vm0, %vm387_vm1  ;;  %vm2921_vm1 = vcmask 1041408  }
  0xb3   :  { %v382_v61 = vmul.f32 %v3591_v17, %v381_v34 }
  0xb5   :  { %v383_v28 = vmul.f32 0.5, %v382_v61 }
  0xb7   :  { %v384_v30 = vsub.f32 1.5, %v383_v28 }
  0xb9   :  { %v385_v22 = vmul.f32 %v3591_v17, %v384_v30 }
  0xbb   :  { %v389_v59 = vsel %vm388_vm2, %v3591_v17, %v385_v22 }
  0xbc   :  { %v391_v27 = vmul.f32 %v390_v36, %v389_v59 }
  0xbe   :  { %v393_v53 = vmul.f32 %v391_v27, %v374_v2  ;;  %v4148_v18 = vperm.slane %v391_v27, 0 }
  0xc0   :  { %v4150_v39 = vsub.f32 %v392_v43, %v393_v53  ;;  %v833_v13 = vmul.f32 %v3702_v7, %v4148_v18  ;;  %v834_v40 = vmul.f32 %v3704_v8, %v4148_v18  ;;  %v835_v63 = vmul.f32 %v3706_v9, %v4148_v18 }
  0xc1   :  { %v836_v44 = vmul.f32 %v3718_v12, %v4148_v18  ;;  %v837_v61 = vmul.f32 %v3722_v14, %v4148_v18  ;;  %v838_v28 = vmul.f32 %v3738_v20, %v4148_v18  ;;  %v839_v43 = vmul.f32 %v3744_v23, %v4148_v18 }
  0xc2   :  { %v4157_v49 = vperm.slane %v4150_v39, 0  ;;  %v840_v53 = vmul.f32 %v3758_v29, %v4148_v18 }
  0xc4   :  { %v900_v21 = vadd.f32 %v4157_v49, %v833_v13  ;;  %v901_v48 = vadd.f32 %v4157_v49, %v834_v40  ;;  %v902_v46 = vadd.f32 %v4157_v49, %v835_v63  ;;  %v903_v6 = vadd.f32 %v4157_v49, %v836_v44 }
  0xc5   :  { %v904_v30 = vadd.f32 %v4157_v49, %v837_v61  ;;  %v905_v22 = vadd.f32 %v4157_v49, %v838_v28  ;;  %v906_v13 = vadd.f32 %v4157_v49, %v839_v43  ;;  %v907_v40 = vadd.f32 %v4157_v49, %v840_v53 }
  0xc6   :  { %v964_v54 = vmax.f32 %v900_v21, 0.0  ;;  %v965_v57 = vmax.f32 %v901_v48, 0.0  ;;  %v966_v26 = vmax.f32 %v902_v46, 0.0  ;;  %v967_v17 = vmax.f32 %v903_v6, 0.0 }
  0xc7   :  { %v968_v36 = vmax.f32 %v904_v30, 0.0  ;;  %v969_v59 = vmax.f32 %v905_v22, 0.0  ;;  %v970_v21 = vmax.f32 %v906_v13, 0.0  ;;  %v971_v48 = vmax.f32 %v907_v40, 0.0 }
  0xc8   :  { %v1028_v2 = vpack.c.bf16 %v965_v57, %v964_v54  ;;  %v1029_v34 = vpack.c.bf16 %v967_v17, %v966_v26  ;;  %v841_v57 = vmul.f32 %v3764_v33, %v4148_v18  ;;  %v843_v17 = vmul.f32 %v3779_v42, %v4148_v18 }
  0xc9   :  { %v1030_v27 = vpack.c.bf16 %v969_v59, %v968_v36  ;;  %v1031_v54 = vpack.c.bf16 %v971_v48, %v970_v21  ;;  %v845_v59 = vmul.f32 %v3793_v51, %v4148_v18  ;;  %v847_v48 = vmul.f32 %v3807_v60, %v4148_v18 }
  0xca   :  { %1132 = vmatmul.bf16.vlgmr.msra.gmra.mxu1 %v1028_v2  ;;  %v842_v2 = vmul.f32 %v3773_v38, %v4148_v18  ;;  %v908_v63 = vadd.f32 %v4157_v49, %v841_v57  ;;  %v910_v61 = vadd.f32 %v4157_v49, %v843_v17 }
  0xcb   :  { %v912_v43 = vadd.f32 %v4157_v49, %v845_v59  ;;  %v914_v57 = vadd.f32 %v4157_v49, %v847_v48  ;;  %v852_v59 = vmul.f32 %v3843_v31, %v4148_v18 }
  0xcc   :  { %v909_v44 = vadd.f32 %v4157_v49, %v842_v2  ;;  %v972_v46 = vmax.f32 %v908_v63, 0.0  ;;  %v974_v30 = vmax.f32 %v910_v61, 0.0 }
  0xcd   :  { %v976_v13 = vmax.f32 %v912_v43, 0.0  ;;  %v978_v63 = vmax.f32 %v914_v57, 0.0  ;;  %v919_v43 = vadd.f32 %v4157_v49, %v852_v59  ;;  %v854_v57 = vmul.f32 %v3857_v41, %v4148_v18 }
  0xce   :  { %v973_v6 = vmax.f32 %v909_v44, 0.0 }
  0xd0   :  { %v1032_v26 = vpack.c.bf16 %v973_v6, %v972_v46  ;;  %v849_v6 = vmul.f32 %v3821_v11, %v4148_v18 }
  0xd2   :  { %v916_v17 = vadd.f32 %v4157_v49, %v849_v6 }
  0xd4   :  { %v980_v61 = vmax.f32 %v916_v17, 0.0 }
  0xda   :  { %1137 = vmatmul.bf16.gmra.mxu1 %v1029_v34  ;;  %v844_v34 = vmul.f32 %v3787_v47, %v4148_v18 }
  0xdc   :  { %v911_v28 = vadd.f32 %v4157_v49, %v844_v34 }
  0xde   :  { %v975_v22 = vmax.f32 %v911_v28, 0.0 }
  0xe0   :  { %v1033_v36 = vpack.c.bf16 %v975_v22, %v974_v30 }
  0xea   :  { %1142 = vmatmul.bf16.gmra.mxu1 %v1030_v27  ;;  %v846_v27 = vmul.f32 %v3801_v56, %v4148_v18 }
  0xec   :  { %v913_v53 = vadd.f32 %v4157_v49, %v846_v27 }
  0xee   :  { %v977_v40 = vmax.f32 %v913_v53, 0.0 }
  0xf0   :  { %v1034_v21 = vpack.c.bf16 %v977_v40, %v976_v13  ;;  %v983_v40 = vmax.f32 %v919_v43, 0.0 }
  0xfa   :  { %1147 = vmatmul.bf16.gmra.mxu1 %v1031_v54  ;;  %v848_v54 = vmul.f32 %v3815_v1, %v4148_v18 }
  0xfc   :  { %v915_v2 = vadd.f32 %v4157_v49, %v848_v54  ;;  %v853_v54 = vmul.f32 %v3849_v35, %v4148_v18 }
  0xfe   :  { %v979_v44 = vmax.f32 %v915_v2, 0.0  ;;  %v920_v2 = vadd.f32 %v4157_v49, %v853_v54 }
 0x100   :  { %v1035_v46 = vpack.c.bf16 %v979_v44, %v978_v63  ;;  %v921_v63 = vadd.f32 %v4157_v49, %v854_v57 }
 0x102   :  { %v985_v6 = vmax.f32 %v921_v63, 0.0 }
 0x10a   :  { %1152 = vmatmul.bf16.gmra.mxu1 %v1032_v26  ;;  %v850_v26 = vmul.f32 %v3829_v19, %v4148_v18 }
 0x10c   :  { %v917_v34 = vadd.f32 %v4157_v49, %v850_v26 }
 0x10e   :  { %v981_v28 = vmax.f32 %v917_v34, 0.0  ;;  %v855_v34 = vmul.f32 %v3863_v45, %v4148_v18 }
 0x110   :  { %v1036_v30 = vpack.c.bf16 %v981_v28, %v980_v61  ;;  %v856_v61 = vmul.f32 %v3871_v52, %v4148_v18  ;;  %v922_v28 = vadd.f32 %v4157_v49, %v855_v34  ;;  %v859_v34 = vmul.f32 %v3890_v4, %v4148_v18 }
 0x112   :  { %v986_v59 = vmax.f32 %v922_v28, 0.0  ;;  %v926_v28 = vadd.f32 %v4157_v49, %v859_v34 }
 0x11a   :  { %1157 = vmatmul.bf16.gmra.mxu1 %v1033_v36  ;;  %v851_v36 = vmul.f32 %v3835_v24, %v4148_v18 }
 0x11c   :  { %v918_v27 = vadd.f32 %v4157_v49, %v851_v36 }
 0x11e   :  { %v982_v13 = vmax.f32 %v918_v27, 0.0 }
 0x12a   :  { %1162 = vmatmul.bf16.gmra.mxu1 %v1034_v21  ;;  %v1037_v21 = vpack.c.bf16 %v983_v40, %v982_v13  ;;  %v857_v40 = vmul.f32 %v3877_v55, %v4148_v18 }
 0x12c   :  { %v924_v54 = vadd.f32 %v4157_v49, %v857_v40 }
 0x12e   :  { %v988_v63 = vmax.f32 %v924_v54, 0.0  ;;  %v861_v54 = vmul.f32 %v3903_v3, %v4148_v18  ;;  %v6001_v3 = vld [vmem:[#allocation25_spill] sm:$0xff] }
 0x13a   :  { %1167 = vmatmul.bf16.gmra.mxu1 %v1035_v46  ;;  %v984_v46 = vmax.f32 %v920_v2, 0.0 }
 0x13c   :  { %v1038_v26 = vpack.c.bf16 %v985_v6, %v984_v46 }
 0x147   :  { %v4209_v22 = vpop.f32.mrf.mxu1 }
 0x14a   :  { %1172 = vmatmul.bf16.gmra.mxu1 %v1036_v30  ;;  %v923_v30 = vadd.f32 %v4157_v49, %v856_v61  ;;  %v860_v61 = vmul.f32 %v3898_v16, %v4148_v18 }
 0x14c   :  { %v987_v27 = vmax.f32 %v923_v30, 0.0  ;;  %v927_v30 = vadd.f32 %v4157_v49, %v860_v61 }
 0x14e   :  { %v1039_v43 = vpack.c.bf16 %v987_v27, %v986_v59  ;;  %v990_v27 = vmax.f32 %v926_v28, 0.0 }
 0x14f   :  { %v4217_v53 = vpop.f32.mrf.mxu1 }
 0x157   :  { %v4219_v48 = vpop.f32.mrf.mxu1 }
 0x15a   :  { %1177 = vmatmul.bf16.gmra.mxu1 %v1037_v21  ;;  %v858_v21 = vmul.f32 %v3885_v62, %v4148_v18 }
 0x15c   :  { %v925_v57 = vadd.f32 %v4157_v49, %v858_v21 }
 0x15e   :  { %v989_v46 = vmax.f32 %v925_v57, 0.0  ;;  %v862_v57 = vmul.f32 %v3911_v32, %v4148_v18 }
 0x15f   :  { %v4227_v44 = vpop.f32.mrf.mxu1 }
 0x160   :  { %v1040_v6 = vpack.c.bf16 %v989_v46, %v988_v63  ;;  %v928_v63 = vadd.f32 %v4157_v49, %v861_v54  ;;  %v929_v46 = vadd.f32 %v4157_v49, %v862_v57 }
 0x162   :  { %v992_v34 = vmax.f32 %v928_v63, 0.0  ;;  %v993_v61 = vmax.f32 %v929_v46, 0.0 }
 0x164   :  { %v1042_v28 = vpack.c.bf16 %v993_v61, %v992_v34  ;;  %v865_v34 = vmul.f32 %v3929_v50, %v4148_v18  ;;  %v866_v61 = vmul.f32 %v3937_v58, %v4148_v18 }
 0x167   :  { %v4229_v17 = vpop.f32.mrf.mxu1 }
 0x16a   :  { %1182 = vmatmul.bf16.gmra.mxu1 %v1038_v26 }
 0x16f   :  { %v4237_v36 = vpop.f32.mrf.mxu1 }
 0x170   :  { %5958 = vst [vmem:[#allocation38_spill] sm:$0xff] %v4237_v36 }
 0x177   :  { %v4239_v13 = vpop.f32.mrf.mxu1 }
 0x178   :  { %5959 = vst [vmem:[#allocation39_spill] sm:$0xff] %v4239_v13 }
 0x17a   :  { %1187 = vmatmul.bf16.gmra.mxu1 %v1039_v43  ;;  %v991_v43 = vmax.f32 %v927_v30, 0.0 }
 0x17c   :  { %v1041_v40 = vpack.c.bf16 %v991_v43, %v990_v27  ;;  %v863_v27 = vmul.f32 %v3916_v37, %v4148_v18  ;;  %v864_v43 = vmul.f32 %v3924_v10, %v4148_v18 }
 0x17e   :  { %v931_v54 = vadd.f32 %v4157_v49, %v864_v43 }
 0x17f   :  { %v4247_v2 = vpop.f32.mrf.mxu1 }
 0x180   :  { %5960 = vst [vmem:[#allocation40_spill] sm:$0xff] %v4247_v2 }
 0x187   :  { %v4249_v26 = vpop.f32.mrf.mxu1 }
 0x188   :  { %5961 = vst [vmem:[#allocation41_spill] sm:$0xff] %v4249_v26 }
 0x18a   :  { %1192 = vmatmul.bf16.gmra.mxu1 %v1040_v6 }
 0x18f   :  { %v4257_v59 = vpop.f32.mrf.mxu1 }
 0x190   :  { %5962 = vst [vmem:[#allocation42_spill] sm:$0xff] %v4257_v59 }
 0x197   :  { %v4259_v21 = vpop.f32.mrf.mxu1 }
 0x198   :  { %5963 = vst [vmem:[#allocation43_spill] sm:$0xff] %v4259_v21 }
 0x19a   :  { %1197 = vmatmul.bf16.gmra.mxu1 %v1041_v40  ;;  %v930_v40 = vadd.f32 %v4157_v49, %v863_v27  ;;  %v933_v27 = vadd.f32 %v4157_v49, %v866_v61 }
 0x19c   :  { %v994_v57 = vmax.f32 %v930_v40, 0.0 }
 0x19f   :  { %v4267_v6 = vpop.f32.mrf.mxu1 }
 0x1a0   :  { %5964 = vst [vmem:[#allocation44_spill] sm:$0xff] %v4267_v6  ;;  %v995_v6 = vmax.f32 %v931_v54, 0.0 }
 0x1a2   :  { %v1043_v63 = vpack.c.bf16 %v995_v6, %v994_v57  ;;  %v867_v6 = vmul.f32 %v3942_v0, %v4148_v18  ;;  %v868_v57 = vmul.f32 %v3950_v15, %v4148_v18 }
 0x1a7   :  { %v4269_v30 = vpop.f32.mrf.mxu1 }
 0x1a8   :  { %5965 = vst [vmem:[#allocation45_spill] sm:$0xff] %v4269_v30 }
 0x1aa   :  { %1202 = vmatmul.bf16.gmra.mxu1 %v1042_v28  ;;  %v932_v28 = vadd.f32 %v4157_v49, %v865_v34  ;;  %v935_v34 = vadd.f32 %v4157_v49, %v868_v57 }
 0x1ac   :  { %v996_v43 = vmax.f32 %v932_v28, 0.0 }
 0x1af   :  { %v4277_v21 = vpop.f32.mrf.mxu1 }
 0x1b0   :  { %5966 = vst [vmem:[#allocation46_spill] sm:$0xff] %v4277_v21  ;;  %v997_v21 = vmax.f32 %v933_v27, 0.0 }
 0x1b2   :  { %v1044_v40 = vpack.c.bf16 %v997_v21, %v996_v43  ;;  %v869_v21 = vmul.f32 %v3955_v25, %v4148_v18  ;;  %v870_v43 = vmul.f32 %v3963_v5, %v4148_v18 }
 0x1b7   :  { %v4279_v46 = vpop.f32.mrf.mxu1 }
 0x1b8   :  { %5967 = vst [vmem:[#allocation47_spill] sm:$0xff] %v4279_v46 }
 0x1ba   :  { %1207 = vmatmul.bf16.gmra.mxu1 %v1043_v63  ;;  %v934_v63 = vadd.f32 %v4157_v49, %v867_v6  ;;  %v937_v6 = vadd.f32 %v4157_v49, %v870_v43 }
 0x1bc   :  { %v998_v61 = vmax.f32 %v934_v63, 0.0 }
 0x1bf   :  { %v4287_v30 = vpop.f32.mrf.mxu1 }
 0x1c0   :  { %5968 = vst [vmem:[#allocation48_spill] sm:$0xff] %v4287_v30  ;;  %v999_v30 = vmax.f32 %v935_v34, 0.0 }
 0x1c2   :  { %v1045_v28 = vpack.c.bf16 %v999_v30, %v998_v61  ;;  %v5974_v30 = vld [vmem:[#allocation12_spill] sm:$0xff] }
 0x1c3   :  { %v871_v61 = vmul.f32 %v5974_v30, %v4148_v18 }
 0x1c5   :  { %v938_v59 = vadd.f32 %v4157_v49, %v871_v61 }
 0x1c7   :  { %v4289_v54 = vpop.f32.mrf.mxu1  ;;  %v1002_v43 = vmax.f32 %v938_v59, 0.0 }
 0x1c8   :  { %5969 = vst [vmem:[#allocation49_spill] sm:$0xff] %v4289_v54 }
 0x1ca   :  { %1212 = vmatmul.bf16.gmra.mxu1 %v1044_v40  ;;  %v936_v40 = vadd.f32 %v4157_v49, %v869_v21 }
 0x1cc   :  { %v1000_v57 = vmax.f32 %v936_v40, 0.0 }
 0x1cf   :  { %v4297_v46 = vpop.f32.mrf.mxu1 }
 0x1d0   :  { %5970 = vst [vmem:[#allocation50_spill] sm:$0xff] %v4297_v46  ;;  %v1001_v46 = vmax.f32 %v937_v6, 0.0 }
 0x1d2   :  { %v1046_v63 = vpack.c.bf16 %v1001_v46, %v1000_v57  ;;  %v5978_v46 = vld [vmem:[#allocation14_spill] sm:$0xff] }
 0x1d3   :  { %v873_v57 = vmul.f32 %v5978_v46, %v4148_v18 }
 0x1d5   :  { %v940_v2 = vadd.f32 %v4157_v49, %v873_v57 }
 0x1d7   :  { %v4299_v27 = vpop.f32.mrf.mxu1 }
 0x1d8   :  { %5971 = vst [vmem:[#allocation51_spill] sm:$0xff] %v4299_v27 }
 0x1da   :  { %1217 = vmatmul.bf16.gmra.mxu1 %v1045_v28  ;;  %v5975_v28 = vld [vmem:[#allocation13_spill] sm:$0xff] }
 0x1db   :  { %v872_v27 = vmul.f32 %v5975_v28, %v4148_v18 }
 0x1dd   :  { %v939_v21 = vadd.f32 %v4157_v49, %v872_v27  ;;  %v1004_v27 = vmax.f32 %v940_v2, 0.0 }
 0x1df   :  { %v4307_v54 = vpop.f32.mrf.mxu1 }
 0x1e0   :  { %5972 = vst [vmem:[#allocation52_spill] sm:$0xff] %v4307_v54  ;;  %v1003_v54 = vmax.f32 %v939_v21, 0.0 }
 0x1e2   :  { %v1047_v40 = vpack.c.bf16 %v1003_v54, %v1002_v43  ;;  %v5982_v54 = vld [vmem:[#allocation16_spill] sm:$0xff] }
 0x1e3   :  { %v875_v43 = vmul.f32 %v5982_v54, %v4148_v18 }
 0x1e5   :  { %v942_v10 = vadd.f32 %v4157_v49, %v875_v43 }
 0x1e7   :  { %v4309_v34 = vpop.f32.mrf.mxu1 }
 0x1e8   :  { %5973 = vst [vmem:[#allocation53_spill] sm:$0xff] %v4309_v34 }
 0x1ea   :  { %1222 = vmatmul.bf16.gmra.mxu1 %v1046_v63  ;;  %v5979_v63 = vld [vmem:[#allocation15_spill] sm:$0xff] }
 0x1eb   :  { %v874_v34 = vmul.f32 %v5979_v63, %v4148_v18 }
 0x1ed   :  { %v941_v61 = vadd.f32 %v4157_v49, %v874_v34  ;;  %v1006_v34 = vmax.f32 %v942_v10, 0.0 }
 0x1ef   :  { %v4317_v26 = vpop.f32.mrf.mxu1 }
 0x1f0   :  { %5976 = vst [vmem:[#allocation12_spill] sm:$0xff] %v4317_v26  ;;  %v1005_v26 = vmax.f32 %v941_v61, 0.0 }
 0x1f2   :  { %v1048_v59 = vpack.c.bf16 %v1005_v26, %v1004_v27  ;;  %v5986_v26 = vld [vmem:[#allocation18_spill] sm:$0xff] }
 0x1f3   :  { %v877_v27 = vmul.f32 %v5986_v26, %v4148_v18 }
 0x1f5   :  { %v944_v60 = vadd.f32 %v4157_v49, %v877_v27 }
 0x1f7   :  { %v4319_v6 = vpop.f32.mrf.mxu1 }
 0x1f8   :  { %5977 = vst [vmem:[#allocation13_spill] sm:$0xff] %v4319_v6 }
 0x1fa   :  { %1227 = vmatmul.bf16.gmra.mxu1 %v1047_v40  ;;  %v5983_v40 = vld [vmem:[#allocation17_spill] sm:$0xff] }
 0x1fb   :  { %v876_v6 = vmul.f32 %v5983_v40, %v4148_v18  ;;  %v884_v40 = vmul.f32 %v6001_v3, %v4148_v18 }
 0x1fd   :  { %v943_v57 = vadd.f32 %v4157_v49, %v876_v6  ;;  %v1008_v6 = vmax.f32 %v944_v60, 0.0 }
 0x1ff   :  { %v4327_v1 = vpop.f32.mrf.mxu1 }
 0x200   :  { %5980 = vst [vmem:[#allocation14_spill] sm:$0xff] %v4327_v1  ;;  %v1007_v1 = vmax.f32 %v943_v57, 0.0 }
 0x202   :  { %v1049_v2 = vpack.c.bf16 %v1007_v1, %v1006_v34  ;;  %v5990_v1 = vld [vmem:[#allocation20_spill] sm:$0xff] }
 0x203   :  { %v879_v34 = vmul.f32 %v5990_v1, %v4148_v18 }
 0x205   :  { %v946_v36 = vadd.f32 %v4157_v49, %v879_v34 }
 0x207   :  { %v4329_v21 = vpop.f32.mrf.mxu1 }
 0x208   :  { %5981 = vst [vmem:[#allocation15_spill] sm:$0xff] %v4329_v21 }
 0x20a   :  { %1232 = vmatmul.bf16.gmra.mxu1 %v1048_v59  ;;  %v5987_v59 = vld [vmem:[#allocation19_spill] sm:$0xff] }
 0x20b   :  { %v878_v21 = vmul.f32 %v5987_v59, %v4148_v18 }
 0x20d   :  { %v945_v43 = vadd.f32 %v4157_v49, %v878_v21  ;;  %v1010_v21 = vmax.f32 %v946_v36, 0.0 }
 0x20f   :  { %v4337_v13 = vpop.f32.mrf.mxu1 }
 0x210   :  { %5984 = vst [vmem:[#allocation54_spill] sm:$0xff] %v4337_v13  ;;  %v1009_v13 = vmax.f32 %v945_v43, 0.0 }
 0x212   :  { %v1050_v10 = vpack.c.bf16 %v1009_v13, %v1008_v6  ;;  %v5994_v13 = vld [vmem:[#allocation22_spill] sm:$0xff] }
 0x213   :  { %v881_v6 = vmul.f32 %v5994_v13, %v4148_v18 }
 0x217   :  { %v4339_v61 = vpop.f32.mrf.mxu1 }
 0x218   :  { %5985 = vst [vmem:[#allocation55_spill] sm:$0xff] %v4339_v61 }
 0x21a   :  { %1237 = vmatmul.bf16.gmra.mxu1 %v1049_v2  ;;  %v5991_v2 = vld [vmem:[#allocation21_spill] sm:$0xff] }
 0x21b   :  { %v880_v61 = vmul.f32 %v5991_v2, %v4148_v18  ;;  %v948_v2 = vadd.f32 %v4157_v49, %v881_v6 }
 0x21d   :  { %v947_v27 = vadd.f32 %v4157_v49, %v880_v61  ;;  %v5997_v61 = vld [vmem:[#allocation32_spill] sm:$0xff] }
 0x21e   :  { %v891_v36 = vmul.f32 %v5997_v61, %v4148_v18 }
 0x21f   :  { %v4347_v37 = vpop.f32.mrf.mxu1 }
 0x220   :  { %5988 = vst [vmem:[#allocation56_spill] sm:$0xff] %v4347_v37  ;;  %v1011_v37 = vmax.f32 %v947_v27, 0.0 }
 0x222   :  { %v1051_v60 = vpack.c.bf16 %v1011_v37, %v1010_v21  ;;  %v5998_v37 = vld [vmem:[#allocation33_spill] sm:$0xff]  ;;  %v1012_v21 = vmax.f32 %v948_v2, 0.0 }
 0x223   :  { %v892_v27 = vmul.f32 %v5998_v37, %v4148_v18 }
 0x227   :  { %v4349_v57 = vpop.f32.mrf.mxu1 }
 0x228   :  { %5989 = vst [vmem:[#allocation57_spill] sm:$0xff] %v4349_v57 }
 0x22a   :  { %1242 = vmatmul.bf16.gmra.mxu1 %v1050_v10  ;;  %v5995_v10 = vld [vmem:[#allocation23_spill] sm:$0xff] }
 0x22b   :  { %v882_v57 = vmul.f32 %v5995_v10, %v4148_v18 }
 0x22d   :  { %v949_v34 = vadd.f32 %v4157_v49, %v882_v57  ;;  %v6000_v57 = vld [vmem:[#allocation24_spill] sm:$0xff] }
 0x22f   :  { %v4357_v59 = vpop.f32.mrf.mxu1 }
 0x230   :  { %5992 = vst [vmem:[#allocation58_spill] sm:$0xff] %v4357_v59  ;;  %v959_v59 = vadd.f32 %v4157_v49, %v892_v27 }
 0x232   :  { %v1023_v32 = vmax.f32 %v959_v59, 0.0  ;;  %v6003_v59 = vld [vmem:[#allocation34_spill] sm:$0xff] }
 0x237   :  { %v4359_v43 = vpop.f32.mrf.mxu1 }
 0x238   :  { %5993 = vst [vmem:[#allocation59_spill] sm:$0xff] %v4359_v43  ;;  %v958_v43 = vadd.f32 %v4157_v49, %v891_v36 }
 0x23a   :  { %1247 = vmatmul.bf16.gmra.mxu1 %v1051_v60  ;;  %v1013_v60 = vmax.f32 %v949_v34, 0.0  ;;  %v1022_v56 = vmax.f32 %v958_v43, 0.0  ;;  %v951_v34 = vadd.f32 %v4157_v49, %v884_v40  ;;  %v893_v43 = vmul.f32 %v6003_v59, %v4148_v18  ;;  %v6006_v40 = vld [vmem:[#allocation26_spill] sm:$0xff]  ;;  %v6007_v59 = vld [vmem:[#allocation27_spill] sm:$0xff] }
 0x23c   :  { %v1052_v26 = vpack.c.bf16 %v1013_v60, %v1012_v21  ;;  %v1057_v6 = vpack.c.bf16 %v1023_v32, %v1022_v56  ;;  %v6004_v56 = vld [vmem:[#allocation35_spill] sm:$0xff]  ;;  %v960_v21 = vadd.f32 %v4157_v49, %v893_v43 }
 0x23d   :  { %v894_v32 = vmul.f32 %v6004_v56, %v4148_v18  ;;  %v886_v56 = vmul.f32 %v6007_v59, %v4148_v18 }
 0x23e   :  { %1277 = vmatmul.bf16.vlgmr.msra.gmra.mxu2 %v1057_v6  ;;  %v1024_v6 = vmax.f32 %v960_v21, 0.0 }
 0x23f   :  { %v4367_v1 = vpop.f32.mrf.mxu1  ;;  %v961_v60 = vadd.f32 %v4157_v49, %v894_v32  ;;  %v6009_v32 = vld [vmem:[#allocation36_spill] sm:$0xff] }
 0x240   :  { %5996 = vst [vmem:[#allocation22_spill] sm:$0xff] %v4367_v1  ;;  %v883_v1 = vmul.f32 %v6000_v57, %v4148_v18 }
 0x242   :  { %v950_v2 = vadd.f32 %v4157_v49, %v883_v1 }
 0x244   :  { %v1014_v27 = vmax.f32 %v950_v2, 0.0 }
 0x247   :  { %v4375_v51 = vpop.f32.mrf.mxu1 }
 0x248   :  { %5999 = vst [vmem:[#allocation23_spill] sm:$0xff] %v4375_v51  ;;  %v1025_v51 = vmax.f32 %v961_v60, 0.0 }
 0x24a   :  { %1252 = vmatmul.bf16.gmra.mxu1 %v1052_v26  ;;  %v1015_v26 = vmax.f32 %v951_v34, 0.0  ;;  %v1058_v1 = vpack.c.bf16 %v1025_v51, %v1024_v6  ;;  %v953_v34 = vadd.f32 %v4157_v49, %v886_v56  ;;  %v6010_v51 = vld [vmem:[#allocation37_spill] sm:$0xff]  ;;  %v6012_v56 = vld [vmem:[#allocation28_spill] sm:$0xff] }
 0x24c   :  { %v1053_v37 = vpack.c.bf16 %v1015_v26, %v1014_v27  ;;  %v895_v27 = vmul.f32 %v6009_v32, %v4148_v18  ;;  %v896_v26 = vmul.f32 %v6010_v51, %v4148_v18  ;;  %v6013_v32 = vld [vmem:[#allocation29_spill] sm:$0xff] }
 0x24d   :  { %v888_v51 = vmul.f32 %v6013_v32, %v4148_v18 }
 0x24e   :  { %1282 = vmatmul.bf16.gmra.mxu2 %v1058_v1  ;;  %v962_v60 = vadd.f32 %v4157_v49, %v895_v27  ;;  %v963_v6 = vadd.f32 %v4157_v49, %v896_v26 }
 0x24f   :  { %v4383_v36 = vpop.f32.mrf.mxu1 }
 0x250   :  { %6002 = vst [vmem:[#allocation24_spill] sm:$0xff] %v4383_v36  ;;  %v885_v36 = vmul.f32 %v6006_v40, %v4148_v18  ;;  %v1026_v1 = vmax.f32 %v962_v60, 0.0 }
 0x252   :  { %v952_v2 = vadd.f32 %v4157_v49, %v885_v36 }
 0x254   :  { %v1016_v21 = vmax.f32 %v952_v2, 0.0 }
 0x257   :  { %v4391_v47 = vpop.f32.mrf.mxu1 }
 0x258   :  { %6005 = vst [vmem:[#allocation25_spill] sm:$0xff] %v4391_v47  ;;  %v1027_v47 = vmax.f32 %v963_v6, 0.0 }
 0x25a   :  { %1257 = vmatmul.bf16.gmra.mxu1 %v1053_v37  ;;  %v1017_v37 = vmax.f32 %v953_v34, 0.0  ;;  %v1059_v36 = vpack.c.bf16 %v1027_v47, %v1026_v1  ;;  %v955_v34 = vadd.f32 %v4157_v49, %v888_v51  ;;  %v1293_v47 = vmax.f32 %v4150_v39, 0.0  ;;  %v6016_v1 = vld [vmem:[#allocation30_spill] sm:$0xff] }
 0x25c   :  { %v1054_v16 = vpack.c.bf16 %v1017_v37, %v1016_v21  ;;  %v1019_v60 = vmax.f32 %v955_v34, 0.0  ;;  %v1294_v37 = vpack.c.bf16 %v1293_v47, %v1293_v47 }
 0x25e   :  { %1287 = vmatmul.bf16.gmra.mxu2 %v1059_v36  ;;  %v889_v36 = vmul.f32 %v6016_v1, %v4148_v18 }
 0x25f   :  { %v4399_v43 = vpop.f32.mrf.mxu1 }
 0x260   :  { %6008 = vst [vmem:[#allocation26_spill] sm:$0xff] %v4399_v43  ;;  %v887_v43 = vmul.f32 %v6012_v56, %v4148_v18  ;;  %v956_v51 = vadd.f32 %v4157_v49, %v889_v36 }
 0x262   :  { %v954_v2 = vadd.f32 %v4157_v49, %v887_v43  ;;  %v1020_v39 = vmax.f32 %v956_v51, 0.0 }
 0x264   :  { %v1018_v26 = vmax.f32 %v954_v2, 0.0 }
 0x266   :  { %v1055_v21 = vpack.c.bf16 %v1019_v60, %v1018_v26 }
 0x267   :  { %v4407_v54 = vpop.f32.mrf.mxu1 }
 0x268   :  { %6011 = vst [vmem:[#allocation27_spill] sm:$0xff] %v4407_v54  ;;  %v6017_v54 = vld [vmem:[#allocation31_spill] sm:$0xff] }
 0x269   :  { %v890_v43 = vmul.f32 %v6017_v54, %v4148_v18  ;;  %v395_v18 = vmax.f32 %v3702_v7, %v3821_v11  ;;  %v413_v7 = vmax.f32 %v3942_v0, %v6000_v57 }
 0x26a   :  { %1262 = vmatmul.bf16.gmra.mxu1 %v1054_v16  ;;  %v1296_v16 = vpack.i.b16 %v1294_v37, %v1294_v37 }
 0x26b   :  { %v957_v2 = vadd.f32 %v4157_v49, %v890_v43  ;;  %v411_v49 = vmax.f32 %v3929_v50, %v5994_v13  ;;  %v398_v50 = vmax.f32 %v3718_v12, %v3843_v31  ;;  %v399_v12 = vmax.f32 %v3722_v14, %v3849_v35 }
 0x26c   :  { %v1298_v61 = vperm.slane %v1296_v16, 0  ;;  %v412_v16 = vmax.f32 %v3937_v58, %v5995_v10  ;;  %v414_v58 = vmax.f32 %v3950_v15, %v6001_v3  ;;  %v415_v31 = vmax.f32 %v3955_v25, %v6006_v40 }
 0x26d   :  { %v1021_v26 = vmax.f32 %v957_v2, 0.0  ;;  %v1383_v35 = vmul.f32 %v4209_v22, %v4209_v22  ;;  %v400_v25 = vmax.f32 %v3738_v20, %v3857_v41  ;;  %v416_v40 = vmax.f32 %v3963_v5, %v6007_v59 }
 0x26e   :  { %1307 = vmatmul.bf16.vlgmr.msrb.gmra.mxu2 %v1298_v61  ;;  %v396_v61 = vmax.f32 %v3704_v8, %v3829_v19  ;;  %v427_v8 = vmax.f32 %v395_v18, %v411_v49  ;;  %v430_v15 = vmax.f32 %v398_v50, %v414_v58  ;;  %v431_v49 = vmax.f32 %v399_v12, %v415_v31 }
 0x26f   :  { %v4415_v27 = vpop.f32.mrf.mxu1  ;;  %v1056_v60 = vpack.c.bf16 %v1021_v26, %v1020_v39  ;;  %v397_v39 = vmax.f32 %v3706_v9, %v3835_v24  ;;  %v3596_v9 = vmov 0.0   ;;  %v1385_v59 = vmul.f32 %v4219_v48, %v4219_v48 }
 0x270   :  { %6014 = vst [vmem:[#allocation28_spill] sm:$0xff] %v4415_v27  ;;  %v428_v13 = vmax.f32 %v396_v61, %v412_v16  ;;  %v1384_v61 = vmul.f32 %v4217_v53, %v4217_v53  ;;  %v1312_v16 = vadd.f32 %v4217_v53, %v4209_v22  ;;  %v1386_v58 = vmul.f32 %v4227_v44, %v4227_v44 }
 0x271   :  { %v429_v10 = vmax.f32 %v397_v39, %v413_v7  ;;  %v401_v39 = vmax.f32 %v3744_v23, %v3863_v45  ;;  %v417_v7 = vmax.f32 %v5974_v30, %v6012_v56  ;;  %v402_v23 = vmax.f32 %v3758_v29, %v3871_v52 }
 0x272   :  { %v1447_v41 = vadd.f32 %v1384_v61, %v1383_v35  ;;  %v1313_v5 = vadd.f32 %v1312_v16, %v4219_v48  ;;  %v418_v45 = vmax.f32 %v5975_v28, %v6013_v32  ;;  %v419_v29 = vmax.f32 %v5978_v46, %v6016_v1  ;;  %v6021_v46 = vld [vmem:[#allocation32_spill] sm:$0xff]  ;;  %v6023_v61 = vld [vmem:[#allocation7_spill] sm:$0xff] }
 0x273   :  { %v420_v52 = vmax.f32 %v5979_v63, %v6017_v54  ;;  %v6022_v63 = vld [vmem:[#allocation16_spill] sm:$0xff] }
 0x274   :  { %v1448_v32 = vadd.f32 %v1447_v41, %v1385_v59  ;;  %v421_v54 = vmax.f32 %v6022_v63, %v6021_v46  ;;  %v6028_v41 = vld [vmem:[#allocation3_spill] sm:$0xff] }
 0x277   :  { %v4418_v6 = vpop.f32.mrf.mxu1 }
 0x278   :  { %6015 = vst [vmem:[#allocation29_spill] sm:$0xff] %v4418_v6 }
 0x27a   :  { %1267 = vmatmul.bf16.gmra.mxu1 %v1055_v21  ;;  %v443_v21 = vlaneseq }
 0x27c   :  { %v4430_v37 = vshrl.u32 %v443_v21, 7 }
 0x27e   :  { %v445_v6 = vadd.s32 8, %v4430_v37  ;;  %v446_v43 = vadd.s32 16, %v4430_v37  ;;  %v492_v51 = vand.u32 7, %v4430_v37  ;;  %v447_v11 = vadd.s32 24, %v4430_v37 }
 0x27f   :  { %v4426_v34 = vpop.f32.mrf.mxu1  ;;  %v453_v20 = vadd.s32 72, %v4430_v37  ;;  %v455_v28 = vadd.s32 88, %v4430_v37 }
 0x280   :  { %6018 = vst [vmem:[#allocation30_spill] sm:$0xff] %v4426_v34  ;;  %v493_v2 = vand.u32 7, %v445_v6  ;;  %v494_v19 = vand.u32 7, %v446_v43  ;;  %v495_v26 = vand.u32 7, %v447_v11  ;;  %vm508_vm3 = vcmp.lt.s32.totalorder %v492_v51, 4 }
 0x281   :  { %v2966_v24 = vsel %vm508_vm3, 1.0, %v3596_v9  ;;  %v452_v43 = vadd.s32 64, %v4430_v37  ;;  %v454_v11 = vadd.s32 80, %v4430_v37  ;;  %v503_v1 = vand.u32 7, %v455_v28  ;;  %v6033_v28 = vld [vmem:[#allocation35_spill] sm:$0xff] }
 0x282   :  { %vm509_vm4 = vcmp.lt.s32.totalorder %v493_v2, 4  ;;  %vm510_vm5 = vcmp.lt.s32.totalorder %v494_v19, 4  ;;  %vm511_vm6 = vcmp.lt.s32.totalorder %v495_v26, 4  ;;  %v4463_v6 = vmul.f32 %v2966_v24, %v427_v8 }
 0x283   :  { %v2967_v0 = vsel %vm509_vm4, 1.0, %v3596_v9  ;;  %v2968_v57 = vsel %vm510_vm5, 1.0, %v3596_v9  ;;  %v2969_v18 = vsel %vm511_vm6, 1.0, %v3596_v9  ;;  %v432_v8 = vmax.f32 %v400_v25, %v416_v40  ;;  %v6025_v25 = vld [vmem:[#allocation33_spill] sm:$0xff] }
 0x284   :  { %v4467_v21 = vmul.f32 %v2968_v57, %v429_v10  ;;  %v4483_v51 = vmul.f32 %v2969_v18, %v430_v15  ;;  %v4495_v19 = vmul.f32 0.0, %v431_v49  ;;  %v500_v30 = vand.u32 7, %v452_v43  ;;  %v6026_v40 = vld [vmem:[#allocation17_spill] sm:$0xff] }
 0x285   :  { %v433_v10 = vmax.f32 %v401_v39, %v417_v7  ;;  %v501_v26 = vand.u32 7, %v453_v20  ;;  %v404_v24 = vmax.f32 %v3773_v38, %v3885_v62  ;;  %v1387_v57 = vmul.f32 %v4229_v17, %v4229_v17  ;;  %v6027_v20 = vld [vmem:[#allocation8_spill] sm:$0xff] }
 0x286   :  { %vm516_vm7 = vcmp.lt.s32.totalorder %v500_v30, 4  ;;  %v4518_v12 = vmul.f32 0.0, %v432_v8  ;;  %v405_v62 = vmax.f32 %v3779_v42, %v3890_v4  ;;  %v1449_v37 = vadd.f32 %v1448_v32, %v1386_v58  ;;  %v6029_v8 = vld [vmem:[#allocation34_spill] sm:$0xff]  ;;  %v6034_v32 = vld [vmem:[#allocation19_spill] sm:$0xff] }
 0x287   :  { %v4428_v47 = vpop.f32.mrf.mxu1  ;;  %vm517_vm8 = vcmp.lt.s32.totalorder %v501_v26, 4  ;;  %v436_v15 = vmax.f32 %v404_v24, %v420_v52  ;;  %v4525_v18 = vmul.f32 0.0, %v433_v10  ;;  %v422_v49 = vmax.f32 %v6026_v40, %v6025_v25  ;;  %v6031_v24 = vld [vmem:[#allocation9_spill] sm:$0xff] }
 0x288   :  { %6019 = vst [vmem:[#allocation31_spill] sm:$0xff] %v4428_v47  ;;  %v2970_v16 = vsel %vm516_vm7, 1.0, %v3596_v9  ;;  %v2971_v43 = vsel %vm517_vm8, 1.0, %v3596_v9  ;;  %v1450_v7 = vadd.f32 %v1449_v37, %v1387_v57  ;;  %v437_v59 = vmax.f32 %v405_v62, %v421_v54  ;;  %v6036_v54 = vld [vmem:[#allocation10_spill] sm:$0xff] }
 0x289   :  { %vm519_vm10 = vcmp.lt.s32.totalorder %v503_v1, 4  ;;  %v609_v10 = vmul.f32 %v4463_v6, %v4463_v6  ;;  %v611_v63 = vmul.f32 %v4467_v21, %v4467_v21  ;;  %v6037_v1 = vld [vmem:[#allocation5_spill] sm:$0xff] }
 0x28a   :  { %1272 = vmatmul.bf16.gmra.mxu1 %v1056_v60  ;;  %v4465_v60 = vmul.f32 %v2967_v0, %v428_v13  ;;  %v403_v13 = vmax.f32 %v3764_v33, %v3877_v55  ;;  %v1314_v0 = vadd.f32 %v1313_v5, %v4227_v44  ;;  %v502_v33 = vand.u32 7, %v454_v11  ;;  %v6030_v11 = vld [vmem:[#allocation18_spill] sm:$0xff] }
 0x28b   :  { %v434_v55 = vmax.f32 %v402_v23, %v418_v45  ;;  %v407_v5 = vmax.f32 %v6028_v41, %v6027_v20  ;;  %v423_v23 = vmax.f32 %v6030_v11, %v6029_v8  ;;  %v2973_v57 = vsel %vm519_vm10, 1.0, %v3596_v9  ;;  %v6043_v41 = vld [vmem:[#allocation37_spill] sm:$0xff] }
 0x28c   :  { %v588_v14 = vadd.f32 %v4465_v60, %v4463_v6  ;;  %v435_v31 = vmax.f32 %v403_v13, %v419_v29  ;;  %vm518_vm9 = vcmp.lt.s32.totalorder %v502_v33, 4  ;;  %v1315_v42 = vadd.f32 %v1314_v0, %v4229_v17  ;;  %v6032_v29 = vld [vmem:[#allocation4_spill] sm:$0xff] }
 0x28d   :  { %v2972_v45 = vsel %vm518_vm9, 1.0, %v3596_v9  ;;  %v4547_v13 = vmul.f32 %v2971_v43, %v436_v15  ;;  %v610_v26 = vmul.f32 %v4465_v60, %v4465_v60  ;;  %v408_v52 = vmax.f32 %v6032_v29, %v6031_v24  ;;  %v6039_v15 = vld [vmem:[#allocation20_spill] sm:$0xff]  ;;  %v6041_v43 = vld [vmem:[#allocation11_spill] sm:$0xff] }
 0x28e   :  { %v589_v2 = vadd.f32 %v588_v14, %v4467_v21  ;;  %v6024_v14 = vld [vmem:[#allocation2_spill] sm:$0xff]  ;;  %v4544_v30 = vmul.f32 %v2970_v16, %v435_v31  ;;  %v424_v0 = vmax.f32 %v6034_v32, %v6033_v28  ;;  %v4562_v46 = vmul.f32 %v2972_v45, %v437_v59  ;;  %v6038_v31 = vld [vmem:[#allocation36_spill] sm:$0xff]  ;;  %v6044_v59 = vld [vmem:[#allocation21_spill] sm:$0xff] }
 0x28f   :  { %v4441_v36 = vpop.f32.mrf.mxu1  ;;  %v406_v35 = vmax.f32 %v6024_v14, %v6023_v61  ;;  %v409_v37 = vmax.f32 %v6037_v1, %v6036_v54  ;;  %v425_v61 = vmax.f32 %v6039_v15, %v6038_v31  ;;  %v439_v14 = vmax.f32 %v407_v5, %v423_v23  ;;  %v6045_v24 = vld [vmem:[#allocation40_spill] sm:$0xff]  ;;  %v6047_v15 = vld [vmem:[#allocation42_spill] sm:$0xff] }
 0x290   :  { %6020 = vst [vmem:[#allocation60_spill] sm:$0xff] %v4441_v36  ;;  %v590_v56 = vadd.f32 %v589_v2, %v4483_v51  ;;  %v4536_v2 = vmul.f32 0.0, %v434_v55  ;;  %v6035_v55 = vld [vmem:[#allocation38_spill] sm:$0xff]  ;;  %v625_v16 = vadd.f32 %v610_v26, %v609_v10  ;;  %v426_v8 = vmax.f32 %v6044_v59, %v6043_v41 }
 0x291   :  { %v438_v58 = vmax.f32 %v406_v35, %v422_v49  ;;  %v1388_v62 = vmul.f32 %v6035_v55, %v6035_v55  ;;  %v6040_v35 = vld [vmem:[#allocation39_spill] sm:$0xff]  ;;  %v612_v49 = vmul.f32 %v4483_v51, %v4483_v51  ;;  %v440_v5 = vmax.f32 %v408_v52, %v424_v0 }
 0x292   :  { %v591_v38 = vadd.f32 %v590_v56, %v4495_v19  ;;  %v1389_v25 = vmul.f32 %v6040_v35, %v6040_v35  ;;  %v1390_v10 = vmul.f32 %v6045_v24, %v6045_v24  ;;  %v441_v26 = vmax.f32 %v409_v37, %v425_v61 }
 0x293   :  { %v4573_v40 = vmul.f32 %v2973_v57, %v438_v58  ;;  %v1451_v23 = vadd.f32 %v1450_v7, %v1388_v62  ;;  %v626_v58 = vadd.f32 %v625_v16, %v611_v63  ;;  %v4589_v29 = vmul.f32 0.0, %v439_v14  ;;  %v6046_v57 = vld [vmem:[#allocation41_spill] sm:$0xff] }
 0x294   :  { %v592_v39 = vadd.f32 %v591_v38, %v4518_v12  ;;  %v1316_v38 = vadd.f32 %v1315_v42, %v6035_v55  ;;  %v614_v7 = vmul.f32 %v4518_v12, %v4518_v12  ;;  %v4597_v62 = vmul.f32 0.0, %v440_v5 }
 0x295   :  { %v1452_v32 = vadd.f32 %v1451_v23, %v1389_v25  ;;  %v627_v0 = vadd.f32 %v626_v58, %v612_v49  ;;  %v615_v1 = vmul.f32 %v4525_v18, %v4525_v18  ;;  %v1392_v61 = vmul.f32 %v6047_v15, %v6047_v15 }
 0x296   :  { %v593_v56 = vadd.f32 %v592_v39, %v4525_v18  ;;  %v6042_v39 = vld [vmem:[#allocation6_spill] sm:$0xff]  ;;  %v1317_v45 = vadd.f32 %v1316_v38, %v6040_v35  ;;  %v4605_v14 = vmul.f32 0.0, %v441_v26  ;;  %v616_v49 = vmul.f32 %v4536_v2, %v4536_v2 }
 0x297   :  { %v4461_v3 = vpop.f32.mrf.mxu1  ;;  %v410_v20 = vmax.f32 %v6042_v39, %v6041_v43  ;;  %v1453_v31 = vadd.f32 %v1452_v32, %v1390_v10  ;;  %v6048_v39 = vld [vmem:[#allocation43_spill] sm:$0xff] }
 0x298   :  { %v594_v33 = vadd.f32 %v593_v56, %v4536_v2  ;;  %v613_v56 = vmul.f32 %v4495_v19, %v4495_v19  ;;  %v1318_v52 = vadd.f32 %v1317_v45, %v6045_v24 }
 0x299   :  { %v442_v38 = vmax.f32 %v410_v20, %v426_v8  ;;  %v1393_v20 = vmul.f32 %v6048_v39, %v6048_v39 }
 0x29a   :  { %v595_v9 = vadd.f32 %v594_v33, %v4544_v30  ;;  %v1391_v33 = vmul.f32 %v6046_v57, %v6046_v57  ;;  %v1319_v54 = vadd.f32 %v1318_v52, %v6046_v57  ;;  %v628_v37 = vadd.f32 %v627_v0, %v613_v56  ;;  %v6049_v56 = vld [vmem:[#allocation44_spill] sm:$0xff] }
 0x29b   :  { %v4615_v59 = vmul.f32 0.0, %v442_v38  ;;  %v1394_v58 = vmul.f32 %v6049_v56, %v6049_v56 }
 0x29c   :  { %v596_v11 = vadd.f32 %v595_v9, %v4547_v13  ;;  %v1320_v25 = vadd.f32 %v1319_v54, %v6047_v15  ;;  %v629_v16 = vadd.f32 %v628_v37, %v614_v7  ;;  %v1454_v43 = vadd.f32 %v1453_v31, %v1391_v33  ;;  %v6050_v7 = vld [vmem:[#allocation45_spill] sm:$0xff]  ;;  %v6051_v37 = vld [vmem:[#allocation46_spill] sm:$0xff] }
 0x29d   :  { %v1395_v0 = vmul.f32 %v6050_v7, %v6050_v7  ;;  %v1396_v31 = vmul.f32 %v6051_v37, %v6051_v37  ;;  %v6073_v15 = vld [vmem:[#allocation26_spill] sm:$0xff] }
 0x29e   :  { %v597_v28 = vadd.f32 %v596_v11, %v4562_v46  ;;  %v1321_v5 = vadd.f32 %v1320_v25, %v6048_v39  ;;  %v617_v11 = vmul.f32 %v4544_v30, %v4544_v30  ;;  %v630_v23 = vadd.f32 %v629_v16, %v615_v1  ;;  %v6072_v39 = vld [vmem:[#allocation25_spill] sm:$0xff] }
 0x29f   :  { %v4497_v50 = vpop.f32.mrf.mxu1  ;;  %v1455_v45 = vadd.f32 %v1454_v43, %v1392_v61  ;;  %v620_v25 = vmul.f32 %v4573_v40, %v4573_v40  ;;  %v6052_v43 = vld [vmem:[#allocation47_spill] sm:$0xff] }
 0x2a0   :  { %v598_v63 = vadd.f32 %v597_v28, %v4573_v40  ;;  %v1322_v26 = vadd.f32 %v1321_v5, %v6049_v56  ;;  %v618_v28 = vmul.f32 %v4547_v13, %v4547_v13  ;;  %v631_v32 = vadd.f32 %v630_v23, %v616_v49 }
 0x2a1   :  { %v1456_v52 = vadd.f32 %v1455_v45, %v1393_v20  ;;  %v1397_v20 = vmul.f32 %v6052_v43, %v6052_v43  ;;  %v621_v23 = vmul.f32 %v4589_v29, %v4589_v29 }
 0x2a2   :  { %v599_v9 = vadd.f32 %v598_v63, %v4589_v29  ;;  %v1323_v38 = vadd.f32 %v1322_v26, %v6050_v7  ;;  %v619_v63 = vmul.f32 %v4562_v46, %v4562_v46  ;;  %v632_v54 = vadd.f32 %v631_v32, %v617_v11 }
 0x2a3   :  { %v1457_v1 = vadd.f32 %v1456_v52, %v1394_v58  ;;  %v622_v52 = vmul.f32 %v4597_v62, %v4597_v62 }
 0x2a4   :  { %v600_v8 = vadd.f32 %v599_v9, %v4597_v62  ;;  %v1324_v9 = vadd.f32 %v1323_v38, %v6051_v37  ;;  %v633_v49 = vadd.f32 %v632_v54, %v618_v28  ;;  %v6054_v54 = vld [vmem:[#allocation49_spill] sm:$0xff] }
 0x2a5   :  { %v1458_v16 = vadd.f32 %v1457_v1, %v1395_v0 }
 0x2a6   :  { %v601_v10 = vadd.f32 %v600_v8, %v4605_v14  ;;  %v1325_v11 = vadd.f32 %v1324_v9, %v6052_v43  ;;  %v634_v45 = vadd.f32 %v633_v49, %v619_v63  ;;  %v623_v63 = vmul.f32 %v4605_v14, %v4605_v14  ;;  %v6055_v9 = vld [vmem:[#allocation50_spill] sm:$0xff] }
 0x2a7   :  { %v4533_v4 = vpop.f32.mrf.mxu1  ;;  %v1459_v58 = vadd.f32 %v1458_v16, %v1396_v31  ;;  %v1400_v49 = vmul.f32 %v6055_v9, %v6055_v9  ;;  %v6061_v43 = vld [vmem:[#allocation14_spill] sm:$0xff] }
 0x2a8   :  { %v602_v33 = vadd.f32 %v601_v10, %v4615_v59  ;;  %v6053_v10 = vld [vmem:[#allocation48_spill] sm:$0xff]  ;;  %v635_v0 = vadd.f32 %v634_v45, %v620_v25  ;;  %v624_v25 = vmul.f32 %v4615_v59, %v4615_v59 }
 0x2a9   :  { %v1398_v26 = vmul.f32 %v6053_v10, %v6053_v10  ;;  %v1326_v32 = vadd.f32 %v1325_v11, %v6053_v10  ;;  %v1460_v38 = vadd.f32 %v1459_v58, %v1397_v20  ;;  %v6056_v58 = vld [vmem:[#allocation51_spill] sm:$0xff] }
 0x2aa   :  { %v603_v61 = vrot.slane %v602_v33, 4  ;;  %v636_v31 = vadd.f32 %v635_v0, %v621_v23  ;;  %v1401_v10 = vmul.f32 %v6056_v58, %v6056_v58  ;;  %v3333_v23 = vld [vmem:[%s5784_s12 + $0x38] sm:$0xff] }
 0x2ab   :  { %v1327_v1 = vadd.f32 %v1326_v32, %v6054_v54  ;;  %791 = vmatpush.bf16.msra.mxu0 %v3333_v23  ;;  %3573 = vmatpush.bf16.msra.mxu3 %v3333_v23 }
 0x2ac   :  { %v604_v5 = vadd.f32 %v603_v61, %v602_v33  ;;  %v1399_v33 = vmul.f32 %v6054_v54, %v6054_v54  ;;  %v1461_v61 = vadd.f32 %v1460_v38, %v1398_v26  ;;  %v637_v20 = vadd.f32 %v636_v31, %v622_v52  ;;  %v3332_v52 = vld [vmem:[%s5784_s12 + $0x30] sm:$0xff] }
 0x2ad   :  { %v1328_v16 = vadd.f32 %v1327_v1, %v6055_v9  ;;  %v6057_v1 = vld [vmem:[#allocation52_spill] sm:$0xff]  ;;  %v6058_v9 = vld [vmem:[#allocation53_spill] sm:$0xff] }
 0x2ae   :  { %v605_v28 = vrot.slane %v604_v5, 2  ;;  %v1462_v45 = vadd.f32 %v1461_v61, %v1399_v33  ;;  %v638_v0 = vadd.f32 %v637_v20, %v623_v63  ;;  %v1403_v54 = vmul.f32 %v6058_v9, %v6058_v9 }
 0x2af   :  { %v4577_v42 = vpop.f32.mrf.mxu1  ;;  %v1329_v26 = vadd.f32 %v1328_v16, %v6056_v58  ;;  %792 = vmatpush.bf16.msra.mxu0 %v3332_v52  ;;  %3574 = vmatpush.bf16.msra.mxu3 %v3332_v52  ;;  %v1406_v52 = vmul.f32 %v6061_v43, %v6061_v43 }
 0x2b0   :  { %v606_v11 = vadd.f32 %v605_v28, %v604_v5  ;;  %v1463_v38 = vadd.f32 %v1462_v45, %v1400_v49  ;;  %v1402_v5 = vmul.f32 %v6057_v1, %v6057_v1  ;;  %v639_v31 = vadd.f32 %v638_v0, %v624_v25  ;;  %v6059_v45 = vld [vmem:[#allocation12_spill] sm:$0xff] }
 0x2b1   :  { %v1330_v28 = vadd.f32 %v1329_v26, %v6057_v1  ;;  %v1404_v23 = vmul.f32 %v6059_v45, %v6059_v45 }
 0x2b2   :  { %v607_v33 = vrot.slane %v606_v11, 1  ;;  %v1464_v61 = vadd.f32 %v1463_v38, %v1401_v10  ;;  %v640_v49 = vrot.slane %v639_v31, 4  ;;  %v6060_v10 = vld [vmem:[#allocation13_spill] sm:$0xff] }
 0x2b3   :  { %v1331_v63 = vadd.f32 %v1330_v28, %v6058_v9  ;;  %v1405_v0 = vmul.f32 %v6060_v10, %v6060_v10  ;;  %v3331_v28 = vld [vmem:[%s5784_s12 + $0x28] sm:$0xff] }
 0x2b4   :  { %v1465_v20 = vadd.f32 %v1464_v61, %v1402_v5  ;;  %v608_v1 = vadd.f32 %v607_v33, %v606_v11  ;;  %v641_v58 = vadd.f32 %v640_v49, %v639_v31  ;;  %793 = vmatpush.bf16.msra.mxu0 %v3331_v28  ;;  %3575 = vmatpush.bf16.msra.mxu3 %v3331_v28  ;;  %v3330_v11 = vld [vmem:[%s5784_s12 + $0x20] sm:$0xff] }
 0x2b5   :  { %v1332_v26 = vadd.f32 %v1331_v63, %v6059_v45  ;;  %v6063_v28 = vld [vmem:[#allocation54_spill] sm:$0xff] }
 0x2b6   :  { %v1466_v25 = vadd.f32 %v1465_v20, %v1403_v54  ;;  %v642_v61 = vrot.slane %v641_v58, 2  ;;  %v4696_v31 = vmul.f32 0.03125, %v608_v1  ;;  %v6062_v20 = vld [vmem:[#allocation15_spill] sm:$0xff] }
 0x2b7   :  { %v4613_v41 = vpop.f32.mrf.mxu1  ;;  %v1333_v5 = vadd.f32 %v1332_v26, %v6060_v10 }
 0x2b8   :  { %v1467_v9 = vadd.f32 %v1466_v25, %v1404_v23  ;;  %v643_v33 = vadd.f32 %v642_v61, %v641_v58  ;;  %v1407_v23 = vmul.f32 %v6062_v20, %v6062_v20  ;;  %794 = vmatpush.bf16.msra.mxu0 %v3330_v11  ;;  %3576 = vmatpush.bf16.msra.mxu3 %v3330_v11 }
 0x2b9   :  { %v1334_v54 = vadd.f32 %v1333_v5, %v6061_v43  ;;  %v1408_v5 = vmul.f32 %v6063_v28, %v6063_v28 }
 0x2ba   :  { %v1468_v63 = vadd.f32 %v1467_v9, %v1405_v0  ;;  %v644_v25 = vrot.slane %v643_v33, 1  ;;  %v648_v9 = vmul.f32 %v4696_v31, %v4696_v31  ;;  %v3329_v0 = vld [vmem:[%s5784_s12 + $0x18] sm:$0xff] }
 0x2bb   :  { %v1335_v26 = vadd.f32 %v1334_v54, %v6062_v20  ;;  %v6064_v54 = vld [vmem:[#allocation55_spill] sm:$0xff]  ;;  %v3328_v20 = vld [vmem:[%s5784_s12 + $0x10] sm:$0xff] }
 0x2bc   :  { %v1469_v10 = vadd.f32 %v1468_v63, %v1406_v52  ;;  %v645_v58 = vadd.f32 %v644_v25, %v643_v33  ;;  %v1409_v11 = vmul.f32 %v6064_v54, %v6064_v54  ;;  %795 = vmatpush.bf16.msra.mxu0 %v3329_v0  ;;  %3577 = vmatpush.bf16.msra.mxu3 %v3329_v0  ;;  %v6065_v33 = vld [vmem:[#allocation56_spill] sm:$0xff] }
 0x2bd   :  { %v1336_v43 = vadd.f32 %v1335_v26, %v6063_v28  ;;  %v1410_v25 = vmul.f32 %v6065_v33, %v6065_v33 }
 0x2be   :  { %v1470_v61 = vadd.f32 %v1469_v10, %v1407_v23  ;;  %v647_v63 = vmul.f32 0.03125, %v645_v58  ;;  %v6066_v23 = vld [vmem:[#allocation57_spill] sm:$0xff] }
 0x2bf   :  { %v4640_v8 = vpop.f32.mrf.mxu1  ;;  %v1337_v52 = vadd.f32 %v1336_v43, %v6064_v54  ;;  %v1411_v58 = vmul.f32 %v6066_v23, %v6066_v23 }
 0x2c0   :  { %v1471_v26 = vadd.f32 %v1470_v61, %v1408_v5  ;;  %v649_v45 = vsub.f32 %v647_v63, %v648_v9  ;;  %796 = vmatpush.bf16.msra.mxu0 %v3328_v20  ;;  %3578 = vmatpush.bf16.msra.mxu3 %v3328_v20  ;;  %v6067_v61 = vld [vmem:[#allocation58_spill] sm:$0xff]  ;;  %v3327_v9 = vld [vmem:[%s5784_s12 + $0x8] sm:$0xff] }
 0x2c1   :  { %v4676_v16 = vpop.f32.mrf.mxu2  ;;  %v1338_v28 = vadd.f32 %v1337_v52, %v6065_v33  ;;  %v1412_v52 = vmul.f32 %v6067_v61, %v6067_v61 }
 0x2c2   :  { %v1472_v43 = vadd.f32 %v1471_v26, %v1409_v11  ;;  %v650_v0 = vmax.f32 %v649_v45, 0.0  ;;  %v6068_v11 = vld [vmem:[#allocation59_spill] sm:$0xff]  ;;  %v6069_v26 = vld [vmem:[#allocation22_spill] sm:$0xff] }
 0x2c3   :  { %v1339_v37 = vadd.f32 %v1338_v28, %v6066_v23  ;;  %v1413_v45 = vmul.f32 %v6068_v11, %v6068_v11 }
 0x2c4   :  { %v1473_v5 = vadd.f32 %v1472_v43, %v1410_v25  ;;  %v651_v54 = vadd.f32 1e-05, %v650_v0  ;;  %797 = vmatpush.bf16.msra.mxu0 %v3327_v9  ;;  %3579 = vmatpush.bf16.msra.mxu3 %v3327_v9  ;;  %v3326_v43 = vld [vmem:[%s5784_s12] sm:$0xff] }
 0x2c5   :  { %v1340_v33 = vadd.f32 %v1339_v37, %v6067_v61  ;;  %v1414_v37 = vmul.f32 %v6069_v26, %v6069_v26 }
 0x2c6   :  { %v1474_v28 = vadd.f32 %v1473_v5, %v1411_v58  ;;  %3592 = vrsqrt.f32 %v651_v54  ;;  %vm658_vm11 = vweird.f32 %v651_v54 }
 0x2c7   :  { %v4662_v32 = vpop.f32.mrf.mxu1  ;;  %v1341_v63 = vadd.f32 %v1340_v33, %v6068_v11  ;;  %v6070_v33 = vld [vmem:[#allocation23_spill] sm:$0xff] }
 0x2c8   :  { %v1475_v20 = vadd.f32 %v1474_v28, %v1412_v52  ;;  %v1415_v11 = vmul.f32 %v6070_v33, %v6070_v33  ;;  %798 = vmatpush.bf16.msra.mxu0 %v3326_v43  ;;  %3580 = vmatpush.bf16.msra.mxu3 %v3326_v43  ;;  %v6071_v28 = vld [vmem:[#allocation24_spill] sm:$0xff] }
 0x2c9   :  { %v4698_v49 = vpop.f32.mrf.mxu2  ;;  %v1342_v25 = vadd.f32 %v1341_v63, %v6069_v26  ;;  %v1416_v61 = vmul.f32 %v6071_v28, %v6071_v28 }
 0x2ca   :  { %v1476_v58 = vadd.f32 %v1475_v20, %v1413_v45  ;;  %v1417_v20 = vmul.f32 %v6072_v39, %v6072_v39 }
 0x2cb   :  { %v1343_v5 = vadd.f32 %v1342_v25, %v6070_v33 }
 0x2cc   :  { %v3593_v52 = vpop.eup %3592  ;;  %v1477_v9 = vadd.f32 %v1476_v58, %v1414_v37  ;;  %v1418_v37 = vmul.f32 %v6073_v15, %v6073_v15 }
 0x2cd   :  { %v1344_v63 = vadd.f32 %v1343_v5, %v6071_v28  ;;  %v653_v23 = vmul.f32 %v3593_v52, %v651_v54  ;;  %vm659_vm12 = vweird.f32 %v3593_v52  ;;  %v6074_v28 = vld [vmem:[#allocation27_spill] sm:$0xff] }
 0x2ce   :  { %v1478_v56 = vadd.f32 %v1477_v9, %v1415_v11  ;;  %v1419_v11 = vmul.f32 %v6074_v28, %v6074_v28  ;;  %vm660_vm13 = vmor %vm658_vm11, %vm659_vm12 }
 0x2cf   :  { %v4684_v38 = vpop.f32.mrf.mxu1  ;;  %v1345_v45 = vadd.f32 %v1344_v63, %v6072_v39  ;;  %v654_v25 = vmul.f32 %v3593_v52, %v653_v23 }
 0x2d0   :  { %v1479_v33 = vadd.f32 %v1478_v56, %v1416_v61  ;;  %v1420_v61 = vmul.f32 %v4415_v27, %v4415_v27 }
 0x2d1   :  { %v4722_v10 = vpop.f32.mrf.mxu2  ;;  %v1346_v43 = vadd.f32 %v1345_v45, %v6073_v15  ;;  %v655_v58 = vmul.f32 0.5, %v654_v25  ;;  %v6075_v25 = vld [vmem:[#allocation29_spill] sm:$0xff] }
 0x2d2   :  { %v1480_v5 = vadd.f32 %v1479_v33, %v1417_v20  ;;  %v662_v33 = vld [vmem:[%s5785_s5] sm:$0x1] }
 0x2d3   :  { %v1347_v57 = vadd.f32 %v1346_v43, %v6074_v28  ;;  %v656_v9 = vsub.f32 1.5, %v655_v58  ;;  %v1421_v58 = vmul.f32 %v6075_v25, %v6075_v25 }
 0x2d4   :  { %v1481_v23 = vadd.f32 %v1480_v5, %v1418_v37 }
 0x2d5   :  { %v1348_v56 = vadd.f32 %v1347_v57, %v4415_v27  ;;  %v657_v54 = vmul.f32 %v3593_v52, %v656_v9  ;;  %v1422_v27 = vmul.f32 %v4426_v34, %v4426_v34  ;;  %v664_v9 = vld [vmem:[%s5786_s6] sm:$0x1] }
 0x2d6   :  { %v1482_v20 = vadd.f32 %v1481_v23, %v1419_v11 }
 0x2d7   :  { %v4708_v1 = vpop.f32.mrf.mxu1  ;;  %v1349_v43 = vadd.f32 %v1348_v56, %v6075_v25  ;;  %v661_v28 = vsel %vm660_vm13, %v3593_v52, %v657_v54  ;;  %v1423_v52 = vmul.f32 %v4428_v47, %v4428_v47 }
 0x2d8   :  { %v663_v37 = vmul.f32 %v662_v33, %v661_v28  ;;  %v1483_v5 = vadd.f32 %v1482_v20, %v1420_v61 }
 0x2d9   :  { %v4744_v0 = vpop.f32.mrf.mxu2  ;;  %v1350_v57 = vadd.f32 %v1349_v43, %v4426_v34 }
 0x2da   :  { %v665_v15 = vmul.f32 %v663_v37, %v4696_v31  ;;  %v4783_v11 = vperm.slane %v663_v37, 0  ;;  %v1484_v23 = vadd.f32 %v1483_v5, %v1421_v58  ;;  %v1424_v31 = vmul.f32 %v4441_v36, %v4441_v36 }
 0x2db   :  { %v1351_v56 = vadd.f32 %v1350_v57, %v4428_v47  ;;  %v1425_v5 = vmul.f32 %v4461_v3, %v4461_v3 }
 0x2dc   :  { %v666_v28 = vsub.f32 %v664_v9, %v665_v15  ;;  %v668_v61 = vmul.f32 %v4783_v11, %v4463_v6  ;;  %v669_v54 = vmul.f32 %v4783_v11, %v4465_v60  ;;  %v1485_v33 = vadd.f32 %v1484_v23, %v1422_v27  ;;  %v3160_v15 = vld [vmem:[%s5787_s8 + $0xe8] sm:$0xf]  ;;  %v3373_v6 = vld [vmem:[%s5787_s8 + $0xf4] sm:$0xf0] }
 0x2dd   :  { %v1352_v20 = vadd.f32 %v1351_v56, %v4441_v36  ;;  %v3161_v57 = vor.u32 %v3373_v6, %v3160_v15  ;;  %v1426_v36 = vmul.f32 %v4497_v50, %v4497_v50 }
 0x2de   :  { %v4799_v37 = vperm.slane %v666_v28, 0  ;;  %v1486_v27 = vadd.f32 %v1485_v33, %v1423_v52 }
 0x2df   :  { %v4730_v7 = vpop.f32.mrf.mxu1  ;;  %v1353_v60 = vadd.f32 %v1352_v20, %v4461_v3  ;;  %2122 = vmatpush.bf16.msrb.mxu0 %v3161_v57  ;;  %v1427_v20 = vmul.f32 %v4533_v4, %v4533_v4 }
 0x2e0   :  { %v687_v9 = vadd.f32 %v4799_v37, %v668_v61  ;;  %v688_v23 = vadd.f32 %v4799_v37, %v669_v54  ;;  %v1487_v56 = vadd.f32 %v1486_v27, %v1424_v31  ;;  %v1428_v54 = vmul.f32 %v4577_v42, %v4577_v42 }
 0x2e1   :  { %v4763_v63 = vpop.f32.mrf.mxu2  ;;  %v1354_v28 = vadd.f32 %v1353_v60, %v4497_v50  ;;  %v670_v60 = vmul.f32 %v4783_v11, %v4467_v21 }
 0x2e2   :  { %v703_v47 = vmax.f32 %v687_v9, 0.0  ;;  %v704_v34 = vmax.f32 %v688_v23, 0.0  ;;  %v1488_v52 = vadd.f32 %v1487_v56, %v1425_v5  ;;  %v671_v5 = vmul.f32 %v4783_v11, %v4483_v51  ;;  %v3369_v9 = vld [vmem:[%s5787_s8 + $0xd4] sm:$0xf0] }
 0x2e3   :  { %v1355_v33 = vadd.f32 %v1354_v28, %v4533_v4  ;;  %v1430_v51 = vmul.f32 %v4640_v8, %v4640_v8  ;;  %v689_v28 = vadd.f32 %v4799_v37, %v670_v60 }
 0x2e4   :  { %v719_v15 = vpack.c.bf16 %v704_v34, %v703_v47  ;;  %v1489_v6 = vadd.f32 %v1488_v52, %v1426_v36  ;;  %v1429_v47 = vmul.f32 %v4613_v41, %v4613_v41  ;;  %v3144_v36 = vld [vmem:[%s5787_s8 + $0xc8] sm:$0xf]  ;;  %v690_v52 = vadd.f32 %v4799_v37, %v671_v5 }
 0x2e5   :  { %v1356_v61 = vadd.f32 %v1355_v33, %v4577_v42  ;;  %v3145_v56 = vor.u32 %v3369_v9, %v3144_v36  ;;  %v1433_v5 = vmul.f32 %v4708_v1, %v4708_v1 }
 0x2e6   :  { %799 = vmatmul.bf16.vlgmr.msra.gmra.mxu0 %v719_v15  ;;  %v1490_v57 = vadd.f32 %v1489_v6, %v1427_v20  ;;  %v1431_v15 = vmul.f32 %v4662_v32, %v4662_v32  ;;  %v706_v36 = vmax.f32 %v690_v52, 0.0 }
 0x2e7   :  { %v4752_v26 = vpop.f32.mrf.mxu1  ;;  %v1357_v34 = vadd.f32 %v1356_v61, %v4613_v41  ;;  %2123 = vmatpush.bf16.msrb.mxu0 %v3145_v56 }
 0x2e8   :  { %v1491_v23 = vadd.f32 %v1490_v57, %v1428_v54  ;;  %v1432_v54 = vmul.f32 %v4684_v38, %v4684_v38 }
 0x2e9   :  { %v4797_v58 = vpop.f32.mrf.mxu2  ;;  %v1358_v21 = vadd.f32 %v1357_v34, %v4640_v8  ;;  %v705_v34 = vmax.f32 %v689_v28, 0.0  ;;  %v1434_v28 = vmul.f32 %v4730_v7, %v4730_v7 }
 0x2ea   :  { %6076 = vst [vmem:[#allocation32_spill] sm:$0xff] %v4797_v58  ;;  %v1492_v33 = vadd.f32 %v1491_v23, %v1429_v47  ;;  %v678_v23 = vmul.f32 %v4783_v11, %v4562_v46  ;;  %v1435_v46 = vmul.f32 %v4752_v26, %v4752_v26 }
 0x2eb   :  { %v1359_v20 = vadd.f32 %v1358_v21, %v4662_v32  ;;  %v679_v21 = vmul.f32 %v4783_v11, %v4573_v40  ;;  %v720_v52 = vpack.c.bf16 %v706_v36, %v705_v34 }
 0x2ec   :  { %v1493_v6 = vadd.f32 %v1492_v33, %v1430_v51  ;;  %v697_v33 = vadd.f32 %v4799_v37, %v678_v23 }
 0x2ed   :  { %v1360_v61 = vadd.f32 %v1359_v20, %v4684_v38  ;;  %v698_v20 = vadd.f32 %v4799_v37, %v679_v21 }
 0x2ee   :  { %v1494_v9 = vadd.f32 %v1493_v6, %v1431_v15 }
 0x2ef   :  { %v4768_v45 = vpop.f32.mrf.mxu1  ;;  %v1361_v60 = vadd.f32 %v1360_v61, %v4708_v1  ;;  %v713_v61 = vmax.f32 %v697_v33, 0.0 }
 0x2f0   :  { %v1495_v51 = vadd.f32 %v1494_v9, %v1432_v54  ;;  %v1436_v9 = vmul.f32 %v4768_v45, %v4768_v45 }
 0x2f1   :  { %v4821_v31 = vpop.f32.mrf.mxu2  ;;  %v1362_v56 = vadd.f32 %v1361_v60, %v4730_v7 }
 0x2f2   :  { %v1496_v15 = vadd.f32 %v1495_v51, %v1433_v5 }
 0x2f3   :  { %v1363_v6 = vadd.f32 %v1362_v56, %v4752_v26 }
 0x2f4   :  { %v1497_v40 = vadd.f32 %v1496_v15, %v1434_v28 }
 0x2f5   :  { %v1364_v54 = vadd.f32 %v1363_v6, %v4768_v45 }
 0x2f6   :  { %804 = vmatmul.bf16.gmra.mxu0 %v720_v52  ;;  %v1498_v36 = vadd.f32 %v1497_v40, %v1435_v46  ;;  %v1441_v40 = vmul.f32 %v4676_v16, %v4676_v16 }
 0x2f7   :  { %v4795_v43 = vpop.f32.mrf.mxu1 }
 0x2f8   :  { %v1365_v60 = vadd.f32 %v1364_v54, %v4795_v43  ;;  %v1437_v5 = vmul.f32 %v4795_v43, %v4795_v43  ;;  %v1499_v23 = vadd.f32 %v1498_v36, %v1436_v9 }
 0x2f9   :  { %v1310_v57 = vpop.f32.mrf.mxu2 }
 0x2fa   :  { %v714_v57 = vmax.f32 %v698_v20, 0.0  ;;  %v1500_v28 = vadd.f32 %v1499_v23, %v1437_v5  ;;  %v1443_v5 = vmul.f32 %v4722_v10, %v4722_v10 }
 0x2fc   :  { %v724_v34 = vpack.c.bf16 %v714_v57, %v713_v61 }
 0x2fe   :  { %820 = vmatmul.bf16.vlgmr.msra.gmra.mxu3 %v724_v34  ;;  %v1442_v34 = vmul.f32 %v4698_v49, %v4698_v49 }
 0x2ff   :  { %v4823_v27 = vpop.f32.mrf.mxu1 }
 0x300   :  { %v1366_v21 = vadd.f32 %v1365_v60, %v4823_v27  ;;  %v1438_v51 = vmul.f32 %v4823_v27, %v4823_v27 }
 0x302   :  { %v1501_v20 = vadd.f32 %v1500_v28, %v1438_v51  ;;  %v1444_v51 = vmul.f32 %v4744_v0, %v4744_v0  ;;  %v672_v28 = vmul.f32 %v4783_v11, %v4495_v19  ;;  %v1446_v19 = vmul.f32 %v4797_v58, %v4797_v58 }
 0x307   :  { %v4852_v47 = vpop.f32.mrf.mxu1 }
 0x308   :  { %v1367_v33 = vadd.f32 %v1366_v21, %v4852_v47  ;;  %v1439_v52 = vmul.f32 %v4852_v47, %v4852_v47 }
 0x30a   :  { %v1502_v46 = vadd.f32 %v1501_v20, %v1439_v52 }
 0x30f   :  { %v4875_v56 = vpop.f32.mrf.mxu1 }
 0x310   :  { %v1368_v15 = vadd.f32 %v1367_v33, %v4875_v56  ;;  %v1440_v6 = vmul.f32 %v4875_v56, %v4875_v56  ;;  %v673_v33 = vmul.f32 %v4783_v11, %v4518_v12 }
 0x312   :  { %v1369_v61 = vadd.f32 %v1368_v15, %v4676_v16  ;;  %v1503_v57 = vadd.f32 %v1502_v46, %v1440_v6  ;;  %v691_v15 = vadd.f32 %v4799_v37, %v672_v28  ;;  %v692_v6 = vadd.f32 %v4799_v37, %v673_v33 }
 0x313   :  { %v1445_v46 = vmul.f32 %v4763_v63, %v4763_v63 }
 0x314   :  { %v1370_v54 = vadd.f32 %v1369_v61, %v4698_v49  ;;  %v1504_v9 = vadd.f32 %v1503_v57, %v1441_v40  ;;  %v707_v61 = vmax.f32 %v691_v15, 0.0  ;;  %v708_v57 = vmax.f32 %v692_v6, 0.0  ;;  %v3152_v6 = vld [vmem:[%s5787_s8 + $0xe0] sm:$0xf] }
 0x316   :  { %v1371_v36 = vadd.f32 %v1370_v54, %v4722_v10  ;;  %v1505_v60 = vadd.f32 %v1504_v9, %v1442_v34  ;;  %v721_v9 = vpack.c.bf16 %v708_v57, %v707_v61 }
 0x318   :  { %v1506_v23 = vadd.f32 %v1505_v60, %v1443_v5  ;;  %v1372_v21 = vadd.f32 %v1371_v36, %v4744_v0  ;;  %809 = vmatmul.bf16.gmra.mxu0 %v721_v9  ;;  %v3128_v5 = vld [vmem:[%s5787_s8 + $0xa8] sm:$0xf]  ;;  %v1516_v9 = vmul.f32 %v4821_v31, %v4821_v31 }
 0x31a   :  { %v1373_v52 = vadd.f32 %v1372_v21, %v4763_v63  ;;  %v1507_v20 = vadd.f32 %v1506_v23, %v1444_v51  ;;  %v3365_v23 = vld [vmem:[%s5787_s8 + $0xb4] sm:$0xf0] }
 0x31b   :  { %v3129_v21 = vor.u32 %v3365_v23, %v3128_v5 }
 0x31c   :  { %v1374_v40 = vadd.f32 %v1373_v52, %v4797_v58  ;;  %v1508_v54 = vadd.f32 %v1507_v20, %v1445_v46  ;;  %v3372_v46 = vld [vmem:[%s5787_s8 + $0xec] sm:$0xf0] }
 0x31d   :  { %2124 = vmatpush.bf16.msrb.mxu0 %v3129_v21  ;;  %v3153_v61 = vor.u32 %v3372_v46, %v3152_v6 }
 0x31e   :  { %v1375_v12 = vrot.slane %v1374_v40, 4  ;;  %v1509_v34 = vadd.f32 %v1508_v54, %v1446_v19 }
 0x31f   :  { %2040 = vmatpush.bf16.msrb.mxu3 %v3153_v61 }
 0x320   :  { %v1376_v36 = vadd.f32 %v1375_v12, %v1374_v40  ;;  %v1510_v60 = vrot.slane %v1509_v34, 4  ;;  %v1381_v40 = vmul.f32 350.0, %v4821_v31  ;;  %v1535_v31 = vld [vmem:[%s5788_s3] sm:$0x1] }
 0x322   :  { %v1511_v51 = vadd.f32 %v1510_v60, %v1509_v34  ;;  %v1377_v28 = vrot.slane %v1376_v36, 2  ;;  %v1517_v34 = vmul.f32 350.0, %v1516_v9  ;;  %v3120_v9 = vld [vmem:[%s5787_s8 + $0xa0] sm:$0xf] }
 0x324   :  { %v1378_v33 = vadd.f32 %v1377_v28, %v1376_v36  ;;  %v1512_v52 = vrot.slane %v1511_v51, 2 }
 0x326   :  { %v1379_v20 = vrot.slane %v1378_v33, 1  ;;  %v1513_v15 = vadd.f32 %v1512_v52, %v1511_v51 }
 0x328   :  { %v1380_v57 = vadd.f32 %v1379_v20, %v1378_v33  ;;  %v1514_v54 = vrot.slane %v1513_v15, 1 }
 0x32a   :  { %v1382_v19 = vsub.f32 %v1380_v57, %v1381_v40  ;;  %v1515_v12 = vadd.f32 %v1514_v54, %v1513_v15  ;;  %v3112_v15 = vld [vmem:[%s5787_s8 + $0x88] sm:$0xf]  ;;  %v3361_v57 = vld [vmem:[%s5787_s8 + $0x94] sm:$0xf0]  ;;  %v3136_v40 = vld [vmem:[%s5787_s8 + $0xc0] sm:$0xf] }
 0x32b   :  { %v3368_v54 = vld [vmem:[%s5787_s8 + $0xcc] sm:$0xf0] }
 0x32c   :  { %v1518_v36 = vsub.f32 %v1515_v12, %v1517_v34  ;;  %v1519_v60 = vmul.f32 0.0061728396, %v1382_v19  ;;  %v3096_v19 = vld [vmem:[%s5787_s8 + $0x68] sm:$0xf]  ;;  %v3113_v34 = vor.u32 %v3361_v57, %v3112_v15 }
 0x32e   :  { %v1520_v5 = vmul.f32 0.0061728396, %v1518_v36  ;;  %v1521_v23 = vmul.f32 %v1519_v60, %v1519_v60  ;;  %v3137_v36 = vor.u32 %v3368_v54, %v3136_v40  ;;  %2125 = vmatpush.bf16.msrb.mxu0 %v3113_v34 }
 0x330   :  { %v1522_v21 = vsub.f32 %v1520_v5, %v1521_v23  ;;  %v680_v5 = vmul.f32 %v4783_v11, %v4589_v29  ;;  %v3357_v23 = vld [vmem:[%s5787_s8 + $0x74] sm:$0xf0]  ;;  %2041 = vmatpush.bf16.msrb.mxu3 %v3137_v36 }
 0x332   :  { %v1523_v51 = vmax.f32 %v1522_v21, 0.0  ;;  %v3370_v21 = vld [vmem:[%s5787_s8 + $0xe4] sm:$0xf]  ;;  %v699_v29 = vadd.f32 %v4799_v37, %v680_v5 }
 0x334   :  { %v1524_v28 = vadd.f32 1e-05, %v1523_v51  ;;  %v3154_v51 = vld [vmem:[%s5787_s8 + $0xf0] sm:$0xf0]  ;;  %v715_v57 = vmax.f32 %v699_v29, 0.0 }
 0x335   :  { %v3157_v15 = vor.u32 %v3370_v21, %v3154_v51  ;;  %v3362_v21 = vld [vmem:[%s5787_s8 + $0xa4] sm:$0xf]  ;;  %v3122_v51 = vld [vmem:[%s5787_s8 + $0xb0] sm:$0xf0]  ;;  %v3088_v29 = vld [vmem:[%s5787_s8 + $0x60] sm:$0xf] }
 0x336   :  { %3594 = vrsqrt.f32 %v1524_v28  ;;  %vm1531_vm15 = vweird.f32 %v1524_v28 }
 0x337   :  { %2081 = vmatpush.bf16.msra.mxu2 %v3157_v15  ;;  %v682_v15 = vmul.f32 %v4783_v11, %v4605_v14  ;;  %v677_v14 = vmul.f32 %v4783_v11, %v4547_v13 }
 0x33c   :  { %v3595_v52 = vpop.eup %3594 }
 0x33d   :  { %v1526_v33 = vmul.f32 %v3595_v52, %v1524_v28  ;;  %vm1532_vm14 = vweird.f32 %v3595_v52  ;;  %v681_v28 = vmul.f32 %v4783_v11, %v4597_v62 }
 0x33e   :  { %vm1533_vm0 = vmor %vm1531_vm15, %vm1532_vm14 }
 0x33f   :  { %v1527_v20 = vmul.f32 %v3595_v52, %v1526_v33  ;;  %v674_v33 = vmul.f32 %v4783_v11, %v4525_v18  ;;  %v700_v62 = vadd.f32 %v4799_v37, %v681_v28  ;;  %v3360_v18 = vld [vmem:[%s5787_s8 + $0x8c] sm:$0xf0] }
 0x341   :  { %v1528_v6 = vmul.f32 0.5, %v1527_v20  ;;  %v675_v20 = vmul.f32 %v4783_v11, %v4536_v2  ;;  %v693_v40 = vadd.f32 %v4799_v37, %v674_v33  ;;  %v716_v34 = vmax.f32 %v700_v62, 0.0  ;;  %v3349_v62 = vld [vmem:[%s5787_s8 + $0x34] sm:$0xf0] }
 0x343   :  { %v1529_v46 = vsub.f32 1.5, %v1528_v6  ;;  %v3366_v6 = vld [vmem:[%s5787_s8 + $0xc4] sm:$0xf]  ;;  %v694_v54 = vadd.f32 %v4799_v37, %v675_v20  ;;  %v709_v36 = vmax.f32 %v693_v40, 0.0  ;;  %v725_v28 = vpack.c.bf16 %v716_v34, %v715_v57 }
 0x344   :  { %v3358_v57 = vld [vmem:[%s5787_s8 + $0x84] sm:$0xf]  ;;  %v676_v40 = vmul.f32 %v4783_v11, %v4544_v30  ;;  %v3345_v30 = vld [vmem:[%s5787_s8 + $0x14] sm:$0xf0] }
 0x345   :  { %v1530_v58 = vmul.f32 %v3595_v52, %v1529_v46  ;;  %v3138_v46 = vld [vmem:[%s5787_s8 + $0xd0] sm:$0xf0]  ;;  %v710_v5 = vmax.f32 %v694_v54, 0.0  ;;  %825 = vmatmul.bf16.gmra.mxu3 %v725_v28  ;;  %v3352_v54 = vld [vmem:[%s5787_s8 + $0x4c] sm:$0xf0] }
 0x346   :  { %v3354_v28 = vld [vmem:[%s5787_s8 + $0x64] sm:$0xf] }
 0x347   :  { %v1534_v61 = vsel %vm1533_vm0, %v3595_v52, %v1530_v58  ;;  %v3364_v58 = vld [vmem:[%s5787_s8 + $0xac] sm:$0xf0] }
 0x348   :  { %v1536_v12 = vmul.f32 %v1535_v31, %v1534_v61  ;;  %v3121_v52 = vor.u32 %v3364_v58, %v3120_v9  ;;  %v3097_v31 = vor.u32 %v3357_v23, %v3096_v19  ;;  %v3104_v61 = vld [vmem:[%s5787_s8 + $0x80] sm:$0xf]  ;;  %v3080_v9 = vld [vmem:[%s5787_s8 + $0x48] sm:$0xf]  ;;  %v3353_v58 = vld [vmem:[%s5787_s8 + $0x54] sm:$0xf0] }
 0x349   :  { %v1537_v19 = vld [vmem:[%s5789_s4] sm:$0x1]  ;;  %v3105_v23 = vor.u32 %v3360_v18, %v3104_v61  ;;  %v3081_v33 = vor.u32 %v3353_v58, %v3080_v9  ;;  %v683_v61 = vmul.f32 %v4783_v11, %v4615_v59  ;;  %v3125_v18 = vor.u32 %v3362_v21, %v3122_v51 }
 0x34a   :  { %v1538_v2 = vmul.f32 %v1536_v12, %v1519_v60  ;;  %v3141_v60 = vor.u32 %v3366_v6, %v3138_v46  ;;  %2042 = vmatpush.bf16.msrb.mxu3 %v3121_v52  ;;  %2126 = vmatpush.bf16.msrb.mxu0 %v3097_v31  ;;  %v3356_v52 = vld [vmem:[%s5787_s8 + $0x6c] sm:$0xf0]  ;;  %v722_v6 = vpack.c.bf16 %v710_v5, %v709_v36  ;;  %v3064_v46 = vld [vmem:[%s5787_s8 + $0x28] sm:$0xf]  ;;  %v5006_v31 = vperm.slane %v1536_v12, 0 }
 0x34b   :  { %v3106_v12 = vld [vmem:[%s5787_s8 + $0x90] sm:$0xf0]  ;;  %v3072_v59 = vld [vmem:[%s5787_s8 + $0x40] sm:$0xf]  ;;  %v3065_v9 = vor.u32 %v3349_v62, %v3064_v46  ;;  %v701_v11 = vadd.f32 %v4799_v37, %v682_v15  ;;  %v702_v34 = vadd.f32 %v4799_v37, %v683_v61  ;;  %v3226_v5 = vld [vmem:[%s5790_s9 + $0x78] sm:$0xf0]  ;;  %v696_v21 = vadd.f32 %v4799_v37, %v677_v14 }
 0x34c   :  { %v1539_v20 = vsub.f32 %v1537_v19, %v1538_v2  ;;  %2082 = vmatpush.bf16.msra.mxu2 %v3141_v60  ;;  %812 = vmatmul.bf16.gmra.mxu0 %v722_v6  ;;  %v3089_v2 = vor.u32 %v3356_v52, %v3088_v29  ;;  %v3048_v19 = vld [vmem:[%s5787_s8 + $0x8] sm:$0xf]  ;;  %v1541_v13 = vmul.f32 %v5006_v31, %v4209_v22  ;;  %v3388_v36 = vld [vmem:[%s5790_s9 + $0x74] sm:$0xf]  ;;  %v3056_v52 = vld [vmem:[%s5787_s8 + $0x20] sm:$0xf] }
 0x34d   :  { %v3109_v60 = vor.u32 %v3358_v57, %v3106_v12  ;;  %v695_v22 = vadd.f32 %v4799_v37, %v676_v40  ;;  %v3073_v51 = vor.u32 %v3352_v54, %v3072_v59  ;;  %v3090_v29 = vld [vmem:[%s5787_s8 + $0x70] sm:$0xf0]  ;;  %v3229_v6 = vor.u32 %v3388_v36, %v3226_v5  ;;  %v3350_v57 = vld [vmem:[%s5787_s8 + $0x44] sm:$0xf]  ;;  %v3040_v40 = vld [vmem:[%s5787_s8] sm:$0xf] }
 0x34e   :  { %2043 = vmatpush.bf16.msrb.mxu3 %v3105_v23  ;;  %2127 = vmatpush.bf16.msrb.mxu0 %v3081_v33  ;;  %v5028_v58 = vperm.slane %v1539_v20, 0  ;;  %v1542_v23 = vmul.f32 %v5006_v31, %v4217_v53  ;;  %v3348_v53 = vld [vmem:[%s5787_s8 + $0x2c] sm:$0xf0]  ;;  %v3049_v33 = vor.u32 %v3345_v30, %v3048_v19  ;;  %v717_v46 = vmax.f32 %v701_v11, 0.0  ;;  %v3074_v12 = vld [vmem:[%s5787_s8 + $0x50] sm:$0xf0] }
 0x34f   :  { %v718_v62 = vmax.f32 %v702_v34, 0.0  ;;  %v3093_v15 = vor.u32 %v3354_v28, %v3090_v29  ;;  %v711_v61 = vmax.f32 %v695_v22, 0.0  ;;  %v3344_v14 = vld [vmem:[%s5787_s8 + $0xc] sm:$0xf0]  ;;  %v3162_v19 = vld [vmem:[%s5787_s8 + $0xf8] sm:$0xf0] }
 0x350   :  { %2083 = vmatpush.bf16.msra.mxu2 %v3125_v18  ;;  %v1608_v37 = vadd.f32 %v5028_v58, %v1541_v13  ;;  %v1609_v20 = vadd.f32 %v5028_v58, %v1542_v23  ;;  %v712_v18 = vmax.f32 %v696_v21, 0.0  ;;  %v3077_v13 = vor.u32 %v3350_v57, %v3074_v12  ;;  %v3346_v34 = vld [vmem:[%s5787_s8 + $0x24] sm:$0xf]  ;;  %v3042_v28 = vld [vmem:[%s5787_s8 + $0x10] sm:$0xf0] }
 0x351   :  { %v726_v30 = vpack.c.bf16 %v718_v62, %v717_v46  ;;  %v3041_v36 = vor.u32 %v3344_v14, %v3040_v40  ;;  %v3224_v29 = vld [vmem:[%s5790_s9 + $0x70] sm:$0xf]  ;;  %v3387_v57 = vld [vmem:[%s5790_s9 + $0x64] sm:$0xf0]  ;;  %v1543_v12 = vmul.f32 %v5006_v31, %v4219_v48  ;;  %v1544_v40 = vmul.f32 %v5006_v31, %v4227_v44  ;;  %v3363_v44 = vld [vmem:[%s5787_s8 + $0xac] sm:$0xf] }
 0x352   :  { %2044 = vmatpush.bf16.msrb.mxu3 %v3089_v2  ;;  %2128 = vmatpush.bf16.msrb.mxu0 %v3065_v9  ;;  %v3057_v2 = vor.u32 %v3348_v53, %v3056_v52  ;;  %v1672_v59 = vmax.f32 %v1608_v37, 0.0  ;;  %v1673_v54 = vmax.f32 %v1609_v20, 0.0  ;;  %v3371_v9 = vld [vmem:[%s5787_s8 + $0xec] sm:$0xf]  ;;  %v723_v11 = vpack.c.bf16 %v712_v18, %v711_v61  ;;  %v3146_v53 = vld [vmem:[%s5787_s8 + $0xd8] sm:$0xf0] }
 0x353   :  { %v3165_v5 = vor.u32 %v3371_v9, %v3162_v19  ;;  %v3367_v52 = vld [vmem:[%s5787_s8 + $0xcc] sm:$0xf]  ;;  %v3386_v20 = vld [vmem:[%s5790_s9 + $0x64] sm:$0xf] }
 0x354   :  { %2084 = vmatpush.bf16.msra.mxu2 %v3109_v60  ;;  %v3058_v60 = vld [vmem:[%s5787_s8 + $0x30] sm:$0xf0]  ;;  %v1736_v23 = vpack.c.bf16 %v1672_v59, %v1672_v59  ;;  %v1737_v22 = vpack.c.bf16 %v1673_v54, %v1673_v54  ;;  %v3149_v37 = vor.u32 %v3367_v52, %v3146_v53  ;;  %v1610_v59 = vadd.f32 %v5028_v58, %v1543_v12  ;;  %v3382_v12 = vld [vmem:[%s5790_s9 + $0x44] sm:$0xf] }
 0x355   :  { %828 = vmatmul.bf16.gmra.mxu3 %v726_v30  ;;  %v3061_v21 = vor.u32 %v3346_v34, %v3058_v60  ;;  %v1611_v54 = vadd.f32 %v5028_v58, %v1544_v40  ;;  %v3208_v34 = vld [vmem:[%s5790_s9 + $0x50] sm:$0xf]  ;;  %v1546_v52 = vmul.f32 %v5006_v31, %v6035_v55  ;;  %v3114_v55 = vld [vmem:[%s5787_s8 + $0x98] sm:$0xf0]  ;;  %v3202_v40 = vld [vmem:[%s5790_s9 + $0x48] sm:$0xf0] }
 0x356   :  { %2045 = vmatpush.bf16.msrb.mxu3 %v3073_v51  ;;  %2129 = vmatpush.bf16.msrb.mxu0 %v3049_v33  ;;  %v3342_v51 = vld [vmem:[%s5787_s8 + $0x4] sm:$0xf]  ;;  %v3389_v33 = vld [vmem:[%s5790_s9 + $0x74] sm:$0xf0]  ;;  %v1848_v46 = vunpack.c.l.b16 %v1736_v23  ;;  %v1849_v62 = vunpack.c.l.b16 %v1737_v22  ;;  %v1674_v19 = vmax.f32 %v1610_v59, 0.0 }
 0x357   :  { %v3045_v61 = vor.u32 %v3342_v51, %v3042_v28  ;;  %v3225_v18 = vor.u32 %v3389_v33, %v3224_v29  ;;  %v1675_v30 = vmax.f32 %v1611_v54, 0.0  ;;  %v3210_v23 = vld [vmem:[%s5790_s9 + $0x58] sm:$0xf0]  ;;  %v1545_v29 = vmul.f32 %v5006_v31, %v4229_v17  ;;  %v3359_v17 = vld [vmem:[%s5787_s8 + $0x8c] sm:$0xf] }
 0x358   :  { %2085 = vmatpush.bf16.msra.mxu2 %v3093_v15  ;;  %v5122_v14 = vpack.c.b16 %v1849_v62, %v1848_v46  ;;  %v1738_v48 = vpack.c.bf16 %v1674_v19, %v1674_v19  ;;  %v3205_v54 = vor.u32 %v3382_v12, %v3202_v40 }
 0x359   :  { %v1612_v33 = vadd.f32 %v5028_v58, %v1545_v29  ;;  %v3380_v29 = vld [vmem:[%s5790_s9 + $0x34] sm:$0xf] }
 0x35a   :  { %2389 = vmatpush.bf16.msra.mxu0 %v3229_v6  ;;  %2046 = vmatpush.bf16.msrb.mxu3 %v3057_v2  ;;  %v3218_v6 = vld [vmem:[%s5790_s9 + $0x68] sm:$0xf0]  ;;  %v3216_v2 = vld [vmem:[%s5790_s9 + $0x60] sm:$0xf]  ;;  %v1850_v51 = vunpack.c.l.b16 %v1738_v48  ;;  %v1548_v48 = vmul.f32 %v5006_v31, %v6045_v24  ;;  %v3098_v24 = vld [vmem:[%s5787_s8 + $0x78] sm:$0xf0] }
 0x35b   :  { %v3221_v15 = vor.u32 %v3386_v20, %v3218_v6  ;;  %v3217_v9 = vor.u32 %v3387_v57, %v3216_v2  ;;  %v1676_v6 = vmax.f32 %v1612_v33, 0.0  ;;  %v3117_v2 = vor.u32 %v3359_v17, %v3114_v55  ;;  %v3383_v57 = vld [vmem:[%s5790_s9 + $0x44] sm:$0xf0]  ;;  %v6078_v17 = vld [vmem:[#allocation42_spill] sm:$0xff] }
 0x35c   :  { %2086 = vmatpush.bf16.msra.mxu2 %v3077_v13  ;;  %815 = vmatmul.bf16.gmra.mxu0 %v723_v11  ;;  %v1739_v13 = vpack.c.bf16 %v1675_v30, %v1675_v30  ;;  %v3130_v11 = vld [vmem:[%s5787_s8 + $0xb8] sm:$0xf0]  ;;  %v1547_v30 = vmul.f32 %v5006_v31, %v6040_v35  ;;  %v3355_v35 = vld [vmem:[%s5787_s8 + $0x6c] sm:$0xf]  ;;  %v1550_v55 = vmul.f32 %v5006_v31, %v6078_v17 }
 0x35d   :  { %v3133_v60 = vor.u32 %v3363_v44, %v3130_v11  ;;  %v1740_v62 = vpack.c.bf16 %v1676_v6, %v1676_v6  ;;  %v1615_v44 = vadd.f32 %v5028_v58, %v1548_v48  ;;  %v3184_v48 = vld [vmem:[%s5790_s9 + $0x20] sm:$0xf] }
 0x35e   :  { %2047 = vmatpush.bf16.msrb.mxu3 %v3041_v36  ;;  %2390 = vmatpush.bf16.msra.mxu0 %v3221_v15  ;;  %v3385_v36 = vld [vmem:[%s5790_s9 + $0x54] sm:$0xf0]  ;;  %v1851_v28 = vunpack.c.l.b16 %v1739_v13  ;;  %v1614_v13 = vadd.f32 %v5028_v58, %v1547_v30  ;;  %v3082_v30 = vld [vmem:[%s5787_s8 + $0x58] sm:$0xf0] }
 0x35f   :  { %v3209_v22 = vor.u32 %v3385_v36, %v3208_v34  ;;  %v1679_v36 = vmax.f32 %v1615_v44, 0.0 }
 0x360   :  { %2087 = vmatpush.bf16.msra.mxu2 %v3061_v21  ;;  %v5155_v20 = vpack.c.b16 %v1851_v28, %v1850_v51  ;;  %v3101_v51 = vor.u32 %v3355_v35, %v3098_v24  ;;  %v3381_v28 = vld [vmem:[%s5790_s9 + $0x34] sm:$0xf0] }
 0x362   :  { %2163 = vmatpush.bf16.msra.mxu3 %v3165_v5  ;;  %v3384_v5 = vld [vmem:[%s5790_s9 + $0x54] sm:$0xf] }
 0x363   :  { %v3213_v21 = vor.u32 %v3384_v5, %v3210_v23  ;;  %v5151_v53 = vpop.f32.mrf.mxu0  ;;  %v1743_v23 = vpack.c.bf16 %v1679_v36, %v1679_v36  ;;  %v3378_v36 = vld [vmem:[%s5790_s9 + $0x24] sm:$0xf] }
 0x364   :  { %2088 = vmatpush.bf16.msra.mxu2 %v3045_v61  ;;  %v3200_v61 = vld [vmem:[%s5790_s9 + $0x40] sm:$0xf] }
 0x365   :  { %2048 = vmatmul.bf16.vlgmr.msrb.gmra.mxu3 %v5122_v14  ;;  %2391 = vmatpush.bf16.msra.mxu0 %v3213_v21  ;;  %v3201_v59 = vor.u32 %v3383_v57, %v3200_v61 }
 0x366   :  { %2164 = vmatpush.bf16.msra.mxu3 %v3149_v37  ;;  %v1613_v37 = vadd.f32 %v5028_v58, %v1546_v52  ;;  %v3194_v52 = vld [vmem:[%s5790_s9 + $0x38] sm:$0xf0] }
 0x367   :  { %2089 = vmatmul.bf16.vlgmr.msra.gmra.mxu2 %v5122_v14 }
 0x368   :  { %2348 = vmatpush.bf16.msrb.mxu2 %v3225_v18  ;;  %v1677_v46 = vmax.f32 %v1613_v37, 0.0  ;;  %v3197_v37 = vor.u32 %v3380_v29, %v3194_v52  ;;  %v6080_v29 = vld [vmem:[#allocation44_spill] sm:$0xff] }
 0x369   :  { %2392 = vmatpush.bf16.msra.mxu0 %v3205_v54  ;;  %v1552_v52 = vmul.f32 %v5006_v31, %v6080_v29 }
 0x36a   :  { %2165 = vmatpush.bf16.msra.mxu3 %v3133_v60  ;;  %v1741_v15 = vpack.c.bf16 %v1677_v46, %v1677_v46  ;;  %v1678_v60 = vmax.f32 %v1614_v13, 0.0  ;;  %v1855_v46 = vunpack.c.l.b16 %v1743_v23 }
 0x36b   :  { %v5169_v18 = vpop.f32.mrf.mxu0 }
 0x36c   :  { %2349 = vmatpush.bf16.msrb.mxu2 %v3217_v9  ;;  %2130 = vmatmul.bf16.vlgmr.msrb.gmra.mxu0 %v5122_v14  ;;  %v1852_v9 = vunpack.c.l.b16 %v1740_v62  ;;  %v1853_v19 = vunpack.c.l.b16 %v1741_v15  ;;  %v1742_v5 = vpack.c.bf16 %v1678_v60, %v1678_v60  ;;  %v6077_v62 = vld [vmem:[#allocation41_spill] sm:$0xff]  ;;  %v3379_v60 = vld [vmem:[%s5790_s9 + $0x24] sm:$0xf0] }
 0x36d   :  { %2393 = vmatpush.bf16.msra.mxu0 %v3197_v37  ;;  %v1549_v15 = vmul.f32 %v5006_v31, %v6077_v62  ;;  %v3185_v23 = vor.u32 %v3379_v60, %v3184_v48  ;;  %v1619_v37 = vadd.f32 %v5028_v58, %v1552_v52  ;;  %v6082_v48 = vld [vmem:[#allocation46_spill] sm:$0xff]  ;;  %v3343_v52 = vld [vmem:[%s5787_s8 + $0xc] sm:$0xf] }
 0x36e   :  { %2166 = vmatpush.bf16.msra.mxu3 %v3117_v2  ;;  %v5186_v11 = vpack.c.b16 %v1853_v19, %v1852_v9  ;;  %v1854_v6 = vunpack.c.l.b16 %v1742_v5  ;;  %v1617_v2 = vadd.f32 %v5028_v58, %v1550_v55  ;;  %v3351_v19 = vld [vmem:[%s5787_s8 + $0x4c] sm:$0xf] }
 0x36f   :  { %v1616_v61 = vadd.f32 %v5028_v58, %v1549_v15  ;;  %v3085_v44 = vor.u32 %v3351_v19, %v3082_v30  ;;  %v3186_v5 = vld [vmem:[%s5790_s9 + $0x28] sm:$0xf0]  ;;  %v1683_v62 = vmax.f32 %v1619_v37, 0.0  ;;  %v6081_v19 = vld [vmem:[#allocation45_spill] sm:$0xff]  ;;  %v3168_v37 = vld [vmem:[%s5790_s9] sm:$0xf] }
 0x370   :  { %2350 = vmatpush.bf16.msrb.mxu2 %v3209_v22  ;;  %v3192_v22 = vld [vmem:[%s5790_s9 + $0x30] sm:$0xf]  ;;  %v5219_v57 = vpack.c.b16 %v1855_v46, %v1854_v6  ;;  %v3189_v35 = vor.u32 %v3378_v36, %v3186_v5  ;;  %v3347_v55 = vld [vmem:[%s5787_s8 + $0x2c] sm:$0xf]  ;;  %v1553_v30 = vmul.f32 %v5006_v31, %v6081_v19  ;;  %v3376_v5 = vld [vmem:[%s5790_s9 + $0x14] sm:$0xf] }
 0x371   :  { %v3193_v33 = vor.u32 %v3381_v28, %v3192_v22  ;;  %v1680_v40 = vmax.f32 %v1616_v61, 0.0  ;;  %v1747_v17 = vpack.c.bf16 %v1683_v62, %v1683_v62  ;;  %v3066_v61 = vld [vmem:[%s5787_s8 + $0x38] sm:$0xf0]  ;;  %v3375_v62 = vld [vmem:[%s5790_s9 + $0x4] sm:$0xf0] }
 0x372   :  { %2167 = vmatpush.bf16.msra.mxu3 %v3101_v51  ;;  %2394 = vmatpush.bf16.msra.mxu0 %v3189_v35  ;;  %v6079_v51 = vld [vmem:[#allocation43_spill] sm:$0xff] }
 0x373   :  { %v5188_v34 = vpop.f32.mrf.mxu0  ;;  %v1744_v54 = vpack.c.bf16 %v1680_v40, %v1680_v40  ;;  %v1551_v28 = vmul.f32 %v5006_v31, %v6079_v51  ;;  %v3377_v40 = vld [vmem:[%s5790_s9 + $0x14] sm:$0xf0] }
 0x374   :  { %2351 = vmatpush.bf16.msrb.mxu2 %v3201_v59  ;;  %v1681_v59 = vmax.f32 %v1617_v2, 0.0  ;;  %v3176_v2 = vld [vmem:[%s5790_s9 + $0x10] sm:$0xf] }
 0x375   :  { %2053 = vmatmul.bf16.gmra.mxu3 %v5155_v20  ;;  %v1856_v24 = vunpack.c.l.b16 %v1744_v54  ;;  %v1859_v54 = vunpack.c.l.b16 %v1747_v17 }
 0x376   :  { %v1745_v9 = vpack.c.bf16 %v1681_v59, %v1681_v59  ;;  %2168 = vmatpush.bf16.msra.mxu3 %v3085_v44  ;;  %v1620_v44 = vadd.f32 %v5028_v58, %v1553_v30  ;;  %v3374_v30 = vld [vmem:[%s5790_s9 + $0x4] sm:$0xf] }
 0x377   :  { %2094 = vmatmul.bf16.gmra.mxu2 %v5155_v20 }
 0x378   :  { %2352 = vmatpush.bf16.msrb.mxu2 %v3193_v33  ;;  %v1857_v22 = vunpack.c.l.b16 %v1745_v9  ;;  %v1618_v33 = vadd.f32 %v5028_v58, %v1551_v28  ;;  %v3177_v9 = vor.u32 %v3377_v40, %v3176_v2 }
 0x37a   :  { %v5248_v6 = vpack.c.b16 %v1857_v22, %v1856_v24  ;;  %v1682_v46 = vmax.f32 %v1618_v33, 0.0  ;;  %v1684_v24 = vmax.f32 %v1620_v44, 0.0  ;;  %v3050_v33 = vld [vmem:[%s5787_s8 + $0x18] sm:$0xf0] }
 0x37b   :  { %v5202_v21 = vpop.f32.mrf.mxu0 }
 0x37c   :  { %2134 = vmatmul.bf16.gmra.mxu0 %v5155_v20  ;;  %2353 = vmatpush.bf16.msrb.mxu2 %v3185_v23  ;;  %v1746_v15 = vpack.c.bf16 %v1682_v46, %v1682_v46  ;;  %v3178_v23 = vld [vmem:[%s5790_s9 + $0x18] sm:$0xf0]  ;;  %v1748_v28 = vpack.c.bf16 %v1684_v24, %v1684_v24  ;;  %v3053_v46 = vor.u32 %v3343_v52, %v3050_v33  ;;  %v3288_v24 = vld [vmem:[%s5791_s10 + $0x70] sm:$0xf] }
 0x37d   :  { %v3181_v35 = vor.u32 %v3376_v5, %v3178_v23  ;;  %v3290_v52 = vld [vmem:[%s5791_s10 + $0x78] sm:$0xf0] }
 0x37e   :  { %v1858_v59 = vunpack.c.l.b16 %v1746_v15  ;;  %v1860_v15 = vunpack.c.l.b16 %v1748_v28  ;;  %v3404_v28 = vld [vmem:[%s5791_s10 + $0x74] sm:$0xf] }
 0x37f   :  { %2395 = vmatpush.bf16.msra.mxu0 %v3181_v35 }
 0x380   :  { %2354 = vmatpush.bf16.msrb.mxu2 %v3177_v9  ;;  %v5271_v36 = vpack.c.b16 %v1859_v54, %v1858_v59 }
 0x381   :  { %v5280_v51 = vpop.f32.mrf.mxu3 }
 0x382   :  { %6083 = vst [vmem:[#allocation16_spill] sm:$0xff] %v5280_v51 }
 0x385   :  { %2058 = vmatmul.bf16.gmra.mxu3 %v5186_v11 }
 0x387   :  { %2099 = vmatmul.bf16.gmra.mxu2 %v5186_v11 }
 0x389   :  { %v5302_v9 = vpop.f32.mrf.mxu3 }
 0x38a   :  { %6086 = vst [vmem:[#allocation7_spill] sm:$0xff] %v5302_v9 }
 0x38c   :  { %2139 = vmatmul.bf16.gmra.mxu0 %v5186_v11 }
 0x395   :  { %v810_v12 = vpop.f32.mrf.mxu0  ;;  %2061 = vmatmul.bf16.gmra.mxu3 %v5219_v57 }
 0x396   :  { %v3069_v12 = vor.u32 %v3347_v55, %v3066_v61  ;;  %v3169_v55 = vor.u32 %v3375_v62, %v3168_v37  ;;  %v6084_v61 = vld [vmem:[#allocation47_spill] sm:$0xff]  ;;  %v3293_v37 = vor.u32 %v3404_v28, %v3290_v52 }
 0x397   :  { %2102 = vmatmul.bf16.gmra.mxu2 %v5219_v57  ;;  %v1555_v2 = vmul.f32 %v5006_v31, %v6084_v61  ;;  %v3282_v28 = vld [vmem:[%s5791_s10 + $0x68] sm:$0xf0] }
 0x398   :  { %2169 = vmatpush.bf16.msra.mxu3 %v3069_v12  ;;  %v6085_v12 = vld [vmem:[#allocation48_spill] sm:$0xff]  ;;  %2355 = vmatpush.bf16.msrb.mxu2 %v3169_v55  ;;  %v6087_v55 = vld [vmem:[#allocation49_spill] sm:$0xff] }
 0x399   :  { %v1556_v40 = vmul.f32 %v5006_v31, %v6085_v12  ;;  %v1622_v59 = vadd.f32 %v5028_v58, %v1555_v2  ;;  %v1557_v61 = vmul.f32 %v5006_v31, %v6087_v55  ;;  %v6088_v2 = vld [vmem:[#allocation50_spill] sm:$0xff]  ;;  %v6092_v55 = vld [vmem:[#allocation52_spill] sm:$0xff] }
 0x39a   :  { %v1558_v12 = vmul.f32 %v5006_v31, %v6088_v2 }
 0x39b   :  { %v1623_v54 = vadd.f32 %v5028_v58, %v1556_v40  ;;  %v1686_v44 = vmax.f32 %v1622_v59, 0.0  ;;  %v1624_v40 = vadd.f32 %v5028_v58, %v1557_v61  ;;  %v1560_v61 = vmul.f32 %v5006_v31, %v6092_v55  ;;  %v6093_v55 = vld [vmem:[#allocation53_spill] sm:$0xff] }
 0x39c   :  { %2143 = vmatmul.bf16.gmra.mxu0 %v5219_v57  ;;  %2170 = vmatpush.bf16.msra.mxu3 %v3053_v46  ;;  %v1625_v59 = vadd.f32 %v5028_v58, %v1558_v12 }
 0x39d   :  { %v811_v13 = vpop.f32.mrf.mxu0  ;;  %v1750_v23 = vpack.c.bf16 %v1686_v44, %v1686_v44  ;;  %2615 = vmatpush.bf16.msra.mxu2 %v3293_v37 }
 0x39e   :  { %v1554_v13 = vmul.f32 %v5006_v31, %v6082_v48  ;;  %v3170_v48 = vld [vmem:[%s5790_s9 + $0x8] sm:$0xf0] }
 0x39f   :  { %v1862_v46 = vunpack.c.l.b16 %v1750_v23  ;;  %v3280_v23 = vld [vmem:[%s5791_s10 + $0x60] sm:$0xf] }
 0x3a0   :  { %v1621_v60 = vadd.f32 %v5028_v58, %v1554_v13  ;;  %v3173_v13 = vor.u32 %v3374_v30, %v3170_v48  ;;  %v1688_v48 = vmax.f32 %v1624_v40, 0.0  ;;  %v1627_v40 = vadd.f32 %v5028_v58, %v1560_v61 }
 0x3a1   :  { %v1561_v61 = vmul.f32 %v5006_v31, %v6093_v55 }
 0x3a2   :  { %v1685_v22 = vmax.f32 %v1621_v60, 0.0  ;;  %v1687_v60 = vmax.f32 %v1623_v54, 0.0  ;;  %2396 = vmatpush.bf16.msra.mxu0 %v3173_v13  ;;  %v1689_v13 = vmax.f32 %v1625_v59, 0.0 }
 0x3a4   :  { %v1749_v29 = vpack.c.bf16 %v1685_v22, %v1685_v22  ;;  %v1751_v35 = vpack.c.bf16 %v1687_v60, %v1687_v60  ;;  %v3405_v22 = vld [vmem:[%s5791_s10 + $0x74] sm:$0xf0]  ;;  %v1752_v60 = vpack.c.bf16 %v1688_v48, %v1688_v48  ;;  %v1691_v48 = vmax.f32 %v1627_v40, 0.0 }
 0x3a5   :  { %2064 = vmatmul.bf16.gmra.mxu3 %v5248_v6  ;;  %v1628_v40 = vadd.f32 %v5028_v58, %v1561_v61 }
 0x3a6   :  { %v1861_v17 = vunpack.c.l.b16 %v1749_v29  ;;  %v3289_v29 = vor.u32 %v3405_v22, %v3288_v24  ;;  %v1863_v62 = vunpack.c.l.b16 %v1751_v35  ;;  %v3403_v35 = vld [vmem:[%s5791_s10 + $0x64] sm:$0xf0]  ;;  %v3402_v24 = vld [vmem:[%s5791_s10 + $0x64] sm:$0xf] }
 0x3a7   :  { %2105 = vmatmul.bf16.gmra.mxu2 %v5248_v6  ;;  %v3281_v22 = vor.u32 %v3403_v35, %v3280_v23  ;;  %v3285_v52 = vor.u32 %v3402_v24, %v3282_v28  ;;  %v1755_v23 = vpack.c.bf16 %v1691_v48, %v1691_v48  ;;  %v3272_v35 = vld [vmem:[%s5791_s10 + $0x50] sm:$0xf]  ;;  %v3401_v24 = vld [vmem:[%s5791_s10 + $0x54] sm:$0xf0] }
 0x3a8   :  { %v5304_v19 = vpack.c.b16 %v1861_v17, %v1860_v15  ;;  %2574 = vmatpush.bf16.msrb.mxu3 %v3289_v29  ;;  %v3413_v17 = vld [vmem:[%s5792_s11 + $0x38] sm:$0xff]  ;;  %v5336_v54 = vpack.c.b16 %v1863_v62, %v1862_v46  ;;  %v3412_v62 = vld [vmem:[%s5792_s11 + $0x30] sm:$0xff]  ;;  %v3273_v28 = vor.u32 %v3401_v24, %v3272_v35 }
 0x3a9   :  { %2768 = vmatpush.bf16.msrb.mxu0 %v3413_v17  ;;  %2616 = vmatpush.bf16.msra.mxu2 %v3285_v52 }
 0x3ac   :  { %2146 = vmatmul.bf16.gmra.mxu0 %v5248_v6  ;;  %2575 = vmatpush.bf16.msrb.mxu3 %v3281_v22  ;;  %v3400_v22 = vld [vmem:[%s5791_s10 + $0x54] sm:$0xf] }
 0x3ad   :  { %2769 = vmatpush.bf16.msrb.mxu0 %v3412_v62 }
 0x3b0   :  { %2576 = vmatpush.bf16.msrb.mxu3 %v3273_v28  ;;  %v3264_v28 = vld [vmem:[%s5791_s10 + $0x40] sm:$0xf] }
 0x3b5   :  { %2069 = vmatmul.bf16.gmra.mxu3 %v5271_v36 }
 0x3b7   :  { %2110 = vmatmul.bf16.gmra.mxu2 %v5271_v36 }
 0x3bc   :  { %2150 = vmatmul.bf16.gmra.mxu0 %v5271_v36 }
 0x3c5   :  { %2074 = vmatmul.bf16.gmra.mxu3 %v5304_v19 }
 0x3c7   :  { %2115 = vmatmul.bf16.gmra.mxu2 %v5304_v19 }
 0x3c8   :  { %v826_v33 = vpop.f32.mrf.mxu3 }
 0x3c9   :  { %v813_v5 = vpop.f32.mrf.mxu0  ;;  %v2236_v33 = vunpack.c.l.b16 %v1752_v60 }
 0x3ca   :  { %v1753_v5 = vpack.c.bf16 %v1689_v13, %v1689_v13 }
 0x3cc   :  { %2155 = vmatmul.bf16.gmra.mxu0 %v5304_v19  ;;  %v2237_v37 = vunpack.c.l.b16 %v1753_v5 }
 0x3ce   :  { %v2252_v12 = vpack.c.b16 %v2237_v37, %v2236_v33  ;;  %v2239_v37 = vunpack.c.l.b16 %v1755_v23 }
 0x3d0   :  { %v827_v30 = vpop.f32.mrf.mxu3 }
 0x3d1   :  { %v814_v15 = vpop.f32.mrf.mxu0 }
 0x3d2   :  { %v6091_v15 = vld [vmem:[#allocation51_spill] sm:$0xff] }
 0x3d3   :  { %v1559_v17 = vmul.f32 %v5006_v31, %v6091_v15 }
 0x3d5   :  { %2077 = vmatmul.bf16.gmra.mxu3 %v5336_v54  ;;  %v1626_v2 = vadd.f32 %v5028_v58, %v1559_v17  ;;  %v3411_v17 = vld [vmem:[%s5792_s11 + $0x28] sm:$0xff] }
 0x3d6   :  { %2770 = vmatpush.bf16.msrb.mxu0 %v3411_v17 }
 0x3d7   :  { %2118 = vmatmul.bf16.gmra.mxu2 %v5336_v54  ;;  %v1690_v30 = vmax.f32 %v1626_v2, 0.0  ;;  %v6094_v2 = vld [vmem:[#allocation12_spill] sm:$0xff] }
 0x3d8   :  { %v829_v29 = vpop.f32.mrf.mxu3 }
 0x3d9   :  { %v5339_v44 = vpop.f32.mrf.mxu0  ;;  %v1754_v5 = vpack.c.bf16 %v1690_v30, %v1690_v30 }
 0x3da   :  { %6089 = vst [vmem:[#allocation2_spill] sm:$0xff] %v5339_v44 }
 0x3db   :  { %v2238_v33 = vunpack.c.l.b16 %v1754_v5 }
 0x3dc   :  { %2159 = vmatmul.bf16.gmra.mxu0 %v5336_v54 }
 0x3e0   :  { %v830_v59 = vpop.f32.mrf.mxu3 }
 0x3e1   :  { %v5355_v46 = vpop.f32.mrf.mxu0  ;;  %v2253_v59 = vpack.c.b16 %v2239_v37, %v2238_v33 }
 0x3e2   :  { %6090 = vst [vmem:[#allocation33_spill] sm:$0xff] %v5355_v46 }
 0x3e5   :  { %2171 = vmatmul.bf16.vlgmr.msra.gmra.mxu3 %v5122_v14  ;;  %v3274_v14 = vld [vmem:[%s5791_s10 + $0x58] sm:$0xf0] }
 0x3e6   :  { %v3277_v52 = vor.u32 %v3400_v22, %v3274_v14  ;;  %v3399_v14 = vld [vmem:[%s5791_s10 + $0x44] sm:$0xf0] }
 0x3e7   :  { %2356 = vmatmul.bf16.vlgmr.msrb.gmra.mxu2 %v2252_v12  ;;  %v3265_v33 = vor.u32 %v3399_v14, %v3264_v28 }
 0x3e8   :  { %v5381_v29 = vpop.f32.mrf.mxu3  ;;  %2617 = vmatpush.bf16.msra.mxu2 %v3277_v52  ;;  %v3398_v52 = vld [vmem:[%s5791_s10 + $0x44] sm:$0xf] }
 0x3e9   :  { %v2131_v13 = vpop.f32.mrf.mxu0  ;;  %2577 = vmatpush.bf16.msrb.mxu3 %v3265_v33 }
 0x3ea   :  { %v5366_v60 = vpop.f32.mrf.mxu2  ;;  %v1692_v13 = vmax.f32 %v1628_v40, 0.0  ;;  %v3410_v40 = vld [vmem:[%s5792_s11 + $0x20] sm:$0xff] }
 0x3eb   :  { %2771 = vmatpush.bf16.msrb.mxu0 %v3410_v40  ;;  %v3256_v40 = vld [vmem:[%s5791_s10 + $0x30] sm:$0xf] }
 0x3ec   :  { %2397 = vmatmul.bf16.vlgmr.msra.gmra.mxu0 %v2252_v12  ;;  %v1562_v12 = vmul.f32 %v5006_v31, %v6094_v2  ;;  %v1756_v24 = vpack.c.bf16 %v1692_v13, %v1692_v13  ;;  %v6096_v13 = vld [vmem:[#allocation14_spill] sm:$0xff] }
 0x3ee   :  { %v1629_v30 = vadd.f32 %v5028_v58, %v1562_v12  ;;  %v2240_v55 = vunpack.c.l.b16 %v1756_v24 }
 0x3f0   :  { %v5396_v48 = vpop.f32.mrf.mxu3  ;;  %v1693_v5 = vmax.f32 %v1629_v30, 0.0 }
 0x3f1   :  { %v5383_v62 = vpop.f32.mrf.mxu0 }
 0x3f2   :  { %v5385_v15 = vpop.f32.mrf.mxu2  ;;  %v1757_v22 = vpack.c.bf16 %v1693_v5, %v1693_v5  ;;  %v1564_v5 = vmul.f32 %v5006_v31, %v6096_v13 }
 0x3f4   :  { %v2241_v61 = vunpack.c.l.b16 %v1757_v22  ;;  %v1631_v22 = vadd.f32 %v5028_v58, %v1564_v5 }
 0x3f5   :  { %2175 = vmatmul.bf16.gmra.mxu3 %v5155_v20  ;;  %v3266_v20 = vld [vmem:[%s5791_s10 + $0x48] sm:$0xf0] }
 0x3f6   :  { %v3269_v17 = vor.u32 %v3398_v52, %v3266_v20  ;;  %v2254_v24 = vpack.c.b16 %v2241_v61, %v2240_v55  ;;  %v1695_v33 = vmax.f32 %v1631_v22, 0.0  ;;  %v3397_v55 = vld [vmem:[%s5791_s10 + $0x34] sm:$0xf0]  ;;  %v3396_v61 = vld [vmem:[%s5791_s10 + $0x34] sm:$0xf] }
 0x3f7   :  { %2361 = vmatmul.bf16.gmra.mxu2 %v2253_v59 }
 0x3f8   :  { %v5415_v37 = vpop.f32.mrf.mxu3  ;;  %2618 = vmatpush.bf16.msra.mxu2 %v3269_v17  ;;  %v1759_v9 = vpack.c.bf16 %v1695_v33, %v1695_v33  ;;  %v3409_v33 = vld [vmem:[%s5792_s11 + $0x18] sm:$0xff] }
 0x3f9   :  { %v5398_v23 = vpop.f32.mrf.mxu0  ;;  %2772 = vmatpush.bf16.msrb.mxu0 %v3409_v33  ;;  %v3248_v33 = vld [vmem:[%s5791_s10 + $0x20] sm:$0xf] }
 0x3fa   :  { %v5400_v35 = vpop.f32.mrf.mxu2 }
 0x3fc   :  { %2401 = vmatmul.bf16.gmra.mxu0 %v2253_v59  ;;  %v6095_v59 = vld [vmem:[#allocation13_spill] sm:$0xff] }
 0x3fd   :  { %v1563_v30 = vmul.f32 %v5006_v31, %v6095_v59 }
 0x3ff   :  { %v1630_v28 = vadd.f32 %v5028_v58, %v1563_v30  ;;  %v3257_v30 = vor.u32 %v3397_v55, %v3256_v40  ;;  %v6098_v40 = vld [vmem:[#allocation54_spill] sm:$0xff] }
 0x400   :  { %v5430_v14 = vpop.f32.mrf.mxu3  ;;  %v1566_v55 = vmul.f32 %v5006_v31, %v6098_v40 }
 0x401   :  { %v5417_v2 = vpop.f32.mrf.mxu0  ;;  %v1694_v52 = vmax.f32 %v1630_v28, 0.0  ;;  %2578 = vmatpush.bf16.msrb.mxu3 %v3257_v30 }
 0x402   :  { %v5419_v12 = vpop.f32.mrf.mxu2 }
 0x403   :  { %v1758_v59 = vpack.c.bf16 %v1694_v52, %v1694_v52 }
 0x405   :  { %2180 = vmatmul.bf16.gmra.mxu3 %v5186_v11  ;;  %v3258_v11 = vld [vmem:[%s5791_s10 + $0x38] sm:$0xf0]  ;;  %v2242_v28 = vunpack.c.l.b16 %v1758_v59  ;;  %v1633_v59 = vadd.f32 %v5028_v58, %v1566_v55 }
 0x406   :  { %v3261_v5 = vor.u32 %v3396_v61, %v3258_v11 }
 0x407   :  { %2366 = vmatmul.bf16.gmra.mxu2 %v2254_v24  ;;  %v1697_v11 = vmax.f32 %v1633_v59, 0.0 }
 0x408   :  { %v2059_v13 = vpop.f32.mrf.mxu3  ;;  %2619 = vmatpush.bf16.msra.mxu2 %v3261_v5 }
 0x409   :  { %v5432_v20 = vpop.f32.mrf.mxu0 }
 0x40a   :  { %v2100_v17 = vpop.f32.mrf.mxu2 }
 0x40b   :  { %v6097_v17 = vld [vmem:[#allocation15_spill] sm:$0xff] }
 0x40c   :  { %2406 = vmatmul.bf16.gmra.mxu0 %v2254_v24  ;;  %v2243_v24 = vunpack.c.l.b16 %v1759_v9  ;;  %v1565_v51 = vmul.f32 %v5006_v31, %v6097_v17  ;;  %v1761_v17 = vpack.c.bf16 %v1697_v11, %v1697_v11  ;;  %v6099_v11 = vld [vmem:[#allocation55_spill] sm:$0xff] }
 0x40e   :  { %v1632_v13 = vadd.f32 %v5028_v58, %v1565_v51  ;;  %v2255_v61 = vpack.c.b16 %v2243_v24, %v2242_v28  ;;  %v3395_v51 = vld [vmem:[%s5791_s10 + $0x24] sm:$0xf0]  ;;  %v3394_v28 = vld [vmem:[%s5791_s10 + $0x24] sm:$0xf] }
 0x40f   :  { %v3249_v24 = vor.u32 %v3395_v51, %v3248_v33 }
 0x410   :  { %v2060_v9 = vpop.f32.mrf.mxu3  ;;  %v1696_v30 = vmax.f32 %v1632_v13, 0.0 }
 0x411   :  { %v2142_v22 = vpop.f32.mrf.mxu0  ;;  %2579 = vmatpush.bf16.msrb.mxu3 %v3249_v24 }
 0x412   :  { %v2101_v52 = vpop.f32.mrf.mxu2 }
 0x413   :  { %v1760_v52 = vpack.c.bf16 %v1696_v30, %v1696_v30  ;;  %v3408_v30 = vld [vmem:[%s5792_s11 + $0x10] sm:$0xff] }
 0x414   :  { %2773 = vmatpush.bf16.msrb.mxu0 %v3408_v30  ;;  %v3240_v30 = vld [vmem:[%s5791_s10 + $0x10] sm:$0xf] }
 0x415   :  { %2184 = vmatmul.bf16.gmra.mxu3 %v5219_v57  ;;  %v3250_v57 = vld [vmem:[%s5791_s10 + $0x28] sm:$0xf0]  ;;  %v2244_v13 = vunpack.c.l.b16 %v1760_v52 }
 0x416   :  { %v3253_v55 = vor.u32 %v3394_v28, %v3250_v57 }
 0x417   :  { %2369 = vmatmul.bf16.gmra.mxu2 %v2255_v61 }
 0x418   :  { %v2062_v40 = vpop.f32.mrf.mxu3  ;;  %2620 = vmatpush.bf16.msra.mxu2 %v3253_v55 }
 0x419   :  { %v2144_v5 = vpop.f32.mrf.mxu0 }
 0x41a   :  { %v2103_v22 = vpop.f32.mrf.mxu2  ;;  %v1567_v5 = vmul.f32 %v5006_v31, %v6099_v11 }
 0x41b   :  { %v6100_v22 = vld [vmem:[#allocation56_spill] sm:$0xff] }
 0x41c   :  { %2410 = vmatmul.bf16.gmra.mxu0 %v2255_v61  ;;  %v2245_v61 = vunpack.c.l.b16 %v1761_v17  ;;  %v1568_v33 = vmul.f32 %v5006_v31, %v6100_v22  ;;  %v1634_v51 = vadd.f32 %v5028_v58, %v1567_v5 }
 0x41e   :  { %v2256_v28 = vpack.c.b16 %v2245_v61, %v2244_v13  ;;  %v1635_v52 = vadd.f32 %v5028_v58, %v1568_v33  ;;  %v1698_v24 = vmax.f32 %v1634_v51, 0.0  ;;  %v3393_v13 = vld [vmem:[%s5791_s10 + $0x14] sm:$0xf0]  ;;  %v3392_v61 = vld [vmem:[%s5791_s10 + $0x14] sm:$0xf] }
 0x41f   :  { %v3241_v11 = vor.u32 %v3393_v13, %v3240_v30 }
 0x420   :  { %v2063_v17 = vpop.f32.mrf.mxu3  ;;  %v1699_v57 = vmax.f32 %v1635_v52, 0.0 }
 0x421   :  { %v2145_v59 = vpop.f32.mrf.mxu0  ;;  %2580 = vmatpush.bf16.msrb.mxu3 %v3241_v11  ;;  %v3407_v17 = vld [vmem:[%s5792_s11 + $0x8] sm:$0xff] }
 0x422   :  { %v2104_v9 = vpop.f32.mrf.mxu2  ;;  %v1762_v59 = vpack.c.bf16 %v1698_v24, %v1698_v24  ;;  %v6105_v24 = vld [vmem:[#allocation57_spill] sm:$0xff]  ;;  %2774 = vmatpush.bf16.msrb.mxu0 %v3407_v17  ;;  %v3390_v17 = vld [vmem:[%s5791_s10 + $0x4] sm:$0xf] }
 0x423   :  { %v1763_v9 = vpack.c.bf16 %v1699_v57, %v1699_v57  ;;  %v1569_v57 = vmul.f32 %v5006_v31, %v6105_v24 }
 0x424   :  { %v2246_v33 = vunpack.c.l.b16 %v1762_v59 }
 0x425   :  { %2187 = vmatmul.bf16.gmra.mxu3 %v5248_v6  ;;  %v3242_v6 = vld [vmem:[%s5791_s10 + $0x18] sm:$0xf0]  ;;  %v2247_v51 = vunpack.c.l.b16 %v1763_v9  ;;  %v1636_v13 = vadd.f32 %v5028_v58, %v1569_v57 }
 0x426   :  { %v3245_v22 = vor.u32 %v3392_v61, %v3242_v6 }
 0x427   :  { %2372 = vmatmul.bf16.gmra.mxu2 %v2256_v28  ;;  %v2257_v59 = vpack.c.b16 %v2247_v51, %v2246_v33  ;;  %v1700_v11 = vmax.f32 %v1636_v13, 0.0  ;;  %v3232_v33 = vld [vmem:[%s5791_s10] sm:$0xf]  ;;  %v3391_v51 = vld [vmem:[%s5791_s10 + $0x4] sm:$0xf0] }
 0x428   :  { %v5493_v5 = vpop.f32.mrf.mxu3  ;;  %2621 = vmatpush.bf16.msra.mxu2 %v3245_v22  ;;  %v3233_v57 = vor.u32 %v3391_v51, %v3232_v33  ;;  %v6113_v33 = vld [vmem:[#allocation59_spill] sm:$0xff] }
 0x429   :  { %v2147_v40 = vpop.f32.mrf.mxu0  ;;  %6102 = vst [vmem:[#allocation8_spill] sm:$0xff] %v5493_v5  ;;  %v1764_v24 = vpack.c.bf16 %v1700_v11, %v1700_v11  ;;  %v1571_v51 = vmul.f32 %v5006_v31, %v6113_v33  ;;  %v6123_v5 = vld [vmem:[#allocation31_spill] sm:$0xff] }
 0x42a   :  { %v5478_v55 = vpop.f32.mrf.mxu2  ;;  %v6106_v40 = vld [vmem:[#allocation58_spill] sm:$0xff]  ;;  %2581 = vmatpush.bf16.msrb.mxu3 %v3233_v57 }
 0x42b   :  { %6101 = vst [vmem:[#allocation17_spill] sm:$0xff] %v5478_v55  ;;  %v1570_v30 = vmul.f32 %v5006_v31, %v6106_v40  ;;  %v6124_v55 = vld [vmem:[#allocation60_spill] sm:$0xff] }
 0x42c   :  { %2413 = vmatmul.bf16.gmra.mxu0 %v2256_v28 }
 0x42d   :  { %v1637_v9 = vadd.f32 %v5028_v58, %v1570_v30 }
 0x42f   :  { %v1701_v6 = vmax.f32 %v1637_v9, 0.0 }
 0x430   :  { %v5508_v61 = vpop.f32.mrf.mxu3 }
 0x431   :  { %v5495_v28 = vpop.f32.mrf.mxu0  ;;  %6107 = vst [vmem:[#allocation18_spill] sm:$0xff] %v5508_v61  ;;  %v1765_v40 = vpack.c.bf16 %v1701_v6, %v1701_v6 }
 0x432   :  { %6103 = vst [vmem:[#allocation3_spill] sm:$0xff] %v5495_v28  ;;  %v5497_v52 = vpop.f32.mrf.mxu2 }
 0x433   :  { %6104 = vst [vmem:[#allocation34_spill] sm:$0xff] %v5497_v52  ;;  %v2249_v9 = vunpack.c.l.b16 %v1765_v40 }
 0x435   :  { %2191 = vmatmul.bf16.gmra.mxu3 %v5271_v36  ;;  %v3234_v36 = vld [vmem:[%s5791_s10 + $0x8] sm:$0xf0] }
 0x436   :  { %v3237_v13 = vor.u32 %v3390_v17, %v3234_v36  ;;  %v1638_v17 = vadd.f32 %v5028_v58, %v1571_v51 }
 0x437   :  { %2377 = vmatmul.bf16.gmra.mxu2 %v2257_v59 }
 0x438   :  { %v5527_v30 = vpop.f32.mrf.mxu3  ;;  %2622 = vmatpush.bf16.msra.mxu2 %v3237_v13  ;;  %v1702_v36 = vmax.f32 %v1638_v17, 0.0 }
 0x439   :  { %v5510_v22 = vpop.f32.mrf.mxu0  ;;  %6110 = vst [vmem:[#allocation35_spill] sm:$0xff] %v5527_v30 }
 0x43a   :  { %6108 = vst [vmem:[#allocation9_spill] sm:$0xff] %v5510_v22  ;;  %v5512_v46 = vpop.f32.mrf.mxu2  ;;  %v6114_v22 = vld [vmem:[#allocation22_spill] sm:$0xff]  ;;  %v1766_v33 = vpack.c.bf16 %v1702_v36, %v1702_v36 }
 0x43b   :  { %6109 = vst [vmem:[#allocation4_spill] sm:$0xff] %v5512_v46  ;;  %v3406_v46 = vld [vmem:[%s5792_s11] sm:$0xff]  ;;  %v1572_v44 = vmul.f32 %v5006_v31, %v6114_v22 }
 0x43c   :  { %2417 = vmatmul.bf16.gmra.mxu0 %v2257_v59  ;;  %v2248_v59 = vunpack.c.l.b16 %v1764_v24 }
 0x43d   :  { %2775 = vmatpush.bf16.msrb.mxu0 %v3406_v46  ;;  %v1639_v40 = vadd.f32 %v5028_v58, %v1572_v44  ;;  %v2250_v46 = vunpack.c.l.b16 %v1766_v33 }
 0x43e   :  { %v2258_v24 = vpack.c.b16 %v2249_v9, %v2248_v59  ;;  %v6117_v9 = vld [vmem:[#allocation23_spill] sm:$0xff] }
 0x43f   :  { %v1703_v13 = vmax.f32 %v1639_v40, 0.0  ;;  %v1573_v44 = vmul.f32 %v5006_v31, %v6117_v9 }
 0x440   :  { %v5542_v57 = vpop.f32.mrf.mxu3 }
 0x441   :  { %v5529_v11 = vpop.f32.mrf.mxu0  ;;  %6115 = vst [vmem:[#allocation10_spill] sm:$0xff] %v5542_v57  ;;  %v1767_v30 = vpack.c.bf16 %v1703_v13, %v1703_v13  ;;  %v6118_v57 = vld [vmem:[#allocation24_spill] sm:$0xff]  ;;  %v1640_v40 = vadd.f32 %v5028_v58, %v1573_v44 }
 0x442   :  { %6111 = vst [vmem:[#allocation19_spill] sm:$0xff] %v5529_v11  ;;  %v5531_v6 = vpop.f32.mrf.mxu2  ;;  %v1574_v17 = vmul.f32 %v5006_v31, %v6118_v57 }
 0x443   :  { %6112 = vst [vmem:[#allocation38_spill] sm:$0xff] %v5531_v6  ;;  %v2251_v61 = vunpack.c.l.b16 %v1767_v30  ;;  %v1590_v30 = vmul.f32 %v5006_v31, %v4684_v38  ;;  %v1704_v36 = vmax.f32 %v1640_v40, 0.0  ;;  %v1575_v40 = vmul.f32 %v5006_v31, %v6072_v39 }
 0x444   :  { %v1592_v39 = vmul.f32 %v5006_v31, %v4730_v7 }
 0x445   :  { %2196 = vmatmul.bf16.gmra.mxu3 %v5304_v19  ;;  %v1657_v57 = vadd.f32 %v5028_v58, %v1590_v30 }
 0x447   :  { %2382 = vmatmul.bf16.gmra.mxu2 %v2258_v24  ;;  %v1721_v9 = vmax.f32 %v1657_v57, 0.0  ;;  %v1591_v57 = vmul.f32 %v5006_v31, %v4708_v1 }
 0x448   :  { %v2075_v22 = vpop.f32.mrf.mxu3 }
 0x449   :  { %v5544_v6 = vpop.f32.mrf.mxu0  ;;  %v1785_v30 = vpack.c.bf16 %v1721_v9, %v1721_v9  ;;  %v1658_v9 = vadd.f32 %v5028_v58, %v1591_v57 }
 0x44a   :  { %6116 = vst [vmem:[#allocation5_spill] sm:$0xff] %v5544_v6  ;;  %v2116_v11 = vpop.f32.mrf.mxu2  ;;  %v2259_v6 = vpack.c.b16 %v2251_v61, %v2250_v46 }
 0x44b   :  { %v1641_v11 = vadd.f32 %v5028_v58, %v1574_v17 }
 0x44c   :  { %2422 = vmatmul.bf16.gmra.mxu0 %v2258_v24  ;;  %v1589_v24 = vmul.f32 %v5006_v31, %v4662_v32 }
 0x44d   :  { %v1705_v13 = vmax.f32 %v1641_v11, 0.0  ;;  %v6119_v11 = vld [vmem:[#allocation26_spill] sm:$0xff] }
 0x44f   :  { %v1769_v61 = vpack.c.bf16 %v1705_v13, %v1705_v13 }
 0x450   :  { %v2076_v19 = vpop.f32.mrf.mxu3 }
 0x451   :  { %v2158_v51 = vpop.f32.mrf.mxu0  ;;  %v2463_v17 = vunpack.c.l.b16 %v1769_v61 }
 0x452   :  { %v2117_v59 = vpop.f32.mrf.mxu2  ;;  %v1656_v51 = vadd.f32 %v5028_v58, %v1589_v24  ;;  %v1576_v24 = vmul.f32 %v5006_v31, %v6119_v11 }
 0x453   :  { %v1768_v59 = vpack.c.bf16 %v1704_v36, %v1704_v36 }
 0x454   :  { %v1720_v46 = vmax.f32 %v1656_v51, 0.0  ;;  %v1643_v36 = vadd.f32 %v5028_v58, %v1576_v24 }
 0x455   :  { %2200 = vmatmul.bf16.gmra.mxu3 %v5336_v54  ;;  %v2462_v32 = vunpack.c.l.b16 %v1768_v59  ;;  %v1642_v54 = vadd.f32 %v5028_v58, %v1575_v40  ;;  %v1722_v40 = vmax.f32 %v1658_v9, 0.0 }
 0x456   :  { %v1707_v61 = vmax.f32 %v1643_v36, 0.0 }
 0x457   :  { %2385 = vmatmul.bf16.gmra.mxu2 %v2259_v6  ;;  %v1706_v59 = vmax.f32 %v1642_v54, 0.0  ;;  %v6120_v54 = vld [vmem:[#allocation27_spill] sm:$0xff] }
 0x458   :  { %v2078_v44 = vpop.f32.mrf.mxu3  ;;  %v1577_v36 = vmul.f32 %v5006_v31, %v6120_v54 }
 0x459   :  { %v2160_v33 = vpop.f32.mrf.mxu0 }
 0x45a   :  { %v2119_v22 = vpop.f32.mrf.mxu2  ;;  %v1784_v33 = vpack.c.bf16 %v1720_v46, %v1720_v46 }
 0x45b   :  { %v2689_v22 = vunpack.c.l.b16 %v1785_v30 }
 0x45c   :  { %2426 = vmatmul.bf16.gmra.mxu0 %v2259_v6  ;;  %v2478_v6 = vpack.c.b16 %v2463_v17, %v2462_v32  ;;  %v2688_v13 = vunpack.c.l.b16 %v1784_v33  ;;  %v1770_v17 = vpack.c.bf16 %v1706_v59, %v1706_v59 }
 0x45e   :  { %v2704_v32 = vpack.c.b16 %v2689_v22, %v2688_v13  ;;  %v2464_v24 = vunpack.c.l.b16 %v1770_v17  ;;  %v1786_v13 = vpack.c.bf16 %v1722_v40, %v1722_v40  ;;  %v1644_v22 = vadd.f32 %v5028_v58, %v1577_v36 }
 0x460   :  { %v2079_v51 = vpop.f32.mrf.mxu3  ;;  %v1708_v17 = vmax.f32 %v1644_v22, 0.0 }
 0x461   :  { %v2161_v19 = vpop.f32.mrf.mxu0  ;;  %v6121_v51 = vld [vmem:[#allocation28_spill] sm:$0xff] }
 0x462   :  { %v2120_v38 = vpop.f32.mrf.mxu2  ;;  %v1659_v19 = vadd.f32 %v5028_v58, %v1592_v39  ;;  %v1578_v57 = vmul.f32 %v5006_v31, %v6121_v51  ;;  %v1772_v54 = vpack.c.bf16 %v1708_v17, %v1708_v17 }
 0x463   :  { %v1771_v38 = vpack.c.bf16 %v1707_v61, %v1707_v61 }
 0x464   :  { %v1723_v11 = vmax.f32 %v1659_v19, 0.0  ;;  %v1645_v39 = vadd.f32 %v5028_v58, %v1578_v57  ;;  %v1593_v19 = vmul.f32 %v5006_v31, %v4752_v26 }
 0x465   :  { %2582 = vmatmul.bf16.vlgmr.msrb.gmra.mxu3 %v2478_v6  ;;  %v2465_v33 = vunpack.c.l.b16 %v1771_v38 }
 0x466   :  { %v1709_v38 = vmax.f32 %v1645_v39, 0.0  ;;  %v1579_v39 = vmul.f32 %v5006_v31, %v6075_v25  ;;  %v1596_v25 = vmul.f32 %v5006_v31, %v4823_v27 }
 0x467   :  { %2623 = vmatmul.bf16.vlgmr.msra.gmra.mxu2 %v2478_v6  ;;  %v1787_v6 = vpack.c.bf16 %v1723_v11, %v1723_v11  ;;  %v2479_v59 = vpack.c.b16 %v2465_v33, %v2464_v24 }
 0x468   :  { %v2172_v1 = vpop.f32.mrf.mxu3  ;;  %v1773_v36 = vpack.c.bf16 %v1709_v38, %v1709_v38 }
 0x469   :  { %v2398_v44 = vpop.f32.mrf.mxu0  ;;  %v2691_v9 = vunpack.c.l.b16 %v1787_v6  ;;  %v1660_v1 = vadd.f32 %v5028_v58, %v1593_v19  ;;  %v6122_v19 = vld [vmem:[#allocation30_spill] sm:$0xff] }
 0x46a   :  { %v5570_v46 = vpop.f32.mrf.mxu2  ;;  %v2690_v44 = vunpack.c.l.b16 %v1786_v13  ;;  %v2467_v13 = vunpack.c.l.b16 %v1773_v36 }
 0x46b   :  { %v1724_v51 = vmax.f32 %v1660_v1, 0.0 }
 0x46c   :  { %2776 = vmatmul.bf16.vlgmr.msrb.gmra.mxu0 %v2704_v32  ;;  %v1594_v32 = vmul.f32 %v5006_v31, %v4768_v45  ;;  %v2705_v33 = vpack.c.b16 %v2691_v9, %v2690_v44  ;;  %v2466_v45 = vunpack.c.l.b16 %v1772_v54  ;;  %v1580_v44 = vmul.f32 %v5006_v31, %v6122_v19 }
 0x46d   :  { %v1595_v54 = vmul.f32 %v5006_v31, %v4795_v43 }
 0x46e   :  { %v1661_v24 = vadd.f32 %v5028_v58, %v1594_v32  ;;  %v1646_v32 = vadd.f32 %v5028_v58, %v1579_v39  ;;  %v1647_v17 = vadd.f32 %v5028_v58, %v1580_v44  ;;  %v2480_v38 = vpack.c.b16 %v2467_v13, %v2466_v45 }
 0x46f   :  { %v1662_v39 = vadd.f32 %v5028_v58, %v1595_v54  ;;  %v1663_v45 = vadd.f32 %v5028_v58, %v1596_v25  ;;  %v1582_v54 = vmul.f32 %v5006_v31, %v6124_v55 }
 0x470   :  { %v5584_v61 = vpop.f32.mrf.mxu3  ;;  %v1725_v26 = vmax.f32 %v1661_v24, 0.0  ;;  %v1710_v36 = vmax.f32 %v1646_v32, 0.0  ;;  %v1711_v19 = vmax.f32 %v1647_v17, 0.0 }
 0x471   :  { %v5574_v7 = vpop.f32.mrf.mxu0  ;;  %v1727_v52 = vmax.f32 %v1663_v45, 0.0 }
 0x472   :  { %v5576_v30 = vpop.f32.mrf.mxu2  ;;  %v1789_v9 = vpack.c.bf16 %v1725_v26, %v1725_v26  ;;  %v1774_v44 = vpack.c.bf16 %v1710_v36, %v1710_v36 }
 0x474   :  { %v2468_v28 = vunpack.c.l.b16 %v1774_v44 }
 0x475   :  { %2587 = vmatmul.bf16.gmra.mxu3 %v2479_v59 }
 0x477   :  { %2628 = vmatmul.bf16.gmra.mxu2 %v2479_v59  ;;  %v1788_v59 = vpack.c.bf16 %v1724_v51, %v1724_v51 }
 0x478   :  { %v5596_v57 = vpop.f32.mrf.mxu3 }
 0x479   :  { %v5590_v40 = vpop.f32.mrf.mxu0  ;;  %v2692_v24 = vunpack.c.l.b16 %v1788_v59  ;;  %v1775_v59 = vpack.c.bf16 %v1711_v19, %v1711_v19 }
 0x47a   :  { %v5592_v11 = vpop.f32.mrf.mxu2 }
 0x47b   :  { %v2469_v27 = vunpack.c.l.b16 %v1775_v59 }
 0x47c   :  { %2781 = vmatmul.bf16.gmra.mxu0 %v2705_v33  ;;  %v2693_v33 = vunpack.c.l.b16 %v1789_v9  ;;  %v1726_v9 = vmax.f32 %v1662_v39, 0.0 }
 0x47d   :  { %v2481_v36 = vpack.c.b16 %v2469_v27, %v2468_v28 }
 0x47e   :  { %v2706_v13 = vpack.c.b16 %v2693_v33, %v2692_v24  ;;  %v1790_v25 = vpack.c.bf16 %v1726_v9, %v1726_v9  ;;  %v1791_v24 = vpack.c.bf16 %v1727_v52, %v1727_v52  ;;  %v1649_v33 = vadd.f32 %v5028_v58, %v1582_v54 }
 0x480   :  { %v5608_v1 = vpop.f32.mrf.mxu3  ;;  %v2694_v39 = vunpack.c.l.b16 %v1790_v25  ;;  %v2695_v45 = vunpack.c.l.b16 %v1791_v24  ;;  %v1713_v59 = vmax.f32 %v1649_v33, 0.0  ;;  %v1584_v33 = vmul.f32 %v5006_v31, %v4497_v50 }
 0x481   :  { %v5598_v6 = vpop.f32.mrf.mxu0 }
 0x482   :  { %v5600_v22 = vpop.f32.mrf.mxu2  ;;  %v1777_v27 = vpack.c.bf16 %v1713_v59, %v1713_v59 }
 0x484   :  { %v2471_v24 = vunpack.c.l.b16 %v1777_v27 }
 0x485   :  { %2592 = vmatmul.bf16.gmra.mxu3 %v2480_v38 }
 0x487   :  { %2633 = vmatmul.bf16.gmra.mxu2 %v2480_v38 }
 0x488   :  { %v5618_v43 = vpop.f32.mrf.mxu3 }
 0x489   :  { %v5614_v51 = vpop.f32.mrf.mxu0 }
 0x48a   :  { %v2367_v26 = vpop.f32.mrf.mxu2 }
 0x48b   :  { %v1581_v26 = vmul.f32 %v5006_v31, %v6123_v5  ;;  %v1598_v5 = vmul.f32 %v5006_v31, %v4875_v56 }
 0x48c   :  { %2786 = vmatmul.bf16.gmra.mxu0 %v2706_v13  ;;  %v1597_v13 = vmul.f32 %v5006_v31, %v4852_v47 }
 0x48d   :  { %v1648_v38 = vadd.f32 %v5028_v58, %v1581_v26 }
 0x48e   :  { %v1664_v52 = vadd.f32 %v5028_v58, %v1597_v13 }
 0x48f   :  { %v1712_v44 = vmax.f32 %v1648_v38, 0.0  ;;  %v1583_v38 = vmul.f32 %v5006_v31, %v4461_v3  ;;  %v1600_v3 = vmul.f32 %v5006_v31, %v4698_v49 }
 0x490   :  { %v2183_v19 = vpop.f32.mrf.mxu3  ;;  %v1728_v26 = vmax.f32 %v1664_v52, 0.0 }
 0x491   :  { %v2409_v32 = vpop.f32.mrf.mxu0  ;;  %v1776_v28 = vpack.c.bf16 %v1712_v44, %v1712_v44 }
 0x492   :  { %v2368_v17 = vpop.f32.mrf.mxu2  ;;  %v1665_v32 = vadd.f32 %v5028_v58, %v1598_v5  ;;  %v1792_v5 = vpack.c.bf16 %v1728_v26, %v1728_v26  ;;  %v1667_v26 = vadd.f32 %v5028_v58, %v1600_v3  ;;  %v1601_v3 = vmul.f32 %v5006_v31, %v4722_v10 }
 0x493   :  { %v2707_v17 = vpack.c.b16 %v2695_v45, %v2694_v39  ;;  %v2470_v47 = vunpack.c.l.b16 %v1776_v28  ;;  %v1651_v39 = vadd.f32 %v5028_v58, %v1584_v33  ;;  %v1585_v33 = vmul.f32 %v5006_v31, %v4533_v4 }
 0x494   :  { %v1729_v54 = vmax.f32 %v1665_v32, 0.0  ;;  %v1602_v4 = vmul.f32 %v5006_v31, %v4744_v0 }
 0x495   :  { %2595 = vmatmul.bf16.gmra.mxu3 %v2481_v36  ;;  %v2482_v45 = vpack.c.b16 %v2471_v24, %v2470_v47  ;;  %v1715_v32 = vmax.f32 %v1651_v39, 0.0  ;;  %v1652_v39 = vadd.f32 %v5028_v58, %v1585_v33  ;;  %v1587_v33 = vmul.f32 %v5006_v31, %v4613_v41 }
 0x496   :  { %v1793_v13 = vpack.c.bf16 %v1729_v54, %v1729_v54 }
 0x497   :  { %2636 = vmatmul.bf16.gmra.mxu2 %v2481_v36  ;;  %v1650_v36 = vadd.f32 %v5028_v58, %v1583_v38 }
 0x498   :  { %v2185_v25 = vpop.f32.mrf.mxu3  ;;  %v2697_v44 = vunpack.c.l.b16 %v1793_v13  ;;  %v1586_v13 = vmul.f32 %v5006_v31, %v4577_v42 }
 0x499   :  { %v2411_v55 = vpop.f32.mrf.mxu0  ;;  %v1714_v52 = vmax.f32 %v1650_v36, 0.0  ;;  %v1779_v25 = vpack.c.bf16 %v1715_v32, %v1715_v32 }
 0x49a   :  { %v2370_v9 = vpop.f32.mrf.mxu2  ;;  %v2696_v55 = vunpack.c.l.b16 %v1792_v5 }
 0x49b   :  { %v1599_v9 = vmul.f32 %v5006_v31, %v4676_v16  ;;  %v1778_v54 = vpack.c.bf16 %v1714_v52, %v1714_v52  ;;  %v1731_v16 = vmax.f32 %v1667_v26, 0.0  ;;  %v1716_v52 = vmax.f32 %v1652_v39, 0.0 }
 0x49c   :  { %2789 = vmatmul.bf16.gmra.mxu0 %v2707_v17  ;;  %v2708_v27 = vpack.c.b16 %v2697_v44, %v2696_v55  ;;  %v1669_v26 = vadd.f32 %v5028_v58, %v1602_v4  ;;  %v1654_v39 = vadd.f32 %v5028_v58, %v1587_v33  ;;  %v1603_v4 = vmul.f32 %v5006_v31, %v4763_v63 }
 0x49d   :  { %v1666_v28 = vadd.f32 %v5028_v58, %v1599_v9  ;;  %v1795_v36 = vpack.c.bf16 %v1731_v16, %v1731_v16 }
 0x49f   :  { %v1730_v47 = vmax.f32 %v1666_v28, 0.0  ;;  %v2699_v9 = vunpack.c.l.b16 %v1795_v36  ;;  %v1668_v28 = vadd.f32 %v5028_v58, %v1601_v3 }
 0x4a0   :  { %v2186_v59 = vpop.f32.mrf.mxu3 }
 0x4a1   :  { %v2412_v19 = vpop.f32.mrf.mxu0  ;;  %v1794_v5 = vpack.c.bf16 %v1730_v47, %v1730_v47  ;;  %v1732_v47 = vmax.f32 %v1668_v28, 0.0 }
 0x4a2   :  { %v2371_v56 = vpop.f32.mrf.mxu2  ;;  %v2472_v19 = vunpack.c.l.b16 %v1778_v54  ;;  %v1780_v54 = vpack.c.bf16 %v1716_v52, %v1716_v52  ;;  %v6125_v52 = vld [vmem:[#allocation32_spill] sm:$0xff] }
 0x4a3   :  { %v2473_v56 = vunpack.c.l.b16 %v1779_v25  ;;  %v2698_v55 = vunpack.c.l.b16 %v1794_v5  ;;  %v1796_v5 = vpack.c.bf16 %v1732_v47, %v1732_v47  ;;  %v1604_v41 = vmul.f32 %v5006_v31, %v6125_v52 }
 0x4a4   :  { %v2474_v0 = vunpack.c.l.b16 %v1780_v54 }
 0x4a5   :  { %2598 = vmatmul.bf16.gmra.mxu3 %v2482_v45  ;;  %v2483_v44 = vpack.c.b16 %v2473_v56, %v2472_v19 }
 0x4a7   :  { %2639 = vmatmul.bf16.gmra.mxu2 %v2482_v45  ;;  %v1653_v45 = vadd.f32 %v5028_v58, %v1586_v13  ;;  %v1588_v13 = vmul.f32 %v5006_v31, %v4640_v8 }
 0x4a8   :  { %v2188_v24 = vpop.f32.mrf.mxu3 }
 0x4a9   :  { %v2414_v50 = vpop.f32.mrf.mxu0  ;;  %v1717_v42 = vmax.f32 %v1653_v45, 0.0  ;;  %v1733_v24 = vmax.f32 %v1669_v26, 0.0  ;;  %v1655_v45 = vadd.f32 %v5028_v58, %v1588_v13  ;;  %v1670_v26 = vadd.f32 %v5028_v58, %v1603_v4 }
 0x4aa   :  { %v5642_v17 = vpop.f32.mrf.mxu2 }
 0x4ab   :  { %v1781_v25 = vpack.c.bf16 %v1717_v42, %v1717_v42  ;;  %v1797_v36 = vpack.c.bf16 %v1733_v24, %v1733_v24  ;;  %v1718_v42 = vmax.f32 %v1654_v39, 0.0  ;;  %v1719_v8 = vmax.f32 %v1655_v45, 0.0 }
 0x4ac   :  { %2792 = vmatmul.bf16.gmra.mxu0 %v2708_v27  ;;  %v2709_v27 = vpack.c.b16 %v2699_v9, %v2698_v55  ;;  %v2700_v9 = vunpack.c.l.b16 %v1796_v5 }
 0x4ad   :  { %v2475_v16 = vunpack.c.l.b16 %v1781_v25  ;;  %v2701_v3 = vunpack.c.l.b16 %v1797_v36  ;;  %v1671_v25 = vadd.f32 %v5028_v58, %v1604_v41  ;;  %v1782_v47 = vpack.c.bf16 %v1718_v42, %v1718_v42 }
 0x4ae   :  { %v1783_v24 = vpack.c.bf16 %v1719_v8, %v1719_v8 }
 0x4af   :  { %v2710_v54 = vpack.c.b16 %v2701_v3, %v2700_v9  ;;  %v1735_v63 = vmax.f32 %v1671_v25, 0.0  ;;  %v2476_v33 = vunpack.c.l.b16 %v1782_v47  ;;  %v2809_v47 = vadd.f32 %v5570_v46, %v5381_v29 }
 0x4b0   :  { %v5656_v59 = vpop.f32.mrf.mxu3  ;;  %v2477_v31 = vunpack.c.l.b16 %v1783_v24 }
 0x4b1   :  { %v5646_v49 = vpop.f32.mrf.mxu0  ;;  %v1799_v39 = vpack.c.bf16 %v1735_v63, %v1735_v63 }
 0x4b2   :  { %v5648_v38 = vpop.f32.mrf.mxu2  ;;  %v2485_v45 = vpack.c.b16 %v2477_v31, %v2476_v33  ;;  %v2833_v33 = vadd.f32 %v5574_v7, %v5383_v62  ;;  %v2834_v62 = vadd.f32 %v5590_v40, %v5398_v23 }
 0x4b3   :  { %v2703_v3 = vunpack.c.l.b16 %v1799_v39 }
 0x4b5   :  { %2603 = vmatmul.bf16.gmra.mxu3 %v2483_v44 }
 0x4b7   :  { %2644 = vmatmul.bf16.gmra.mxu2 %v2483_v44  ;;  %v2484_v44 = vpack.c.b16 %v2475_v16, %v2474_v0  ;;  %v1734_v0 = vmax.f32 %v1670_v26, 0.0 }
 0x4b8   :  { %v5668_v10 = vpop.f32.mrf.mxu3 }
 0x4b9   :  { %v5662_v32 = vpop.f32.mrf.mxu0  ;;  %v1798_v36 = vpack.c.bf16 %v1734_v0, %v1734_v0 }
 0x4ba   :  { %v5664_v50 = vpop.f32.mrf.mxu2 }
 0x4bb   :  { %v2702_v9 = vunpack.c.l.b16 %v1798_v36 }
 0x4bc   :  { %2797 = vmatmul.bf16.gmra.mxu0 %v2709_v27 }
 0x4bd   :  { %v2711_v4 = vpack.c.b16 %v2703_v3, %v2702_v9 }
 0x4c0   :  { %v5680_v55 = vpop.f32.mrf.mxu3 }
 0x4c1   :  { %v5670_v19 = vpop.f32.mrf.mxu0 }
 0x4c2   :  { %v5672_v56 = vpop.f32.mrf.mxu2 }
 0x4c5   :  { %2608 = vmatmul.bf16.gmra.mxu3 %v2484_v44 }
 0x4c7   :  { %2649 = vmatmul.bf16.gmra.mxu2 %v2484_v44 }
 0x4c8   :  { %v5690_v16 = vpop.f32.mrf.mxu3 }
 0x4c9   :  { %v5686_v28 = vpop.f32.mrf.mxu0 }
 0x4ca   :  { %v2383_v27 = vpop.f32.mrf.mxu2 }
 0x4cc   :  { %2802 = vmatmul.bf16.gmra.mxu0 %v2710_v54 }
 0x4d0   :  { %v2199_v52 = vpop.f32.mrf.mxu3 }
 0x4d1   :  { %v2425_v13 = vpop.f32.mrf.mxu0 }
 0x4d2   :  { %v2384_v5 = vpop.f32.mrf.mxu2 }
 0x4d5   :  { %2611 = vmatmul.bf16.gmra.mxu3 %v2485_v45 }
 0x4d7   :  { %2652 = vmatmul.bf16.gmra.mxu2 %v2485_v45 }
 0x4d8   :  { %v2201_v41 = vpop.f32.mrf.mxu3 }
 0x4d9   :  { %v2427_v58 = vpop.f32.mrf.mxu0 }
 0x4da   :  { %v2386_v44 = vpop.f32.mrf.mxu2 }
 0x4dc   :  { %2805 = vmatmul.bf16.gmra.mxu0 %v2711_v4 }
 0x4e0   :  { %v2202_v27 = vpop.f32.mrf.mxu3 }
 0x4e1   :  { %v2428_v42 = vpop.f32.mrf.mxu0 }
 0x4e2   :  { %v2387_v8 = vpop.f32.mrf.mxu2 }
 0x4e8   :  { %v2583_v0 = vpop.f32.mrf.mxu3 }
 0x4e9   :  { %v2777_v26 = vpop.f32.mrf.mxu0  ;;  %v2817_v63 = vadd.f32 %v2809_v47, %v2583_v0 }
 0x4ea   :  { %v2624_v54 = vpop.f32.mrf.mxu2 }
 0x4eb   :  { %v2849_v25 = vadd.f32 %v2624_v54, %v5366_v60  ;;  %v2825_v31 = vadd.f32 %v2817_v63, %v2777_v26  ;;  %v2810_v60 = vadd.f32 %v5576_v30, %v5396_v48 }
 0x4ed   :  { %v2857_v24 = vadd.f32 %v2849_v25, %v5584_v61  ;;  %v2841_v45 = vadd.f32 %v2833_v33, %v2825_v31 }
 0x4ef   :  { %v2873_v13 = vrot.slane %v2857_v24, 1 }
 0x4f0   :  { %v2585_v46 = vpop.f32.mrf.mxu3 }
 0x4f1   :  { %v2779_v5 = vpop.f32.mrf.mxu0  ;;  %v2889_v52 = vadd.f32 %v2873_v13, %v2841_v45  ;;  %v2818_v9 = vadd.f32 %v2810_v60, %v2585_v46 }
 0x4f2   :  { %v2626_v36 = vpop.f32.mrf.mxu2 }
 0x4f3   :  { %v2850_v39 = vadd.f32 %v2626_v36, %v5385_v15  ;;  %v2897_v61 = vpack.c.bf16 %v5151_v53, %v2889_v52  ;;  %v2826_v3 = vadd.f32 %v2818_v9, %v2779_v5  ;;  %v2811_v53 = vadd.f32 %v5592_v11, %v5415_v37 }
 0x4f5   :  { %v2858_v29 = vadd.f32 %v2850_v39, %v5596_v57  ;;  %v2913_v7 = vrot.slane %v2897_v61, 2  ;;  %v2842_v30 = vadd.f32 %v2834_v62, %v2826_v3 }
 0x4f7   :  { %v2874_v58 = vrot.slane %v2858_v29, 1  ;;  %v2924_v48 = vsel %vm2921_vm1, %v2897_v61, %v2913_v7 }
 0x4f8   :  { %2954 = vst [vmem:[%s5793_s13] sm:$0xf] %v2924_v48  ;;  %v2588_v40 = vpop.f32.mrf.mxu3 }
 0x4f9   :  { %v2782_v44 = vpop.f32.mrf.mxu0  ;;  %v2890_v57 = vadd.f32 %v2874_v58, %v2842_v30  ;;  %v2819_v42 = vadd.f32 %v2811_v53, %v2588_v40  ;;  %v6126_v58 = vld [vmem:[#allocation17_spill] sm:$0xff]  ;;  %v6128_v53 = vld [vmem:[#allocation3_spill] sm:$0xff] }
 0x4fa   :  { %v2629_v15 = vpop.f32.mrf.mxu2 }
 0x4fb   :  { %v2851_v4 = vadd.f32 %v2629_v15, %v5400_v35  ;;  %v2898_v41 = vpack.c.bf16 %v5169_v18, %v2890_v57  ;;  %v2835_v35 = vadd.f32 %v5598_v6, %v5417_v2  ;;  %v2827_v27 = vadd.f32 %v2819_v42, %v2782_v44  ;;  %v6127_v44 = vld [vmem:[#allocation8_spill] sm:$0xff] }
 0x4fc   :  { %v2812_v18 = vadd.f32 %v5600_v22, %v5430_v14  ;;  %v2813_v15 = vadd.f32 %v5642_v17, %v6127_v44  ;;  %v2837_v57 = vadd.f32 %v5646_v49, %v6128_v53 }
 0x4fd   :  { %v2859_v23 = vadd.f32 %v2851_v4, %v5608_v1  ;;  %v2914_v8 = vrot.slane %v2898_v41, 2  ;;  %v2843_v37 = vadd.f32 %v2835_v35, %v2827_v27  ;;  %v6129_v35 = vld [vmem:[#allocation34_spill] sm:$0xff] }
 0x4ff   :  { %v2875_v26 = vrot.slane %v2859_v23, 1  ;;  %v2927_v24 = vsel %vm2921_vm1, %v2898_v41, %v2914_v8 }
 0x500   :  { %2955 = vst [vmem:[%s5793_s13 + $0x4] sm:$0xf] %v2927_v24  ;;  %v2590_v6 = vpop.f32.mrf.mxu3 }
 0x501   :  { %v2784_v54 = vpop.f32.mrf.mxu0  ;;  %v2891_v11 = vadd.f32 %v2875_v26, %v2843_v37  ;;  %v2820_v0 = vadd.f32 %v2812_v18, %v2590_v6  ;;  %v6130_v26 = vld [vmem:[#allocation18_spill] sm:$0xff]  ;;  %v6132_v18 = vld [vmem:[#allocation9_spill] sm:$0xff] }
 0x502   :  { %v2631_v25 = vpop.f32.mrf.mxu2  ;;  %v2838_v49 = vadd.f32 %v5662_v32, %v6132_v18 }
 0x503   :  { %v2852_v47 = vadd.f32 %v2631_v25, %v5419_v12  ;;  %v2899_v1 = vpack.c.bf16 %v5188_v34, %v2891_v11  ;;  %v2836_v12 = vadd.f32 %v5614_v51, %v5432_v20  ;;  %v2828_v33 = vadd.f32 %v2820_v0, %v2784_v54 }
 0x504   :  { %v2814_v54 = vadd.f32 %v5648_v38, %v6130_v26 }
 0x505   :  { %v2860_v2 = vadd.f32 %v2852_v47, %v5618_v43  ;;  %v2915_v63 = vrot.slane %v2899_v1, 2  ;;  %v2844_v39 = vadd.f32 %v2836_v12, %v2828_v33  ;;  %v6133_v12 = vld [vmem:[#allocation4_spill] sm:$0xff] }
 0x507   :  { %v2876_v31 = vrot.slane %v2860_v2, 1  ;;  %v2930_v36 = vsel %vm2921_vm1, %v2899_v1, %v2915_v63 }
 0x508   :  { %2956 = vst [vmem:[%s5793_s13 + $0x8] sm:$0xf] %v2930_v36  ;;  %v2593_v22 = vpop.f32.mrf.mxu3  ;;  %v6135_v36 = vld [vmem:[#allocation33_spill] sm:$0xff] }
 0x509   :  { %v2787_v13 = vpop.f32.mrf.mxu0  ;;  %v2892_v14 = vadd.f32 %v2876_v31, %v2844_v39  ;;  %v6136_v22 = vld [vmem:[#allocation19_spill] sm:$0xff] }
 0x50a   :  { %v2634_v5 = vpop.f32.mrf.mxu2 }
 0x50b   :  { %v2900_v34 = vpack.c.bf16 %v5202_v21, %v2892_v14 }
 0x50d   :  { %v2916_v43 = vrot.slane %v2900_v34, 2 }
 0x50f   :  { %v2933_v20 = vsel %vm2921_vm1, %v2900_v34, %v2916_v43  ;;  %v2839_v34 = vadd.f32 %v5670_v19, %v6136_v22 }
 0x510   :  { %2957 = vst [vmem:[%s5793_s13 + $0xc] sm:$0xf] %v2933_v20  ;;  %v2594_v51 = vpop.f32.mrf.mxu3 }
 0x511   :  { %v2788_v45 = vpop.f32.mrf.mxu0 }
 0x512   :  { %v2635_v60 = vpop.f32.mrf.mxu2 }
 0x518   :  { %v2596_v46 = vpop.f32.mrf.mxu3 }
 0x519   :  { %v2790_v52 = vpop.f32.mrf.mxu0 }
 0x51a   :  { %v2637_v29 = vpop.f32.mrf.mxu2  ;;  %v6137_v52 = vld [vmem:[#allocation38_spill] sm:$0xff] }
 0x520   :  { %v2597_v62 = vpop.f32.mrf.mxu3 }
 0x521   :  { %v2791_v61 = vpop.f32.mrf.mxu0 }
 0x522   :  { %v2638_v9 = vpop.f32.mrf.mxu2 }
 0x528   :  { %v2599_v48 = vpop.f32.mrf.mxu3 }
 0x529   :  { %v2793_v7 = vpop.f32.mrf.mxu0  ;;  %v2821_v30 = vadd.f32 %v2813_v15, %v2599_v48 }
 0x52a   :  { %v2640_v3 = vpop.f32.mrf.mxu2 }
 0x52b   :  { %v2853_v21 = vadd.f32 %v2640_v3, %v6126_v58  ;;  %v2829_v23 = vadd.f32 %v2821_v30, %v2793_v7  ;;  %v6139_v7 = vld [vmem:[#allocation16_spill] sm:$0xff] }
 0x52d   :  { %v2861_v4 = vadd.f32 %v2853_v21, %v5656_v59  ;;  %v2845_v27 = vadd.f32 %v2837_v57, %v2829_v23  ;;  %v6131_v59 = vld [vmem:[#allocation2_spill] sm:$0xff]  ;;  %v6140_v21 = vld [vmem:[#allocation5_spill] sm:$0xff] }
 0x52e   :  { %v2840_v44 = vadd.f32 %v5686_v28, %v6140_v21 }
 0x52f   :  { %v2877_v40 = vrot.slane %v2861_v4, 1 }
 0x530   :  { %v2601_v47 = vpop.f32.mrf.mxu3 }
 0x531   :  { %v2795_v41 = vpop.f32.mrf.mxu0  ;;  %v2893_v25 = vadd.f32 %v2877_v40, %v2845_v27  ;;  %v2822_v37 = vadd.f32 %v2814_v54, %v2601_v47  ;;  %v6141_v40 = vld [vmem:[#allocation7_spill] sm:$0xff] }
 0x532   :  { %v2642_v42 = vpop.f32.mrf.mxu2 }
 0x533   :  { %v2854_v8 = vadd.f32 %v2642_v42, %v6129_v35  ;;  %v2901_v24 = vpack.c.bf16 %v6131_v59, %v2893_v25  ;;  %v2830_v2 = vadd.f32 %v2822_v37, %v2795_v41 }
 0x535   :  { %v2862_v17 = vadd.f32 %v2854_v8, %v5668_v10  ;;  %v2917_v11 = vrot.slane %v2901_v24, 2  ;;  %v2846_v38 = vadd.f32 %v2838_v49, %v2830_v2  ;;  %v6134_v10 = vld [vmem:[#allocation35_spill] sm:$0xff] }
 0x536   :  { %v2815_v31 = vadd.f32 %v5664_v50, %v6134_v10 }
 0x537   :  { %v2878_v6 = vrot.slane %v2862_v17, 1  ;;  %v2936_v33 = vsel %vm2921_vm1, %v2901_v24, %v2917_v11 }
 0x538   :  { %2958 = vst [vmem:[%s5793_s13 + $0x10] sm:$0xf] %v2936_v33  ;;  %v2604_v5 = vpop.f32.mrf.mxu3 }
 0x539   :  { %v2798_v1 = vpop.f32.mrf.mxu0  ;;  %v2894_v13 = vadd.f32 %v2878_v6, %v2846_v38  ;;  %v2823_v14 = vadd.f32 %v2815_v31, %v2604_v5 }
 0x53a   :  { %v2645_v0 = vpop.f32.mrf.mxu2 }
 0x53b   :  { %v2855_v63 = vadd.f32 %v2645_v0, %v6133_v12  ;;  %v2902_v39 = vpack.c.bf16 %v6135_v36, %v2894_v13  ;;  %v2831_v45 = vadd.f32 %v2823_v14, %v2798_v1 }
 0x53d   :  { %v2863_v32 = vadd.f32 %v2855_v63, %v5680_v55  ;;  %v2918_v43 = vrot.slane %v2902_v39, 2  ;;  %v2847_v50 = vadd.f32 %v2839_v34, %v2831_v45  ;;  %v6138_v55 = vld [vmem:[#allocation10_spill] sm:$0xff] }
 0x53e   :  { %v2816_v61 = vadd.f32 %v5672_v56, %v6138_v55 }
 0x53f   :  { %v2879_v60 = vrot.slane %v2863_v32, 1  ;;  %v2939_v46 = vsel %vm2921_vm1, %v2902_v39, %v2918_v43 }
 0x540   :  { %2959 = vst [vmem:[%s5793_s13 + $0x14] sm:$0xf] %v2939_v46  ;;  %v2606_v62 = vpop.f32.mrf.mxu3 }
 0x541   :  { %v2800_v20 = vpop.f32.mrf.mxu0  ;;  %v2895_v9 = vadd.f32 %v2879_v60, %v2847_v50  ;;  %v2824_v58 = vadd.f32 %v2816_v61, %v2606_v62 }
 0x542   :  { %v2647_v51 = vpop.f32.mrf.mxu2 }
 0x543   :  { %v2856_v29 = vadd.f32 %v2647_v51, %v6137_v52  ;;  %v2903_v3 = vpack.c.bf16 %v6139_v7, %v2895_v9  ;;  %v2832_v4 = vadd.f32 %v2824_v58, %v2800_v20 }
 0x545   :  { %v2864_v19 = vadd.f32 %v2856_v29, %v5690_v16  ;;  %v2919_v15 = vrot.slane %v2903_v3, 2  ;;  %v2848_v23 = vadd.f32 %v2840_v44, %v2832_v4 }
 0x547   :  { %v2880_v48 = vrot.slane %v2864_v19, 1  ;;  %v2942_v57 = vsel %vm2921_vm1, %v2903_v3, %v2919_v15 }
 0x548   :  { %2960 = vst [vmem:[%s5793_s13 + $0x18] sm:$0xf] %v2942_v57  ;;  %v2609_v16 = vpop.f32.mrf.mxu3 }
 0x549   :  { %v2803_v30 = vpop.f32.mrf.mxu0  ;;  %v2896_v56 = vadd.f32 %v2880_v48, %v2848_v23 }
 0x54a   :  { %v2650_v53 = vpop.f32.mrf.mxu2 }
 0x54b   :  { %v2904_v41 = vpack.c.bf16 %v6141_v40, %v2896_v56 }
 0x54d   :  { %v2920_v42 = vrot.slane %v2904_v41, 2 }
 0x54f   :  { %v2945_v28 = vsel %vm2921_vm1, %v2904_v41, %v2920_v42 }
 0x550   :  { %2961 = vst [vmem:[%s5793_s13 + $0x1c] sm:$0xf] %v2945_v28  ;;  %v2610_v27 = vpop.f32.mrf.mxu3 }
 0x551   :  { %v2804_v35 = vpop.f32.mrf.mxu0 }
 0x552   :  { %v2651_v8 = vpop.f32.mrf.mxu2 }
 0x558   :  { %v2612_v25 = vpop.f32.mrf.mxu3 }
 0x559   :  { %v2806_v26 = vpop.f32.mrf.mxu0 }
 0x55a   :  { %v2653_v54 = vpop.f32.mrf.mxu2 }
 0x560   :  { %v2613_v59 = vpop.f32.mrf.mxu3 }
 0x561   :  { %v2807_v17 = vpop.f32.mrf.mxu0 }
 0x562   :  { %v2654_v47 = vpop.f32.mrf.mxu2 }

</bundles_post_ra>
